<compile_context>
chip_gen: v7x
topology: tpu7x:2x2x1
jax: 0.10.0
libtpu: 0.0.40
codegen_flags: <defaults>
</compile_context>

<pallas_src>
from collections import OrderedDict

import jax
import jax.numpy as jnp
from jax.experimental import pallas as pl
from jax.experimental.pallas import tpu as pltpu


# ----------------------------------------------------------------------------
# In-kernel building blocks (trace-time helpers, all shapes static)
# ----------------------------------------------------------------------------
def _conv3x3_bn_relu(x, w_ref, shift_ref):
    """3x3 'same' conv (9 shifted MXU matmuls) + folded-BN shift + ReLU.

    x:         (1, H, W, Cin) f32 value (register/VMEM resident)
    w_ref:     (9, Cin, Cout) bf16 ref, BN scale already folded in
    shift_ref: (1, Cout) f32 ref  (beta - mean * scale)
    returns:   (1, H, W, Cout) f32 value
    """
    _, H, W, Cin = x.shape
    Cout = w_ref.shape[-1]
    M = H * W
    x2d = x.reshape(M, Cin)

    # Row / column index of every flattened pixel (built 4-D, then collapsed so
    # no integer div/mod is needed in-kernel).
    y_idx = jax.lax.broadcasted_iota(jnp.int32, (1, H, W, Cin), 1).reshape(M, Cin)
    x_idx = jax.lax.broadcasted_iota(jnp.int32, (1, H, W, Cin), 2).reshape(M, Cin)

    acc = jnp.zeros((M, Cout), jnp.float32)
    for dy in range(3):
        for dx in range(3):
            # Tap (dy, dx) reads pixel (y + dy - 1, x + dx - 1): realized as a
            # circular roll of the flattened rows + zero-mask of the borders
            # (the mask also kills every wrapped-around element).
            shift = ((1 - dy) * W + (1 - dx)) % M
            tap = x2d if shift == 0 else pltpu.roll(x2d, shift, 0)

            valid = None
            if dy == 0:
                valid = y_idx > 0
            elif dy == 2:
                valid = y_idx < H - 1
            if dx == 0:
                cond = x_idx > 0
                valid = cond if valid is None else (valid & cond)
            elif dx == 2:
                cond = x_idx < W - 1
                valid = cond if valid is None else (valid & cond)
            if valid is not None:
                tap = jnp.where(valid, tap, 0.0)

            acc = acc + jnp.dot(tap.astype(jnp.bfloat16), w_ref[dy * 3 + dx],
                                preferred_element_type=jnp.float32)

    y = jnp.maximum(acc + shift_ref[...], 0.0)
    return y.reshape(1, H, W, Cout)


def _maxpool2_from_ref(conv_ref):
    """2x2 / stride-2 max pool, reading the conv output staged in VMEM.

    conv_ref: (1, H, W, C) ref.  Returns (1, H//2, W//2, C) f32 value.
    """
    _, H, W, C = conv_ref.shape
    Hh, Wh = H // 2, W // 2
    # Even / odd columns via strided sublane loads; row pairs via a
    # leading-dim split + leading-axis max.
    even = conv_ref[:, :, pl.ds(0, Wh, stride=2), :]   # (1, H, Wh, C)
    odd = conv_ref[:, :, pl.ds(1, Wh, stride=2), :]
    wmax = jnp.maximum(even, odd)
    wmax = wmax.reshape(1, Hh, 2, Wh, C)
    return jnp.maximum(wmax[:, :, 0], wmax[:, :, 1])   # (1, Hh, Wh, C)


def _fused_forward_kernel(x_ref, w0_ref, s0_ref, w1_ref, s1_ref, w2_ref, s2_ref,
                          wfc_ref, bfc_ref,
                          prep_ref, conv1_ref, pool1_ref, conv2_ref, pool2_ref,
                          gpool_ref, logits_ref):
    # One grid step == one image; everything below stays in VMEM/registers.
    x = x_ref[...]                                      # (1, H, W, C0) f32

    # ---- prep : conv(C0->C1) + BN + ReLU -------------------------------
    y0 = _conv3x3_bn_relu(x, w0_ref, s0_ref)
    prep_ref[...] = y0

    # ---- layer1 : conv(C1->C2) + BN + ReLU + maxpool2 ------------------
    y1 = _conv3x3_bn_relu(y0, w1_ref, s1_ref)
    conv1_ref[...] = y1
    p1 = _maxpool2_from_ref(conv1_ref)
    pool1_ref[...] = p1

    # ---- layer2 : conv(C2->C3) + BN + ReLU + maxpool2 ------------------
    y2 = _conv3x3_bn_relu(p1, w2_ref, s2_ref)
    conv2_ref[...] = y2
    p2 = _maxpool2_from_ref(conv2_ref)
    pool2_ref[...] = p2

    # ---- global max pool + scaled linear -------------------------------
    gp = jnp.max(jnp.max(p2, axis=1), axis=1)           # (1, C3)
    gpool_ref[...] = gp[:, None, :]
    logits = (jnp.dot(gp, wfc_ref[...], preferred_element_type=jnp.float32)
              + bfc_ref[...]) * 0.125
    logits_ref[...] = logits[:, None, :]


# ----------------------------------------------------------------------------
# pallas_call wrapper
# ----------------------------------------------------------------------------
def _fused_forward(x_nhwc, w0, s0, w1, s1, w2, s2, wfc, bfc):
    B, H, W, C0 = x_nhwc.shape
    C1, C2, C3 = w0.shape[-1], w1.shape[-1], w2.shape[-1]
    NC = wfc.shape[-1]
    H2, W2, H4, W4 = H // 2, W // 2, H // 4, W // 4

    out_shape = (
        jax.ShapeDtypeStruct((B, H, W, C1), jnp.float32),    # prep
        jax.ShapeDtypeStruct((B, H, W, C2), jnp.float32),    # layer1_conv
        jax.ShapeDtypeStruct((B, H2, W2, C2), jnp.float32),  # layer1_pool
        jax.ShapeDtypeStruct((B, H2, W2, C3), jnp.float32),  # layer2_conv
        jax.ShapeDtypeStruct((B, H4, W4, C3), jnp.float32),  # layer2_pool
        jax.ShapeDtypeStruct((B, 1, C3), jnp.float32),       # pool (global max)
        jax.ShapeDtypeStruct((B, 1, NC), jnp.float32),       # logits
    )
    in_specs = [
        pl.BlockSpec((1, H, W, C0), lambda b: (b, 0, 0, 0)),
        pl.BlockSpec((9, C0, C1), lambda b: (0, 0, 0)),
        pl.BlockSpec((1, C1), lambda b: (0, 0)),
        pl.BlockSpec((9, C1, C2), lambda b: (0, 0, 0)),
        pl.BlockSpec((1, C2), lambda b: (0, 0)),
        pl.BlockSpec((9, C2, C3), lambda b: (0, 0, 0)),
        pl.BlockSpec((1, C3), lambda b: (0, 0)),
        pl.BlockSpec((C3, NC), lambda b: (0, 0)),
        pl.BlockSpec((1, NC), lambda b: (0, 0)),
    ]
    out_specs = (
        pl.BlockSpec((1, H, W, C1), lambda b: (b, 0, 0, 0)),
        pl.BlockSpec((1, H, W, C2), lambda b: (b, 0, 0, 0)),
        pl.BlockSpec((1, H2, W2, C2), lambda b: (b, 0, 0, 0)),
        pl.BlockSpec((1, H2, W2, C3), lambda b: (b, 0, 0, 0)),
        pl.BlockSpec((1, H4, W4, C3), lambda b: (b, 0, 0, 0)),
        pl.BlockSpec((1, 1, C3), lambda b: (b, 0, 0)),
        pl.BlockSpec((1, 1, NC), lambda b: (b, 0, 0)),
    )
    return pl.pallas_call(
        _fused_forward_kernel,
        out_shape=out_shape,
        grid=(B,),
        in_specs=in_specs,
        out_specs=out_specs,
        compiler_params=pltpu.CompilerParams(
            dimension_semantics=("parallel",)),
    )(x_nhwc, w0, s0, w1, s1, w2, s2, wfc, bfc)


def _fold_conv_bn(w, gamma, beta, mean, var, eps=1e-5):
    """Fold inference-mode BatchNorm into the conv weights.

    w: torch layout (Cout, Cin, 3, 3) -> (9, Cin, Cout) bf16, scale folded in.
    Returns (w9_bf16, shift_f32) with shift = beta - mean * scale.
    """
    # TODO(synk): PyTorch BatchNorm2d defaults to train-mode batch statistics;
    # here we use inference-mode running statistics.
    cout, cin = w.shape[0], w.shape[1]
    scale = gamma / jnp.sqrt(var + eps)
    shift = beta - mean * scale
    w9 = jnp.transpose(w, (2, 3, 1, 0)).reshape(9, cin, cout)
    w9 = (w9 * scale[None, None, :]).astype(jnp.bfloat16)
    return w9, shift.reshape(1, cout).astype(jnp.float32)


@jax.jit
def _forward(params, x_nchw):
    w0, s0 = _fold_conv_bn(params["prep_w"], *params["prep_bn"])
    w1, s1 = _fold_conv_bn(params["l1_w"], *params["l1_bn"])
    w2, s2 = _fold_conv_bn(params["l2_w"], *params["l2_bn"])
    wfc = params["fc_w"].T.astype(jnp.float32)            # (Cin, Cout)
    bfc = params["fc_b"].reshape(1, -1).astype(jnp.float32)

    x_nhwc = jnp.transpose(x_nchw, (0, 2, 3, 1)).astype(jnp.float32)
    prep, conv1, pool1, conv2, pool2, gpool, logits = _fused_forward(
        x_nhwc, w0, s0, w1, s1, w2, s2, wfc, bfc)

    def to_nchw(t):
        return jnp.transpose(t, (0, 3, 1, 2))

    # Cache entries are returned in PyTorch's NCHW layout (tiny post-kernel
    # transposes; the fused kernel itself never leaves NHWC/VMEM).
    return OrderedDict([
        ("prep", to_nchw(prep)),
        ("layer1_conv", to_nchw(conv1)),
        ("layer1_pool", to_nchw(pool1)),
        ("layer2_conv", to_nchw(conv2)),
        ("layer2_pool", to_nchw(pool2)),
        ("pool", gpool.reshape(gpool.shape[0], -1)),
        ("logits", logits.reshape(logits.shape[0], -1)),
    ])


# ----------------------------------------------------------------------------
# Graph-executor Network (mirrors torch_backend.Network.forward semantics)
# ----------------------------------------------------------------------------
class Network:
    """The whole node graph runs inside one fused Pallas kernel; the returned
    cache contains the inputs plus every node output (NCHW), like the PyTorch
    reference's ``self.cache``."""

    def __init__(self, params):
        self.params = params

    def __call__(self, inputs):
        cache = OrderedDict(inputs)
        cache.update(_forward(self.params, cache["input"]))
        return cache


# ----------------------------------------------------------------------------
# Deterministic parameter init + demo run
# ----------------------------------------------------------------------------
def _bn_params(key, c):
    k1, k2, k3, k4 = jax.random.split(key, 4)
    gamma = jax.random.uniform(k1, (c,), jnp.float32, 0.5, 1.5)
    beta = 0.1 * jax.random.normal(k2, (c,), jnp.float32)
    mean = 0.1 * jax.random.normal(k3, (c,), jnp.float32)
    var = jax.random.uniform(k4, (c,), jnp.float32, 0.5, 1.5)
    return (gamma, beta, mean, var)


if __name__ == "__main__":
    key = jax.random.PRNGKey(0)
    ks = jax.random.split(key, 10)

    params = {
        "prep_w": 0.1 * jax.random.normal(ks[0], (16, 3, 3, 3), jnp.float32),
        "prep_bn": _bn_params(ks[1], 16),
        "l1_w": 0.1 * jax.random.normal(ks[2], (32, 16, 3, 3), jnp.float32),
        "l1_bn": _bn_params(ks[3], 32),
        "l2_w": 0.1 * jax.random.normal(ks[4], (32, 32, 3, 3), jnp.float32),
        "l2_bn": _bn_params(ks[5], 32),
        "fc_w": 0.1 * jax.random.normal(ks[6], (10, 32), jnp.float32),
        "fc_b": 0.1 * jax.random.normal(ks[7], (10,), jnp.float32),
    }

    x = jax.random.normal(ks[8], (2, 3, 16, 16), jnp.float32)  # NCHW

    net = Network(params)
    cache = net({"input": x})
    logits = jax.block_until_ready(cache["logits"])

    assert logits.shape == (2, 10)
    assert cache["prep"].shape == (2, 16, 16, 16)
    assert cache["layer1_conv"].shape == (2, 32, 16, 16)
    assert cache["layer1_pool"].shape == (2, 32, 8, 8)
    assert cache["layer2_conv"].shape == (2, 32, 8, 8)
    assert cache["layer2_pool"].shape == (2, 32, 4, 4)
    assert cache["pool"].shape == (2, 32)
    assert bool(jnp.all(jnp.isfinite(logits)))
    assert float(jnp.min(cache["prep"])) >= 0.0          # ReLU output
    assert float(jnp.min(cache["layer1_pool"])) >= 0.0   # pooled ReLU output
    print("KERNEL_OK")
</pallas_src>

<mosaic_0001>
module attributes {stable_mosaic.version = 11 : i64} {
  func.func @_fused_forward_kernel(%arg0: i32, %arg1: memref<1x16x16x3xf32, #tpu.memory_space<vmem>>, %arg2: memref<9x3x16xbf16, #tpu.memory_space<vmem>>, %arg3: memref<1x16xf32, #tpu.memory_space<vmem>>, %arg4: memref<9x16x32xbf16, #tpu.memory_space<vmem>>, %arg5: memref<1x32xf32, #tpu.memory_space<vmem>>, %arg6: memref<9x32x32xbf16, #tpu.memory_space<vmem>>, %arg7: memref<1x32xf32, #tpu.memory_space<vmem>>, %arg8: memref<32x10xf32, #tpu.memory_space<vmem>>, %arg9: memref<1x10xf32, #tpu.memory_space<vmem>>, %arg10: memref<1x16x16x16xf32, #tpu.memory_space<vmem>>, %arg11: memref<1x16x16x32xf32, #tpu.memory_space<vmem>>, %arg12: memref<1x8x8x32xf32, #tpu.memory_space<vmem>>, %arg13: memref<1x8x8x32xf32, #tpu.memory_space<vmem>>, %arg14: memref<1x4x4x32xf32, #tpu.memory_space<vmem>>, %arg15: memref<1x1x32xf32, #tpu.memory_space<vmem>>, %arg16: memref<1x1x10xf32, #tpu.memory_space<vmem>>) attributes {dimension_semantics = [#tpu.dimension_semantics<parallel>], iteration_bounds = array<i64: 2>, scalar_prefetch = 0 : i64, scratch_operands = 0 : i64, tpu.core_type = #tpu.core_type<tc>, window_params = [{transform_indices = @transform_0, window_bounds = array<i64: 1, 16, 16, 3>}, {pipeline_mode = #tpu.pipeline_mode<synchronous>, transform_indices = @transform_1, window_bounds = array<i64: 9, 3, 16>}, {pipeline_mode = #tpu.pipeline_mode<synchronous>, transform_indices = @transform_2, window_bounds = array<i64: 1, 16>}, {pipeline_mode = #tpu.pipeline_mode<synchronous>, transform_indices = @transform_3, window_bounds = array<i64: 9, 16, 32>}, {pipeline_mode = #tpu.pipeline_mode<synchronous>, transform_indices = @transform_4, window_bounds = array<i64: 1, 32>}, {pipeline_mode = #tpu.pipeline_mode<synchronous>, transform_indices = @transform_5, window_bounds = array<i64: 9, 32, 32>}, {pipeline_mode = #tpu.pipeline_mode<synchronous>, transform_indices = @transform_6, window_bounds = array<i64: 1, 32>}, {pipeline_mode = #tpu.pipeline_mode<synchronous>, transform_indices = @transform_7, window_bounds = array<i64: 32, 10>}, {pipeline_mode = #tpu.pipeline_mode<synchronous>, transform_indices = @transform_8, window_bounds = array<i64: 1, 10>}, {transform_indices = @transform_9, window_bounds = array<i64: 1, 16, 16, 16>}, {transform_indices = @transform_10, window_bounds = array<i64: 1, 16, 16, 32>}, {transform_indices = @transform_11, window_bounds = array<i64: 1, 8, 8, 32>}, {transform_indices = @transform_12, window_bounds = array<i64: 1, 8, 8, 32>}, {transform_indices = @transform_13, window_bounds = array<i64: 1, 4, 4, 32>}, {transform_indices = @transform_14, window_bounds = array<i64: 1, 1, 32>}, {transform_indices = @transform_15, window_bounds = array<i64: 1, 1, 10>}]} {
    %c0 = arith.constant 0 : index
    %c0_0 = arith.constant 0 : index
    %c0_1 = arith.constant 0 : index
    %c0_2 = arith.constant 0 : index
    %0 = vector.load %arg1[%c0, %c0_0, %c0_1, %c0_2] : memref<1x16x16x3xf32, #tpu.memory_space<vmem>>, vector<1x16x16x3xf32>
    %1 = vector.shape_cast %0 : vector<1x16x16x3xf32> to vector<256x3xf32>
    %2 = tpu.iota {dimensions = array<i32: 1>} : vector<1x16x16x3xi32>
    %3 = vector.shape_cast %2 : vector<1x16x16x3xi32> to vector<256x3xi32>
    %4 = tpu.iota {dimensions = array<i32: 2>} : vector<1x16x16x3xi32>
    %5 = vector.shape_cast %4 : vector<1x16x16x3xi32> to vector<256x3xi32>
    %cst = arith.constant 0.000000e+00 : f32
    %6 = vector.broadcast %cst : f32 to vector<256x16xf32>
    %c17_i32 = arith.constant 17 : i32
    %7 = tpu.dynamic_rotate %1 by %c17_i32 dim 0 : vector<256x3xf32>, i32 -> vector<256x3xf32>
    %c0_i32 = arith.constant 0 : i32
    %8 = vector.broadcast %c0_i32 : i32 to vector<256x3xi32>
    %9 = arith.cmpi sgt, %3, %8 : vector<256x3xi32>
    %c0_i32_3 = arith.constant 0 : i32
    %10 = vector.broadcast %c0_i32_3 : i32 to vector<256x3xi32>
    %11 = arith.cmpi sgt, %5, %10 : vector<256x3xi32>
    %12 = arith.andi %9, %11 : vector<256x3xi1>
    %cst_4 = arith.constant 0.000000e+00 : f32
    %13 = vector.broadcast %cst_4 : f32 to vector<256x3xf32>
    %14 = arith.select %12, %7, %13 : vector<256x3xi1>, vector<256x3xf32>
    %15 = arith.truncf %14 : vector<256x3xf32> to vector<256x3xbf16>
    %c0_5 = arith.constant 0 : index
    %c0_6 = arith.constant 0 : index
    %c0_7 = arith.constant 0 : index
    %16 = vector.load %arg2[%c0_5, %c0_6, %c0_7] : memref<9x3x16xbf16, #tpu.memory_space<vmem>>, vector<1x3x16xbf16>
    %17 = vector.shape_cast %16 : vector<1x3x16xbf16> to vector<3x16xbf16>
    %cst_8 = arith.constant dense<0.000000e+00> : vector<256x16xf32>
    %18 = tpu.matmul %15, %17, %cst_8 {dimension_numbers = #tpu.dot_dimension_numbers<[1], [0], [0], [1], [0, 0, 1, 1], [], []>} : vector<256x3xbf16>, vector<3x16xbf16>, vector<256x16xf32> -> vector<256x16xf32>
    %19 = arith.addf %6, %18 : vector<256x16xf32>
    %c16_i32 = arith.constant 16 : i32
    %20 = tpu.dynamic_rotate %1 by %c16_i32 dim 0 : vector<256x3xf32>, i32 -> vector<256x3xf32>
    %c0_i32_9 = arith.constant 0 : i32
    %21 = vector.broadcast %c0_i32_9 : i32 to vector<256x3xi32>
    %22 = arith.cmpi sgt, %3, %21 : vector<256x3xi32>
    %cst_10 = arith.constant 0.000000e+00 : f32
    %23 = vector.broadcast %cst_10 : f32 to vector<256x3xf32>
    %24 = arith.select %22, %20, %23 : vector<256x3xi1>, vector<256x3xf32>
    %25 = arith.truncf %24 : vector<256x3xf32> to vector<256x3xbf16>
    %c1 = arith.constant 1 : index
    %c0_11 = arith.constant 0 : index
    %c0_12 = arith.constant 0 : index
    %26 = vector.load %arg2[%c1, %c0_11, %c0_12] : memref<9x3x16xbf16, #tpu.memory_space<vmem>>, vector<1x3x16xbf16>
    %27 = vector.shape_cast %26 : vector<1x3x16xbf16> to vector<3x16xbf16>
    %cst_13 = arith.constant dense<0.000000e+00> : vector<256x16xf32>
    %28 = tpu.matmul %25, %27, %cst_13 {dimension_numbers = #tpu.dot_dimension_numbers<[1], [0], [0], [1], [0, 0, 1, 1], [], []>} : vector<256x3xbf16>, vector<3x16xbf16>, vector<256x16xf32> -> vector<256x16xf32>
    %29 = arith.addf %19, %28 : vector<256x16xf32>
    %c15_i32 = arith.constant 15 : i32
    %30 = tpu.dynamic_rotate %1 by %c15_i32 dim 0 : vector<256x3xf32>, i32 -> vector<256x3xf32>
    %c0_i32_14 = arith.constant 0 : i32
    %31 = vector.broadcast %c0_i32_14 : i32 to vector<256x3xi32>
    %32 = arith.cmpi sgt, %3, %31 : vector<256x3xi32>
    %c15_i32_15 = arith.constant 15 : i32
    %33 = vector.broadcast %c15_i32_15 : i32 to vector<256x3xi32>
    %34 = arith.cmpi slt, %5, %33 : vector<256x3xi32>
    %35 = arith.andi %32, %34 : vector<256x3xi1>
    %cst_16 = arith.constant 0.000000e+00 : f32
    %36 = vector.broadcast %cst_16 : f32 to vector<256x3xf32>
    %37 = arith.select %35, %30, %36 : vector<256x3xi1>, vector<256x3xf32>
    %38 = arith.truncf %37 : vector<256x3xf32> to vector<256x3xbf16>
    %c2 = arith.constant 2 : index
    %c0_17 = arith.constant 0 : index
    %c0_18 = arith.constant 0 : index
    %39 = vector.load %arg2[%c2, %c0_17, %c0_18] : memref<9x3x16xbf16, #tpu.memory_space<vmem>>, vector<1x3x16xbf16>
    %40 = vector.shape_cast %39 : vector<1x3x16xbf16> to vector<3x16xbf16>
    %cst_19 = arith.constant dense<0.000000e+00> : vector<256x16xf32>
    %41 = tpu.matmul %38, %40, %cst_19 {dimension_numbers = #tpu.dot_dimension_numbers<[1], [0], [0], [1], [0, 0, 1, 1], [], []>} : vector<256x3xbf16>, vector<3x16xbf16>, vector<256x16xf32> -> vector<256x16xf32>
    %42 = arith.addf %29, %41 : vector<256x16xf32>
    %c1_i32 = arith.constant 1 : i32
    %43 = tpu.dynamic_rotate %1 by %c1_i32 dim 0 : vector<256x3xf32>, i32 -> vector<256x3xf32>
    %c0_i32_20 = arith.constant 0 : i32
    %44 = vector.broadcast %c0_i32_20 : i32 to vector<256x3xi32>
    %45 = arith.cmpi sgt, %5, %44 : vector<256x3xi32>
    %cst_21 = arith.constant 0.000000e+00 : f32
    %46 = vector.broadcast %cst_21 : f32 to vector<256x3xf32>
    %47 = arith.select %45, %43, %46 : vector<256x3xi1>, vector<256x3xf32>
    %48 = arith.truncf %47 : vector<256x3xf32> to vector<256x3xbf16>
    %c3 = arith.constant 3 : index
    %c0_22 = arith.constant 0 : index
    %c0_23 = arith.constant 0 : index
    %49 = vector.load %arg2[%c3, %c0_22, %c0_23] : memref<9x3x16xbf16, #tpu.memory_space<vmem>>, vector<1x3x16xbf16>
    %50 = vector.shape_cast %49 : vector<1x3x16xbf16> to vector<3x16xbf16>
    %cst_24 = arith.constant dense<0.000000e+00> : vector<256x16xf32>
    %51 = tpu.matmul %48, %50, %cst_24 {dimension_numbers = #tpu.dot_dimension_numbers<[1], [0], [0], [1], [0, 0, 1, 1], [], []>} : vector<256x3xbf16>, vector<3x16xbf16>, vector<256x16xf32> -> vector<256x16xf32>
    %52 = arith.addf %42, %51 : vector<256x16xf32>
    %53 = arith.truncf %1 : vector<256x3xf32> to vector<256x3xbf16>
    %c4 = arith.constant 4 : index
    %c0_25 = arith.constant 0 : index
    %c0_26 = arith.constant 0 : index
    %54 = vector.load %arg2[%c4, %c0_25, %c0_26] : memref<9x3x16xbf16, #tpu.memory_space<vmem>>, vector<1x3x16xbf16>
    %55 = vector.shape_cast %54 : vector<1x3x16xbf16> to vector<3x16xbf16>
    %cst_27 = arith.constant dense<0.000000e+00> : vector<256x16xf32>
    %56 = tpu.matmul %53, %55, %cst_27 {dimension_numbers = #tpu.dot_dimension_numbers<[1], [0], [0], [1], [0, 0, 1, 1], [], []>} : vector<256x3xbf16>, vector<3x16xbf16>, vector<256x16xf32> -> vector<256x16xf32>
    %57 = arith.addf %52, %56 : vector<256x16xf32>
    %c255_i32 = arith.constant 255 : i32
    %58 = tpu.dynamic_rotate %1 by %c255_i32 dim 0 : vector<256x3xf32>, i32 -> vector<256x3xf32>
    %c15_i32_28 = arith.constant 15 : i32
    %59 = vector.broadcast %c15_i32_28 : i32 to vector<256x3xi32>
    %60 = arith.cmpi slt, %5, %59 : vector<256x3xi32>
    %cst_29 = arith.constant 0.000000e+00 : f32
    %61 = vector.broadcast %cst_29 : f32 to vector<256x3xf32>
    %62 = arith.select %60, %58, %61 : vector<256x3xi1>, vector<256x3xf32>
    %63 = arith.truncf %62 : vector<256x3xf32> to vector<256x3xbf16>
    %c5 = arith.constant 5 : index
    %c0_30 = arith.constant 0 : index
    %c0_31 = arith.constant 0 : index
    %64 = vector.load %arg2[%c5, %c0_30, %c0_31] : memref<9x3x16xbf16, #tpu.memory_space<vmem>>, vector<1x3x16xbf16>
    %65 = vector.shape_cast %64 : vector<1x3x16xbf16> to vector<3x16xbf16>
    %cst_32 = arith.constant dense<0.000000e+00> : vector<256x16xf32>
    %66 = tpu.matmul %63, %65, %cst_32 {dimension_numbers = #tpu.dot_dimension_numbers<[1], [0], [0], [1], [0, 0, 1, 1], [], []>} : vector<256x3xbf16>, vector<3x16xbf16>, vector<256x16xf32> -> vector<256x16xf32>
    %67 = arith.addf %57, %66 : vector<256x16xf32>
    %c241_i32 = arith.constant 241 : i32
    %68 = tpu.dynamic_rotate %1 by %c241_i32 dim 0 : vector<256x3xf32>, i32 -> vector<256x3xf32>
    %c15_i32_33 = arith.constant 15 : i32
    %69 = vector.broadcast %c15_i32_33 : i32 to vector<256x3xi32>
    %70 = arith.cmpi slt, %3, %69 : vector<256x3xi32>
    %c0_i32_34 = arith.constant 0 : i32
    %71 = vector.broadcast %c0_i32_34 : i32 to vector<256x3xi32>
    %72 = arith.cmpi sgt, %5, %71 : vector<256x3xi32>
    %73 = arith.andi %70, %72 : vector<256x3xi1>
    %cst_35 = arith.constant 0.000000e+00 : f32
    %74 = vector.broadcast %cst_35 : f32 to vector<256x3xf32>
    %75 = arith.select %73, %68, %74 : vector<256x3xi1>, vector<256x3xf32>
    %76 = arith.truncf %75 : vector<256x3xf32> to vector<256x3xbf16>
    %c6 = arith.constant 6 : index
    %c0_36 = arith.constant 0 : index
    %c0_37 = arith.constant 0 : index
    %77 = vector.load %arg2[%c6, %c0_36, %c0_37] : memref<9x3x16xbf16, #tpu.memory_space<vmem>>, vector<1x3x16xbf16>
    %78 = vector.shape_cast %77 : vector<1x3x16xbf16> to vector<3x16xbf16>
    %cst_38 = arith.constant dense<0.000000e+00> : vector<256x16xf32>
    %79 = tpu.matmul %76, %78, %cst_38 {dimension_numbers = #tpu.dot_dimension_numbers<[1], [0], [0], [1], [0, 0, 1, 1], [], []>} : vector<256x3xbf16>, vector<3x16xbf16>, vector<256x16xf32> -> vector<256x16xf32>
    %80 = arith.addf %67, %79 : vector<256x16xf32>
    %c240_i32 = arith.constant 240 : i32
    %81 = tpu.dynamic_rotate %1 by %c240_i32 dim 0 : vector<256x3xf32>, i32 -> vector<256x3xf32>
    %c15_i32_39 = arith.constant 15 : i32
    %82 = vector.broadcast %c15_i32_39 : i32 to vector<256x3xi32>
    %83 = arith.cmpi slt, %3, %82 : vector<256x3xi32>
    %cst_40 = arith.constant 0.000000e+00 : f32
    %84 = vector.broadcast %cst_40 : f32 to vector<256x3xf32>
    %85 = arith.select %83, %81, %84 : vector<256x3xi1>, vector<256x3xf32>
    %86 = arith.truncf %85 : vector<256x3xf32> to vector<256x3xbf16>
    %c7 = arith.constant 7 : index
    %c0_41 = arith.constant 0 : index
    %c0_42 = arith.constant 0 : index
    %87 = vector.load %arg2[%c7, %c0_41, %c0_42] : memref<9x3x16xbf16, #tpu.memory_space<vmem>>, vector<1x3x16xbf16>
    %88 = vector.shape_cast %87 : vector<1x3x16xbf16> to vector<3x16xbf16>
    %cst_43 = arith.constant dense<0.000000e+00> : vector<256x16xf32>
    %89 = tpu.matmul %86, %88, %cst_43 {dimension_numbers = #tpu.dot_dimension_numbers<[1], [0], [0], [1], [0, 0, 1, 1], [], []>} : vector<256x3xbf16>, vector<3x16xbf16>, vector<256x16xf32> -> vector<256x16xf32>
    %90 = arith.addf %80, %89 : vector<256x16xf32>
    %c239_i32 = arith.constant 239 : i32
    %91 = tpu.dynamic_rotate %1 by %c239_i32 dim 0 : vector<256x3xf32>, i32 -> vector<256x3xf32>
    %c15_i32_44 = arith.constant 15 : i32
    %92 = vector.broadcast %c15_i32_44 : i32 to vector<256x3xi32>
    %93 = arith.cmpi slt, %3, %92 : vector<256x3xi32>
    %c15_i32_45 = arith.constant 15 : i32
    %94 = vector.broadcast %c15_i32_45 : i32 to vector<256x3xi32>
    %95 = arith.cmpi slt, %5, %94 : vector<256x3xi32>
    %96 = arith.andi %93, %95 : vector<256x3xi1>
    %cst_46 = arith.constant 0.000000e+00 : f32
    %97 = vector.broadcast %cst_46 : f32 to vector<256x3xf32>
    %98 = arith.select %96, %91, %97 : vector<256x3xi1>, vector<256x3xf32>
    %99 = arith.truncf %98 : vector<256x3xf32> to vector<256x3xbf16>
    %c8 = arith.constant 8 : index
    %c0_47 = arith.constant 0 : index
    %c0_48 = arith.constant 0 : index
    %100 = vector.load %arg2[%c8, %c0_47, %c0_48] : memref<9x3x16xbf16, #tpu.memory_space<vmem>>, vector<1x3x16xbf16>
    %101 = vector.shape_cast %100 : vector<1x3x16xbf16> to vector<3x16xbf16>
    %cst_49 = arith.constant dense<0.000000e+00> : vector<256x16xf32>
    %102 = tpu.matmul %99, %101, %cst_49 {dimension_numbers = #tpu.dot_dimension_numbers<[1], [0], [0], [1], [0, 0, 1, 1], [], []>} : vector<256x3xbf16>, vector<3x16xbf16>, vector<256x16xf32> -> vector<256x16xf32>
    %103 = arith.addf %90, %102 : vector<256x16xf32>
    %c0_50 = arith.constant 0 : index
    %c0_51 = arith.constant 0 : index
    %104 = vector.load %arg3[%c0_50, %c0_51] : memref<1x16xf32, #tpu.memory_space<vmem>>, vector<1x16xf32>
    %105 = vector.broadcast %104 : vector<1x16xf32> to vector<256x16xf32>
    %106 = arith.addf %103, %105 : vector<256x16xf32>
    %cst_52 = arith.constant 0.000000e+00 : f32
    %107 = vector.broadcast %cst_52 : f32 to vector<256x16xf32>
    %108 = arith.maximumf %106, %107 : vector<256x16xf32>
    %109 = vector.shape_cast %108 : vector<256x16xf32> to vector<1x16x16x16xf32>
    %c0_53 = arith.constant 0 : index
    %c0_54 = arith.constant 0 : index
    %c0_55 = arith.constant 0 : index
    %c0_56 = arith.constant 0 : index
    %110 = vector.load %arg10[%c0_53, %c0_54, %c0_55, %c0_56] : memref<1x16x16x16xf32, #tpu.memory_space<vmem>>, vector<1x16x16x16xf32>
    tpu.vector_store %arg10[%c0_53, %c0_54, %c0_55, %c0_56], %109 {strides = array<i32>} : memref<1x16x16x16xf32, #tpu.memory_space<vmem>>, vector<1x16x16x16xf32>,
    %111 = vector.shape_cast %109 : vector<1x16x16x16xf32> to vector<256x16xf32>
    %112 = tpu.iota {dimensions = array<i32: 1>} : vector<1x16x16x16xi32>
    %113 = vector.shape_cast %112 : vector<1x16x16x16xi32> to vector<256x16xi32>
    %114 = tpu.iota {dimensions = array<i32: 2>} : vector<1x16x16x16xi32>
    %115 = vector.shape_cast %114 : vector<1x16x16x16xi32> to vector<256x16xi32>
    %cst_57 = arith.constant 0.000000e+00 : f32
    %116 = vector.broadcast %cst_57 : f32 to vector<256x32xf32>
    %c17_i32_58 = arith.constant 17 : i32
    %117 = tpu.dynamic_rotate %111 by %c17_i32_58 dim 0 : vector<256x16xf32>, i32 -> vector<256x16xf32>
    %c0_i32_59 = arith.constant 0 : i32
    %118 = vector.broadcast %c0_i32_59 : i32 to vector<256x16xi32>
    %119 = arith.cmpi sgt, %113, %118 : vector<256x16xi32>
    %c0_i32_60 = arith.constant 0 : i32
    %120 = vector.broadcast %c0_i32_60 : i32 to vector<256x16xi32>
    %121 = arith.cmpi sgt, %115, %120 : vector<256x16xi32>
    %122 = arith.andi %119, %121 : vector<256x16xi1>
    %cst_61 = arith.constant 0.000000e+00 : f32
    %123 = vector.broadcast %cst_61 : f32 to vector<256x16xf32>
    %124 = arith.select %122, %117, %123 : vector<256x16xi1>, vector<256x16xf32>
    %125 = arith.truncf %124 : vector<256x16xf32> to vector<256x16xbf16>
    %c0_62 = arith.constant 0 : index
    %c0_63 = arith.constant 0 : index
    %c0_64 = arith.constant 0 : index
    %126 = vector.load %arg4[%c0_62, %c0_63, %c0_64] : memref<9x16x32xbf16, #tpu.memory_space<vmem>>, vector<1x16x32xbf16>
    %127 = vector.shape_cast %126 : vector<1x16x32xbf16> to vector<16x32xbf16>
    %cst_65 = arith.constant dense<0.000000e+00> : vector<256x32xf32>
    %128 = tpu.matmul %125, %127, %cst_65 {dimension_numbers = #tpu.dot_dimension_numbers<[1], [0], [0], [1], [0, 0, 1, 1], [], []>} : vector<256x16xbf16>, vector<16x32xbf16>, vector<256x32xf32> -> vector<256x32xf32>
    %129 = arith.addf %116, %128 : vector<256x32xf32>
    %c16_i32_66 = arith.constant 16 : i32
    %130 = tpu.dynamic_rotate %111 by %c16_i32_66 dim 0 : vector<256x16xf32>, i32 -> vector<256x16xf32>
    %c0_i32_67 = arith.constant 0 : i32
    %131 = vector.broadcast %c0_i32_67 : i32 to vector<256x16xi32>
    %132 = arith.cmpi sgt, %113, %131 : vector<256x16xi32>
    %cst_68 = arith.constant 0.000000e+00 : f32
    %133 = vector.broadcast %cst_68 : f32 to vector<256x16xf32>
    %134 = arith.select %132, %130, %133 : vector<256x16xi1>, vector<256x16xf32>
    %135 = arith.truncf %134 : vector<256x16xf32> to vector<256x16xbf16>
    %c1_69 = arith.constant 1 : index
    %c0_70 = arith.constant 0 : index
    %c0_71 = arith.constant 0 : index
    %136 = vector.load %arg4[%c1_69, %c0_70, %c0_71] : memref<9x16x32xbf16, #tpu.memory_space<vmem>>, vector<1x16x32xbf16>
    %137 = vector.shape_cast %136 : vector<1x16x32xbf16> to vector<16x32xbf16>
    %cst_72 = arith.constant dense<0.000000e+00> : vector<256x32xf32>
    %138 = tpu.matmul %135, %137, %cst_72 {dimension_numbers = #tpu.dot_dimension_numbers<[1], [0], [0], [1], [0, 0, 1, 1], [], []>} : vector<256x16xbf16>, vector<16x32xbf16>, vector<256x32xf32> -> vector<256x32xf32>
    %139 = arith.addf %129, %138 : vector<256x32xf32>
    %c15_i32_73 = arith.constant 15 : i32
    %140 = tpu.dynamic_rotate %111 by %c15_i32_73 dim 0 : vector<256x16xf32>, i32 -> vector<256x16xf32>
    %c0_i32_74 = arith.constant 0 : i32
    %141 = vector.broadcast %c0_i32_74 : i32 to vector<256x16xi32>
    %142 = arith.cmpi sgt, %113, %141 : vector<256x16xi32>
    %c15_i32_75 = arith.constant 15 : i32
    %143 = vector.broadcast %c15_i32_75 : i32 to vector<256x16xi32>
    %144 = arith.cmpi slt, %115, %143 : vector<256x16xi32>
    %145 = arith.andi %142, %144 : vector<256x16xi1>
    %cst_76 = arith.constant 0.000000e+00 : f32
    %146 = vector.broadcast %cst_76 : f32 to vector<256x16xf32>
    %147 = arith.select %145, %140, %146 : vector<256x16xi1>, vector<256x16xf32>
    %148 = arith.truncf %147 : vector<256x16xf32> to vector<256x16xbf16>
    %c2_77 = arith.constant 2 : index
    %c0_78 = arith.constant 0 : index
    %c0_79 = arith.constant 0 : index
    %149 = vector.load %arg4[%c2_77, %c0_78, %c0_79] : memref<9x16x32xbf16, #tpu.memory_space<vmem>>, vector<1x16x32xbf16>
    %150 = vector.shape_cast %149 : vector<1x16x32xbf16> to vector<16x32xbf16>
    %cst_80 = arith.constant dense<0.000000e+00> : vector<256x32xf32>
    %151 = tpu.matmul %148, %150, %cst_80 {dimension_numbers = #tpu.dot_dimension_numbers<[1], [0], [0], [1], [0, 0, 1, 1], [], []>} : vector<256x16xbf16>, vector<16x32xbf16>, vector<256x32xf32> -> vector<256x32xf32>
    %152 = arith.addf %139, %151 : vector<256x32xf32>
    %c1_i32_81 = arith.constant 1 : i32
    %153 = tpu.dynamic_rotate %111 by %c1_i32_81 dim 0 : vector<256x16xf32>, i32 -> vector<256x16xf32>
    %c0_i32_82 = arith.constant 0 : i32
    %154 = vector.broadcast %c0_i32_82 : i32 to vector<256x16xi32>
    %155 = arith.cmpi sgt, %115, %154 : vector<256x16xi32>
    %cst_83 = arith.constant 0.000000e+00 : f32
    %156 = vector.broadcast %cst_83 : f32 to vector<256x16xf32>
    %157 = arith.select %155, %153, %156 : vector<256x16xi1>, vector<256x16xf32>
    %158 = arith.truncf %157 : vector<256x16xf32> to vector<256x16xbf16>
    %c3_84 = arith.constant 3 : index
    %c0_85 = arith.constant 0 : index
    %c0_86 = arith.constant 0 : index
    %159 = vector.load %arg4[%c3_84, %c0_85, %c0_86] : memref<9x16x32xbf16, #tpu.memory_space<vmem>>, vector<1x16x32xbf16>
    %160 = vector.shape_cast %159 : vector<1x16x32xbf16> to vector<16x32xbf16>
    %cst_87 = arith.constant dense<0.000000e+00> : vector<256x32xf32>
    %161 = tpu.matmul %158, %160, %cst_87 {dimension_numbers = #tpu.dot_dimension_numbers<[1], [0], [0], [1], [0, 0, 1, 1], [], []>} : vector<256x16xbf16>, vector<16x32xbf16>, vector<256x32xf32> -> vector<256x32xf32>
    %162 = arith.addf %152, %161 : vector<256x32xf32>
    %163 = arith.truncf %111 : vector<256x16xf32> to vector<256x16xbf16>
    %c4_88 = arith.constant 4 : index
    %c0_89 = arith.constant 0 : index
    %c0_90 = arith.constant 0 : index
    %164 = vector.load %arg4[%c4_88, %c0_89, %c0_90] : memref<9x16x32xbf16, #tpu.memory_space<vmem>>, vector<1x16x32xbf16>
    %165 = vector.shape_cast %164 : vector<1x16x32xbf16> to vector<16x32xbf16>
    %cst_91 = arith.constant dense<0.000000e+00> : vector<256x32xf32>
    %166 = tpu.matmul %163, %165, %cst_91 {dimension_numbers = #tpu.dot_dimension_numbers<[1], [0], [0], [1], [0, 0, 1, 1], [], []>} : vector<256x16xbf16>, vector<16x32xbf16>, vector<256x32xf32> -> vector<256x32xf32>
    %167 = arith.addf %162, %166 : vector<256x32xf32>
    %c255_i32_92 = arith.constant 255 : i32
    %168 = tpu.dynamic_rotate %111 by %c255_i32_92 dim 0 : vector<256x16xf32>, i32 -> vector<256x16xf32>
    %c15_i32_93 = arith.constant 15 : i32
    %169 = vector.broadcast %c15_i32_93 : i32 to vector<256x16xi32>
    %170 = arith.cmpi slt, %115, %169 : vector<256x16xi32>
    %cst_94 = arith.constant 0.000000e+00 : f32
    %171 = vector.broadcast %cst_94 : f32 to vector<256x16xf32>
    %172 = arith.select %170, %168, %171 : vector<256x16xi1>, vector<256x16xf32>
    %173 = arith.truncf %172 : vector<256x16xf32> to vector<256x16xbf16>
    %c5_95 = arith.constant 5 : index
    %c0_96 = arith.constant 0 : index
    %c0_97 = arith.constant 0 : index
    %174 = vector.load %arg4[%c5_95, %c0_96, %c0_97] : memref<9x16x32xbf16, #tpu.memory_space<vmem>>, vector<1x16x32xbf16>
    %175 = vector.shape_cast %174 : vector<1x16x32xbf16> to vector<16x32xbf16>
    %cst_98 = arith.constant dense<0.000000e+00> : vector<256x32xf32>
    %176 = tpu.matmul %173, %175, %cst_98 {dimension_numbers = #tpu.dot_dimension_numbers<[1], [0], [0], [1], [0, 0, 1, 1], [], []>} : vector<256x16xbf16>, vector<16x32xbf16>, vector<256x32xf32> -> vector<256x32xf32>
    %177 = arith.addf %167, %176 : vector<256x32xf32>
    %c241_i32_99 = arith.constant 241 : i32
    %178 = tpu.dynamic_rotate %111 by %c241_i32_99 dim 0 : vector<256x16xf32>, i32 -> vector<256x16xf32>
    %c15_i32_100 = arith.constant 15 : i32
    %179 = vector.broadcast %c15_i32_100 : i32 to vector<256x16xi32>
    %180 = arith.cmpi slt, %113, %179 : vector<256x16xi32>
    %c0_i32_101 = arith.constant 0 : i32
    %181 = vector.broadcast %c0_i32_101 : i32 to vector<256x16xi32>
    %182 = arith.cmpi sgt, %115, %181 : vector<256x16xi32>
    %183 = arith.andi %180, %182 : vector<256x16xi1>
    %cst_102 = arith.constant 0.000000e+00 : f32
    %184 = vector.broadcast %cst_102 : f32 to vector<256x16xf32>
    %185 = arith.select %183, %178, %184 : vector<256x16xi1>, vector<256x16xf32>
    %186 = arith.truncf %185 : vector<256x16xf32> to vector<256x16xbf16>
    %c6_103 = arith.constant 6 : index
    %c0_104 = arith.constant 0 : index
    %c0_105 = arith.constant 0 : index
    %187 = vector.load %arg4[%c6_103, %c0_104, %c0_105] : memref<9x16x32xbf16, #tpu.memory_space<vmem>>, vector<1x16x32xbf16>
    %188 = vector.shape_cast %187 : vector<1x16x32xbf16> to vector<16x32xbf16>
    %cst_106 = arith.constant dense<0.000000e+00> : vector<256x32xf32>
    %189 = tpu.matmul %186, %188, %cst_106 {dimension_numbers = #tpu.dot_dimension_numbers<[1], [0], [0], [1], [0, 0, 1, 1], [], []>} : vector<256x16xbf16>, vector<16x32xbf16>, vector<256x32xf32> -> vector<256x32xf32>
    %190 = arith.addf %177, %189 : vector<256x32xf32>
    %c240_i32_107 = arith.constant 240 : i32
    %191 = tpu.dynamic_rotate %111 by %c240_i32_107 dim 0 : vector<256x16xf32>, i32 -> vector<256x16xf32>
    %c15_i32_108 = arith.constant 15 : i32
    %192 = vector.broadcast %c15_i32_108 : i32 to vector<256x16xi32>
    %193 = arith.cmpi slt, %113, %192 : vector<256x16xi32>
    %cst_109 = arith.constant 0.000000e+00 : f32
    %194 = vector.broadcast %cst_109 : f32 to vector<256x16xf32>
    %195 = arith.select %193, %191, %194 : vector<256x16xi1>, vector<256x16xf32>
    %196 = arith.truncf %195 : vector<256x16xf32> to vector<256x16xbf16>
    %c7_110 = arith.constant 7 : index
    %c0_111 = arith.constant 0 : index
    %c0_112 = arith.constant 0 : index
    %197 = vector.load %arg4[%c7_110, %c0_111, %c0_112] : memref<9x16x32xbf16, #tpu.memory_space<vmem>>, vector<1x16x32xbf16>
    %198 = vector.shape_cast %197 : vector<1x16x32xbf16> to vector<16x32xbf16>
    %cst_113 = arith.constant dense<0.000000e+00> : vector<256x32xf32>
    %199 = tpu.matmul %196, %198, %cst_113 {dimension_numbers = #tpu.dot_dimension_numbers<[1], [0], [0], [1], [0, 0, 1, 1], [], []>} : vector<256x16xbf16>, vector<16x32xbf16>, vector<256x32xf32> -> vector<256x32xf32>
    %200 = arith.addf %190, %199 : vector<256x32xf32>
    %c239_i32_114 = arith.constant 239 : i32
    %201 = tpu.dynamic_rotate %111 by %c239_i32_114 dim 0 : vector<256x16xf32>, i32 -> vector<256x16xf32>
    %c15_i32_115 = arith.constant 15 : i32
    %202 = vector.broadcast %c15_i32_115 : i32 to vector<256x16xi32>
    %203 = arith.cmpi slt, %113, %202 : vector<256x16xi32>
    %c15_i32_116 = arith.constant 15 : i32
    %204 = vector.broadcast %c15_i32_116 : i32 to vector<256x16xi32>
    %205 = arith.cmpi slt, %115, %204 : vector<256x16xi32>
    %206 = arith.andi %203, %205 : vector<256x16xi1>
    %cst_117 = arith.constant 0.000000e+00 : f32
    %207 = vector.broadcast %cst_117 : f32 to vector<256x16xf32>
    %208 = arith.select %206, %201, %207 : vector<256x16xi1>, vector<256x16xf32>
    %209 = arith.truncf %208 : vector<256x16xf32> to vector<256x16xbf16>
    %c8_118 = arith.constant 8 : index
    %c0_119 = arith.constant 0 : index
    %c0_120 = arith.constant 0 : index
    %210 = vector.load %arg4[%c8_118, %c0_119, %c0_120] : memref<9x16x32xbf16, #tpu.memory_space<vmem>>, vector<1x16x32xbf16>
    %211 = vector.shape_cast %210 : vector<1x16x32xbf16> to vector<16x32xbf16>
    %cst_121 = arith.constant dense<0.000000e+00> : vector<256x32xf32>
    %212 = tpu.matmul %209, %211, %cst_121 {dimension_numbers = #tpu.dot_dimension_numbers<[1], [0], [0], [1], [0, 0, 1, 1], [], []>} : vector<256x16xbf16>, vector<16x32xbf16>, vector<256x32xf32> -> vector<256x32xf32>
    %213 = arith.addf %200, %212 : vector<256x32xf32>
    %c0_122 = arith.constant 0 : index
    %c0_123 = arith.constant 0 : index
    %214 = vector.load %arg5[%c0_122, %c0_123] : memref<1x32xf32, #tpu.memory_space<vmem>>, vector<1x32xf32>
    %215 = vector.broadcast %214 : vector<1x32xf32> to vector<256x32xf32>
    %216 = arith.addf %213, %215 : vector<256x32xf32>
    %cst_124 = arith.constant 0.000000e+00 : f32
    %217 = vector.broadcast %cst_124 : f32 to vector<256x32xf32>
    %218 = arith.maximumf %216, %217 : vector<256x32xf32>
    %219 = vector.shape_cast %218 : vector<256x32xf32> to vector<1x16x16x32xf32>
    %c0_125 = arith.constant 0 : index
    %c0_126 = arith.constant 0 : index
    %c0_127 = arith.constant 0 : index
    %c0_128 = arith.constant 0 : index
    %220 = vector.load %arg11[%c0_125, %c0_126, %c0_127, %c0_128] : memref<1x16x16x32xf32, #tpu.memory_space<vmem>>, vector<1x16x16x32xf32>
    tpu.vector_store %arg11[%c0_125, %c0_126, %c0_127, %c0_128], %219 {strides = array<i32>} : memref<1x16x16x32xf32, #tpu.memory_space<vmem>>, vector<1x16x16x32xf32>,
    %c0_129 = arith.constant 0 : index
    %c0_130 = arith.constant 0 : index
    %c0_131 = arith.constant 0 : index
    %c0_132 = arith.constant 0 : index
    %221 = tpu.strided_load %arg11[%c0_129, %c0_130, %c0_131, %c0_132] {strides = array<i32: 1, 1, 2, 1>} : memref<1x16x16x32xf32, #tpu.memory_space<vmem>>, vector<1x16x8x32xf32>
    %c0_133 = arith.constant 0 : index
    %c0_134 = arith.constant 0 : index
    %c1_135 = arith.constant 1 : index
    %c0_136 = arith.constant 0 : index
    %222 = tpu.strided_load %arg11[%c0_133, %c0_134, %c1_135, %c0_136] {strides = array<i32: 1, 1, 2, 1>} : memref<1x16x16x32xf32, #tpu.memory_space<vmem>>, vector<1x16x8x32xf32>
    %223 = arith.maximumf %221, %222 : vector<1x16x8x32xf32>
    %224 = vector.shape_cast %223 : vector<1x16x8x32xf32> to vector<1x8x2x8x32xf32>
    %225 = vector.extract_strided_slice %224 {offsets = [0, 0, 0, 0, 0], sizes = [1, 8, 1, 8, 32], strides = [1, 1, 1, 1, 1]} : vector<1x8x2x8x32xf32> to vector<1x8x1x8x32xf32>
    %226 = vector.shape_cast %225 : vector<1x8x1x8x32xf32> to vector<1x8x8x32xf32>
    %227 = vector.extract_strided_slice %224 {offsets = [0, 0, 1, 0, 0], sizes = [1, 8, 1, 8, 32], strides = [1, 1, 1, 1, 1]} : vector<1x8x2x8x32xf32> to vector<1x8x1x8x32xf32>
    %228 = vector.shape_cast %227 : vector<1x8x1x8x32xf32> to vector<1x8x8x32xf32>
    %229 = arith.maximumf %226, %228 : vector<1x8x8x32xf32>
    %c0_137 = arith.constant 0 : index
    %c0_138 = arith.constant 0 : index
    %c0_139 = arith.constant 0 : index
    %c0_140 = arith.constant 0 : index
    %230 = vector.load %arg12[%c0_137, %c0_138, %c0_139, %c0_140] : memref<1x8x8x32xf32, #tpu.memory_space<vmem>>, vector<1x8x8x32xf32>
    tpu.vector_store %arg12[%c0_137, %c0_138, %c0_139, %c0_140], %229 {strides = array<i32>} : memref<1x8x8x32xf32, #tpu.memory_space<vmem>>, vector<1x8x8x32xf32>,
    %231 = vector.shape_cast %229 : vector<1x8x8x32xf32> to vector<64x32xf32>
    %232 = tpu.iota {dimensions = array<i32: 1>} : vector<1x8x8x32xi32>
    %233 = vector.shape_cast %232 : vector<1x8x8x32xi32> to vector<64x32xi32>
    %234 = tpu.iota {dimensions = array<i32: 2>} : vector<1x8x8x32xi32>
    %235 = vector.shape_cast %234 : vector<1x8x8x32xi32> to vector<64x32xi32>
    %cst_141 = arith.constant 0.000000e+00 : f32
    %236 = vector.broadcast %cst_141 : f32 to vector<64x32xf32>
    %c9_i32 = arith.constant 9 : i32
    %237 = tpu.dynamic_rotate %231 by %c9_i32 dim 0 : vector<64x32xf32>, i32 -> vector<64x32xf32>
    %c0_i32_142 = arith.constant 0 : i32
    %238 = vector.broadcast %c0_i32_142 : i32 to vector<64x32xi32>
    %239 = arith.cmpi sgt, %233, %238 : vector<64x32xi32>
    %c0_i32_143 = arith.constant 0 : i32
    %240 = vector.broadcast %c0_i32_143 : i32 to vector<64x32xi32>
    %241 = arith.cmpi sgt, %235, %240 : vector<64x32xi32>
    %242 = arith.andi %239, %241 : vector<64x32xi1>
    %cst_144 = arith.constant 0.000000e+00 : f32
    %243 = vector.broadcast %cst_144 : f32 to vector<64x32xf32>
    %244 = arith.select %242, %237, %243 : vector<64x32xi1>, vector<64x32xf32>
    %245 = arith.truncf %244 : vector<64x32xf32> to vector<64x32xbf16>
    %c0_145 = arith.constant 0 : index
    %c0_146 = arith.constant 0 : index
    %c0_147 = arith.constant 0 : index
    %246 = vector.load %arg6[%c0_145, %c0_146, %c0_147] : memref<9x32x32xbf16, #tpu.memory_space<vmem>>, vector<1x32x32xbf16>
    %247 = vector.shape_cast %246 : vector<1x32x32xbf16> to vector<32x32xbf16>
    %cst_148 = arith.constant dense<0.000000e+00> : vector<64x32xf32>
    %248 = tpu.matmul %245, %247, %cst_148 {dimension_numbers = #tpu.dot_dimension_numbers<[1], [0], [0], [1], [0, 0, 1, 1], [], []>} : vector<64x32xbf16>, vector<32x32xbf16>, vector<64x32xf32> -> vector<64x32xf32>
    %249 = arith.addf %236, %248 : vector<64x32xf32>
    %c8_i32 = arith.constant 8 : i32
    %250 = tpu.dynamic_rotate %231 by %c8_i32 dim 0 : vector<64x32xf32>, i32 -> vector<64x32xf32>
    %c0_i32_149 = arith.constant 0 : i32
    %251 = vector.broadcast %c0_i32_149 : i32 to vector<64x32xi32>
    %252 = arith.cmpi sgt, %233, %251 : vector<64x32xi32>
    %cst_150 = arith.constant 0.000000e+00 : f32
    %253 = vector.broadcast %cst_150 : f32 to vector<64x32xf32>
    %254 = arith.select %252, %250, %253 : vector<64x32xi1>, vector<64x32xf32>
    %255 = arith.truncf %254 : vector<64x32xf32> to vector<64x32xbf16>
    %c1_151 = arith.constant 1 : index
    %c0_152 = arith.constant 0 : index
    %c0_153 = arith.constant 0 : index
    %256 = vector.load %arg6[%c1_151, %c0_152, %c0_153] : memref<9x32x32xbf16, #tpu.memory_space<vmem>>, vector<1x32x32xbf16>
    %257 = vector.shape_cast %256 : vector<1x32x32xbf16> to vector<32x32xbf16>
    %cst_154 = arith.constant dense<0.000000e+00> : vector<64x32xf32>
    %258 = tpu.matmul %255, %257, %cst_154 {dimension_numbers = #tpu.dot_dimension_numbers<[1], [0], [0], [1], [0, 0, 1, 1], [], []>} : vector<64x32xbf16>, vector<32x32xbf16>, vector<64x32xf32> -> vector<64x32xf32>
    %259 = arith.addf %249, %258 : vector<64x32xf32>
    %c7_i32 = arith.constant 7 : i32
    %260 = tpu.dynamic_rotate %231 by %c7_i32 dim 0 : vector<64x32xf32>, i32 -> vector<64x32xf32>
    %c0_i32_155 = arith.constant 0 : i32
    %261 = vector.broadcast %c0_i32_155 : i32 to vector<64x32xi32>
    %262 = arith.cmpi sgt, %233, %261 : vector<64x32xi32>
    %c7_i32_156 = arith.constant 7 : i32
    %263 = vector.broadcast %c7_i32_156 : i32 to vector<64x32xi32>
    %264 = arith.cmpi slt, %235, %263 : vector<64x32xi32>
    %265 = arith.andi %262, %264 : vector<64x32xi1>
    %cst_157 = arith.constant 0.000000e+00 : f32
    %266 = vector.broadcast %cst_157 : f32 to vector<64x32xf32>
    %267 = arith.select %265, %260, %266 : vector<64x32xi1>, vector<64x32xf32>
    %268 = arith.truncf %267 : vector<64x32xf32> to vector<64x32xbf16>
    %c2_158 = arith.constant 2 : index
    %c0_159 = arith.constant 0 : index
    %c0_160 = arith.constant 0 : index
    %269 = vector.load %arg6[%c2_158, %c0_159, %c0_160] : memref<9x32x32xbf16, #tpu.memory_space<vmem>>, vector<1x32x32xbf16>
    %270 = vector.shape_cast %269 : vector<1x32x32xbf16> to vector<32x32xbf16>
    %cst_161 = arith.constant dense<0.000000e+00> : vector<64x32xf32>
    %271 = tpu.matmul %268, %270, %cst_161 {dimension_numbers = #tpu.dot_dimension_numbers<[1], [0], [0], [1], [0, 0, 1, 1], [], []>} : vector<64x32xbf16>, vector<32x32xbf16>, vector<64x32xf32> -> vector<64x32xf32>
    %272 = arith.addf %259, %271 : vector<64x32xf32>
    %c1_i32_162 = arith.constant 1 : i32
    %273 = tpu.dynamic_rotate %231 by %c1_i32_162 dim 0 : vector<64x32xf32>, i32 -> vector<64x32xf32>
    %c0_i32_163 = arith.constant 0 : i32
    %274 = vector.broadcast %c0_i32_163 : i32 to vector<64x32xi32>
    %275 = arith.cmpi sgt, %235, %274 : vector<64x32xi32>
    %cst_164 = arith.constant 0.000000e+00 : f32
    %276 = vector.broadcast %cst_164 : f32 to vector<64x32xf32>
    %277 = arith.select %275, %273, %276 : vector<64x32xi1>, vector<64x32xf32>
    %278 = arith.truncf %277 : vector<64x32xf32> to vector<64x32xbf16>
    %c3_165 = arith.constant 3 : index
    %c0_166 = arith.constant 0 : index
    %c0_167 = arith.constant 0 : index
    %279 = vector.load %arg6[%c3_165, %c0_166, %c0_167] : memref<9x32x32xbf16, #tpu.memory_space<vmem>>, vector<1x32x32xbf16>
    %280 = vector.shape_cast %279 : vector<1x32x32xbf16> to vector<32x32xbf16>
    %cst_168 = arith.constant dense<0.000000e+00> : vector<64x32xf32>
    %281 = tpu.matmul %278, %280, %cst_168 {dimension_numbers = #tpu.dot_dimension_numbers<[1], [0], [0], [1], [0, 0, 1, 1], [], []>} : vector<64x32xbf16>, vector<32x32xbf16>, vector<64x32xf32> -> vector<64x32xf32>
    %282 = arith.addf %272, %281 : vector<64x32xf32>
    %283 = arith.truncf %231 : vector<64x32xf32> to vector<64x32xbf16>
    %c4_169 = arith.constant 4 : index
    %c0_170 = arith.constant 0 : index
    %c0_171 = arith.constant 0 : index
    %284 = vector.load %arg6[%c4_169, %c0_170, %c0_171] : memref<9x32x32xbf16, #tpu.memory_space<vmem>>, vector<1x32x32xbf16>
    %285 = vector.shape_cast %284 : vector<1x32x32xbf16> to vector<32x32xbf16>
    %cst_172 = arith.constant dense<0.000000e+00> : vector<64x32xf32>
    %286 = tpu.matmul %283, %285, %cst_172 {dimension_numbers = #tpu.dot_dimension_numbers<[1], [0], [0], [1], [0, 0, 1, 1], [], []>} : vector<64x32xbf16>, vector<32x32xbf16>, vector<64x32xf32> -> vector<64x32xf32>
    %287 = arith.addf %282, %286 : vector<64x32xf32>
    %c63_i32 = arith.constant 63 : i32
    %288 = tpu.dynamic_rotate %231 by %c63_i32 dim 0 : vector<64x32xf32>, i32 -> vector<64x32xf32>
    %c7_i32_173 = arith.constant 7 : i32
    %289 = vector.broadcast %c7_i32_173 : i32 to vector<64x32xi32>
    %290 = arith.cmpi slt, %235, %289 : vector<64x32xi32>
    %cst_174 = arith.constant 0.000000e+00 : f32
    %291 = vector.broadcast %cst_174 : f32 to vector<64x32xf32>
    %292 = arith.select %290, %288, %291 : vector<64x32xi1>, vector<64x32xf32>
    %293 = arith.truncf %292 : vector<64x32xf32> to vector<64x32xbf16>
    %c5_175 = arith.constant 5 : index
    %c0_176 = arith.constant 0 : index
    %c0_177 = arith.constant 0 : index
    %294 = vector.load %arg6[%c5_175, %c0_176, %c0_177] : memref<9x32x32xbf16, #tpu.memory_space<vmem>>, vector<1x32x32xbf16>
    %295 = vector.shape_cast %294 : vector<1x32x32xbf16> to vector<32x32xbf16>
    %cst_178 = arith.constant dense<0.000000e+00> : vector<64x32xf32>
    %296 = tpu.matmul %293, %295, %cst_178 {dimension_numbers = #tpu.dot_dimension_numbers<[1], [0], [0], [1], [0, 0, 1, 1], [], []>} : vector<64x32xbf16>, vector<32x32xbf16>, vector<64x32xf32> -> vector<64x32xf32>
    %297 = arith.addf %287, %296 : vector<64x32xf32>
    %c57_i32 = arith.constant 57 : i32
    %298 = tpu.dynamic_rotate %231 by %c57_i32 dim 0 : vector<64x32xf32>, i32 -> vector<64x32xf32>
    %c7_i32_179 = arith.constant 7 : i32
    %299 = vector.broadcast %c7_i32_179 : i32 to vector<64x32xi32>
    %300 = arith.cmpi slt, %233, %299 : vector<64x32xi32>
    %c0_i32_180 = arith.constant 0 : i32
    %301 = vector.broadcast %c0_i32_180 : i32 to vector<64x32xi32>
    %302 = arith.cmpi sgt, %235, %301 : vector<64x32xi32>
    %303 = arith.andi %300, %302 : vector<64x32xi1>
    %cst_181 = arith.constant 0.000000e+00 : f32
    %304 = vector.broadcast %cst_181 : f32 to vector<64x32xf32>
    %305 = arith.select %303, %298, %304 : vector<64x32xi1>, vector<64x32xf32>
    %306 = arith.truncf %305 : vector<64x32xf32> to vector<64x32xbf16>
    %c6_182 = arith.constant 6 : index
    %c0_183 = arith.constant 0 : index
    %c0_184 = arith.constant 0 : index
    %307 = vector.load %arg6[%c6_182, %c0_183, %c0_184] : memref<9x32x32xbf16, #tpu.memory_space<vmem>>, vector<1x32x32xbf16>
    %308 = vector.shape_cast %307 : vector<1x32x32xbf16> to vector<32x32xbf16>
    %cst_185 = arith.constant dense<0.000000e+00> : vector<64x32xf32>
    %309 = tpu.matmul %306, %308, %cst_185 {dimension_numbers = #tpu.dot_dimension_numbers<[1], [0], [0], [1], [0, 0, 1, 1], [], []>} : vector<64x32xbf16>, vector<32x32xbf16>, vector<64x32xf32> -> vector<64x32xf32>
    %310 = arith.addf %297, %309 : vector<64x32xf32>
    %c56_i32 = arith.constant 56 : i32
    %311 = tpu.dynamic_rotate %231 by %c56_i32 dim 0 : vector<64x32xf32>, i32 -> vector<64x32xf32>
    %c7_i32_186 = arith.constant 7 : i32
    %312 = vector.broadcast %c7_i32_186 : i32 to vector<64x32xi32>
    %313 = arith.cmpi slt, %233, %312 : vector<64x32xi32>
    %cst_187 = arith.constant 0.000000e+00 : f32
    %314 = vector.broadcast %cst_187 : f32 to vector<64x32xf32>
    %315 = arith.select %313, %311, %314 : vector<64x32xi1>, vector<64x32xf32>
    %316 = arith.truncf %315 : vector<64x32xf32> to vector<64x32xbf16>
    %c7_188 = arith.constant 7 : index
    %c0_189 = arith.constant 0 : index
    %c0_190 = arith.constant 0 : index
    %317 = vector.load %arg6[%c7_188, %c0_189, %c0_190] : memref<9x32x32xbf16, #tpu.memory_space<vmem>>, vector<1x32x32xbf16>
    %318 = vector.shape_cast %317 : vector<1x32x32xbf16> to vector<32x32xbf16>
    %cst_191 = arith.constant dense<0.000000e+00> : vector<64x32xf32>
    %319 = tpu.matmul %316, %318, %cst_191 {dimension_numbers = #tpu.dot_dimension_numbers<[1], [0], [0], [1], [0, 0, 1, 1], [], []>} : vector<64x32xbf16>, vector<32x32xbf16>, vector<64x32xf32> -> vector<64x32xf32>
    %320 = arith.addf %310, %319 : vector<64x32xf32>
    %c55_i32 = arith.constant 55 : i32
    %321 = tpu.dynamic_rotate %231 by %c55_i32 dim 0 : vector<64x32xf32>, i32 -> vector<64x32xf32>
    %c7_i32_192 = arith.constant 7 : i32
    %322 = vector.broadcast %c7_i32_192 : i32 to vector<64x32xi32>
    %323 = arith.cmpi slt, %233, %322 : vector<64x32xi32>
    %c7_i32_193 = arith.constant 7 : i32
    %324 = vector.broadcast %c7_i32_193 : i32 to vector<64x32xi32>
    %325 = arith.cmpi slt, %235, %324 : vector<64x32xi32>
    %326 = arith.andi %323, %325 : vector<64x32xi1>
    %cst_194 = arith.constant 0.000000e+00 : f32
    %327 = vector.broadcast %cst_194 : f32 to vector<64x32xf32>
    %328 = arith.select %326, %321, %327 : vector<64x32xi1>, vector<64x32xf32>
    %329 = arith.truncf %328 : vector<64x32xf32> to vector<64x32xbf16>
    %c8_195 = arith.constant 8 : index
    %c0_196 = arith.constant 0 : index
    %c0_197 = arith.constant 0 : index
    %330 = vector.load %arg6[%c8_195, %c0_196, %c0_197] : memref<9x32x32xbf16, #tpu.memory_space<vmem>>, vector<1x32x32xbf16>
    %331 = vector.shape_cast %330 : vector<1x32x32xbf16> to vector<32x32xbf16>
    %cst_198 = arith.constant dense<0.000000e+00> : vector<64x32xf32>
    %332 = tpu.matmul %329, %331, %cst_198 {dimension_numbers = #tpu.dot_dimension_numbers<[1], [0], [0], [1], [0, 0, 1, 1], [], []>} : vector<64x32xbf16>, vector<32x32xbf16>, vector<64x32xf32> -> vector<64x32xf32>
    %333 = arith.addf %320, %332 : vector<64x32xf32>
    %c0_199 = arith.constant 0 : index
    %c0_200 = arith.constant 0 : index
    %334 = vector.load %arg7[%c0_199, %c0_200] : memref<1x32xf32, #tpu.memory_space<vmem>>, vector<1x32xf32>
    %335 = vector.broadcast %334 : vector<1x32xf32> to vector<64x32xf32>
    %336 = arith.addf %333, %335 : vector<64x32xf32>
    %cst_201 = arith.constant 0.000000e+00 : f32
    %337 = vector.broadcast %cst_201 : f32 to vector<64x32xf32>
    %338 = arith.maximumf %336, %337 : vector<64x32xf32>
    %339 = vector.shape_cast %338 : vector<64x32xf32> to vector<1x8x8x32xf32>
    %c0_202 = arith.constant 0 : index
    %c0_203 = arith.constant 0 : index
    %c0_204 = arith.constant 0 : index
    %c0_205 = arith.constant 0 : index
    %340 = vector.load %arg13[%c0_202, %c0_203, %c0_204, %c0_205] : memref<1x8x8x32xf32, #tpu.memory_space<vmem>>, vector<1x8x8x32xf32>
    tpu.vector_store %arg13[%c0_202, %c0_203, %c0_204, %c0_205], %339 {strides = array<i32>} : memref<1x8x8x32xf32, #tpu.memory_space<vmem>>, vector<1x8x8x32xf32>,
    %c0_206 = arith.constant 0 : index
    %c0_207 = arith.constant 0 : index
    %c0_208 = arith.constant 0 : index
    %c0_209 = arith.constant 0 : index
    %341 = tpu.strided_load %arg13[%c0_206, %c0_207, %c0_208, %c0_209] {strides = array<i32: 1, 1, 2, 1>} : memref<1x8x8x32xf32, #tpu.memory_space<vmem>>, vector<1x8x4x32xf32>
    %c0_210 = arith.constant 0 : index
    %c0_211 = arith.constant 0 : index
    %c1_212 = arith.constant 1 : index
    %c0_213 = arith.constant 0 : index
    %342 = tpu.strided_load %arg13[%c0_210, %c0_211, %c1_212, %c0_213] {strides = array<i32: 1, 1, 2, 1>} : memref<1x8x8x32xf32, #tpu.memory_space<vmem>>, vector<1x8x4x32xf32>
    %343 = arith.maximumf %341, %342 : vector<1x8x4x32xf32>
    %344 = vector.shape_cast %343 : vector<1x8x4x32xf32> to vector<1x4x2x4x32xf32>
    %345 = vector.extract_strided_slice %344 {offsets = [0, 0, 0, 0, 0], sizes = [1, 4, 1, 4, 32], strides = [1, 1, 1, 1, 1]} : vector<1x4x2x4x32xf32> to vector<1x4x1x4x32xf32>
    %346 = vector.shape_cast %345 : vector<1x4x1x4x32xf32> to vector<1x4x4x32xf32>
    %347 = vector.extract_strided_slice %344 {offsets = [0, 0, 1, 0, 0], sizes = [1, 4, 1, 4, 32], strides = [1, 1, 1, 1, 1]} : vector<1x4x2x4x32xf32> to vector<1x4x1x4x32xf32>
    %348 = vector.shape_cast %347 : vector<1x4x1x4x32xf32> to vector<1x4x4x32xf32>
    %349 = arith.maximumf %346, %348 : vector<1x4x4x32xf32>
    %c0_214 = arith.constant 0 : index
    %c0_215 = arith.constant 0 : index
    %c0_216 = arith.constant 0 : index
    %c0_217 = arith.constant 0 : index
    %350 = vector.load %arg14[%c0_214, %c0_215, %c0_216, %c0_217] : memref<1x4x4x32xf32, #tpu.memory_space<vmem>>, vector<1x4x4x32xf32>
    tpu.vector_store %arg14[%c0_214, %c0_215, %c0_216, %c0_217], %349 {strides = array<i32>} : memref<1x4x4x32xf32, #tpu.memory_space<vmem>>, vector<1x4x4x32xf32>,
    %cst_218 = arith.constant dense<0xFF800000> : vector<1x4x32xf32>
    %351 = vector.multi_reduction <maximumf>, %349, %cst_218 [1] : vector<1x4x4x32xf32> to vector<1x4x32xf32>
    %cst_219 = arith.constant dense<0xFF800000> : vector<1x32xf32>
    %352 = vector.multi_reduction <maximumf>, %351, %cst_219 [1] : vector<1x4x32xf32> to vector<1x32xf32>
    %353 = vector.shape_cast %352 : vector<1x32xf32> to vector<1x1x32xf32>
    %c0_220 = arith.constant 0 : index
    %c0_221 = arith.constant 0 : index
    %c0_222 = arith.constant 0 : index
    %354 = vector.load %arg15[%c0_220, %c0_221, %c0_222] : memref<1x1x32xf32, #tpu.memory_space<vmem>>, vector<1x1x32xf32>
    tpu.vector_store %arg15[%c0_220, %c0_221, %c0_222], %353 {strides = array<i32>} : memref<1x1x32xf32, #tpu.memory_space<vmem>>, vector<1x1x32xf32>,
    %c0_223 = arith.constant 0 : index
    %c0_224 = arith.constant 0 : index
    %355 = vector.load %arg8[%c0_223, %c0_224] : memref<32x10xf32, #tpu.memory_space<vmem>>, vector<32x10xf32>
    %cst_225 = arith.constant dense<0.000000e+00> : vector<1x10xf32>
    %356 = tpu.matmul %352, %355, %cst_225 {dimension_numbers = #tpu.dot_dimension_numbers<[1], [0], [0], [1], [0, 0, 1, 1], [], []>} : vector<1x32xf32>, vector<32x10xf32>, vector<1x10xf32> -> vector<1x10xf32>
    %c0_226 = arith.constant 0 : index
    %c0_227 = arith.constant 0 : index
    %357 = vector.load %arg9[%c0_226, %c0_227] : memref<1x10xf32, #tpu.memory_space<vmem>>, vector<1x10xf32>
    %358 = arith.addf %356, %357 : vector<1x10xf32>
    %cst_228 = arith.constant 1.250000e-01 : f32
    %359 = vector.broadcast %cst_228 : f32 to vector<1x10xf32>
    %360 = arith.mulf %358, %359 : vector<1x10xf32>
    %361 = vector.shape_cast %360 : vector<1x10xf32> to vector<1x1x10xf32>
    %c0_229 = arith.constant 0 : index
    %c0_230 = arith.constant 0 : index
    %c0_231 = arith.constant 0 : index
    %362 = vector.load %arg16[%c0_229, %c0_230, %c0_231] : memref<1x1x10xf32, #tpu.memory_space<vmem>>, vector<1x1x10xf32>
    tpu.vector_store %arg16[%c0_229, %c0_230, %c0_231], %361 {strides = array<i32>} : memref<1x1x10xf32, #tpu.memory_space<vmem>>, vector<1x1x10xf32>,
    return
  }
  func.func @transform_0(%arg0: i32) -> (i32, i32, i32, i32) {
    %c0_i32 = arith.constant 0 : i32
    %c0_i32_0 = arith.constant 0 : i32
    %c0_i32_1 = arith.constant 0 : i32
    %c0_i32_2 = arith.constant 0 : i32
    return %arg0, %c0_i32, %c0_i32_0, %c0_i32_1 : i32, i32, i32, i32
  }
  func.func @transform_1(%arg0: i32) -> (i32, i32, i32) {
    %c0_i32 = arith.constant 0 : i32
    %c0_i32_0 = arith.constant 0 : i32
    %c0_i32_1 = arith.constant 0 : i32
    %c0_i32_2 = arith.constant 0 : i32
    return %c0_i32, %c0_i32_0, %c0_i32_1 : i32, i32, i32
  }
  func.func @transform_2(%arg0: i32) -> (i32, i32) {
    %c0_i32 = arith.constant 0 : i32
    %c0_i32_0 = arith.constant 0 : i32
    %c0_i32_1 = arith.constant 0 : i32
    return %c0_i32, %c0_i32_0 : i32, i32
  }
  func.func @transform_3(%arg0: i32) -> (i32, i32, i32) {
    %c0_i32 = arith.constant 0 : i32
    %c0_i32_0 = arith.constant 0 : i32
    %c0_i32_1 = arith.constant 0 : i32
    %c0_i32_2 = arith.constant 0 : i32
    return %c0_i32, %c0_i32_0, %c0_i32_1 : i32, i32, i32
  }
  func.func @transform_4(%arg0: i32) -> (i32, i32) {
    %c0_i32 = arith.constant 0 : i32
    %c0_i32_0 = arith.constant 0 : i32
    %c0_i32_1 = arith.constant 0 : i32
    return %c0_i32, %c0_i32_0 : i32, i32
  }
  func.func @transform_5(%arg0: i32) -> (i32, i32, i32) {
    %c0_i32 = arith.constant 0 : i32
    %c0_i32_0 = arith.constant 0 : i32
    %c0_i32_1 = arith.constant 0 : i32
    %c0_i32_2 = arith.constant 0 : i32
    return %c0_i32, %c0_i32_0, %c0_i32_1 : i32, i32, i32
  }
  func.func @transform_6(%arg0: i32) -> (i32, i32) {
    %c0_i32 = arith.constant 0 : i32
    %c0_i32_0 = arith.constant 0 : i32
    %c0_i32_1 = arith.constant 0 : i32
    return %c0_i32, %c0_i32_0 : i32, i32
  }
  func.func @transform_7(%arg0: i32) -> (i32, i32) {
    %c0_i32 = arith.constant 0 : i32
    %c0_i32_0 = arith.constant 0 : i32
    %c0_i32_1 = arith.constant 0 : i32
    return %c0_i32, %c0_i32_0 : i32, i32
  }
  func.func @transform_8(%arg0: i32) -> (i32, i32) {
    %c0_i32 = arith.constant 0 : i32
    %c0_i32_0 = arith.constant 0 : i32
    %c0_i32_1 = arith.constant 0 : i32
    return %c0_i32, %c0_i32_0 : i32, i32
  }
  func.func @transform_9(%arg0: i32) -> (i32, i32, i32, i32) {
    %c0_i32 = arith.constant 0 : i32
    %c0_i32_0 = arith.constant 0 : i32
    %c0_i32_1 = arith.constant 0 : i32
    %c0_i32_2 = arith.constant 0 : i32
    return %arg0, %c0_i32, %c0_i32_0, %c0_i32_1 : i32, i32, i32, i32
  }
  func.func @transform_10(%arg0: i32) -> (i32, i32, i32, i32) {
    %c0_i32 = arith.constant 0 : i32
    %c0_i32_0 = arith.constant 0 : i32
    %c0_i32_1 = arith.constant 0 : i32
    %c0_i32_2 = arith.constant 0 : i32
    return %arg0, %c0_i32, %c0_i32_0, %c0_i32_1 : i32, i32, i32, i32
  }
  func.func @transform_11(%arg0: i32) -> (i32, i32, i32, i32) {
    %c0_i32 = arith.constant 0 : i32
    %c0_i32_0 = arith.constant 0 : i32
    %c0_i32_1 = arith.constant 0 : i32
    %c0_i32_2 = arith.constant 0 : i32
    return %arg0, %c0_i32, %c0_i32_0, %c0_i32_1 : i32, i32, i32, i32
  }
  func.func @transform_12(%arg0: i32) -> (i32, i32, i32, i32) {
    %c0_i32 = arith.constant 0 : i32
    %c0_i32_0 = arith.constant 0 : i32
    %c0_i32_1 = arith.constant 0 : i32
    %c0_i32_2 = arith.constant 0 : i32
    return %arg0, %c0_i32, %c0_i32_0, %c0_i32_1 : i32, i32, i32, i32
  }
  func.func @transform_13(%arg0: i32) -> (i32, i32, i32, i32) {
    %c0_i32 = arith.constant 0 : i32
    %c0_i32_0 = arith.constant 0 : i32
    %c0_i32_1 = arith.constant 0 : i32
    %c0_i32_2 = arith.constant 0 : i32
    return %arg0, %c0_i32, %c0_i32_0, %c0_i32_1 : i32, i32, i32, i32
  }
  func.func @transform_14(%arg0: i32) -> (i32, i32, i32) {
    %c0_i32 = arith.constant 0 : i32
    %c0_i32_0 = arith.constant 0 : i32
    %c0_i32_1 = arith.constant 0 : i32
    return %arg0, %c0_i32, %c0_i32_0 : i32, i32, i32
  }
  func.func @transform_15(%arg0: i32) -> (i32, i32, i32) {
    %c0_i32 = arith.constant 0 : i32
    %c0_i32_0 = arith.constant 0 : i32
    %c0_i32_1 = arith.constant 0 : i32
    return %arg0, %c0_i32, %c0_i32_0 : i32, i32, i32
  }
}

</mosaic_0001>

<bundles_post_ra>
// kernel: _forward.1
= control target key start
LH: loop header
LB: loop body
LE: loop exit
PB: predicated region body
PF: predicated region fallthrough
CT: control target
= control target key end

     0   :  { %s11944_s0 = inlined_call_operand.vmem [shape: f32[2,16,16,3], index: 0, kind: input, shape index: {}]   ;;  %s11945_s1 = inlined_call_operand.vmem [shape: bf16[9,3,16], index: 1, kind: input, shape index: {}]   ;;  %s11946_s2 = inlined_call_operand.vmem [shape: f32[1,16], index: 2, kind: input, shape index: {}]   ;;  %s11947_s3 = inlined_call_operand.vmem [shape: bf16[9,16,32], index: 3, kind: input, shape index: {}]   ;;  %s11948_s4 = inlined_call_operand.vmem [shape: f32[1,32], index: 4, kind: input, shape index: {}]   ;;  %s11949_s5 = inlined_call_operand.vmem [shape: bf16[9,32,32], index: 5, kind: input, shape index: {}]   ;;  %s11950_s6 = inlined_call_operand.vmem [shape: f32[1,32], index: 6, kind: input, shape index: {}]   ;;  %s11951_s7 = inlined_call_operand.vmem [shape: f32[32,10], index: 7, kind: input, shape index: {}]   ;;  %s11952_s8 = inlined_call_operand.vmem [shape: f32[1,10], index: 8, kind: input, shape index: {}]   ;;  %s11953_s9 = inlined_call_operand.vmem [shape: f32[2,16,16,16], index: 9, kind: output, shape index: {0}]   ;;  %s11954_s10 = inlined_call_operand.hbm [shape: f32[2,16,16,32], index: 10, kind: output, shape index: {1}]   ;;  %s11955_s11 = inlined_call_operand.hbm [shape: f32[2,8,8,32], index: 11, kind: output, shape index: {2}]   ;;  %s11956_s12 = inlined_call_operand.hbm [shape: f32[2,8,8,32], index: 12, kind: output, shape index: {3}]   ;;  %s11957_s13 = inlined_call_operand.hbm [shape: f32[2,4,4,32], index: 13, kind: output, shape index: {4}]   ;;  %s11958_s14 = inlined_call_operand.hbm [shape: f32[2,1,32], index: 14, kind: output, shape index: {5}]   ;;  %s11959_s15 = inlined_call_operand.hbm [shape: f32[2,1,10], index: 15, kind: output, shape index: {6}]  }
   0x1   :  { %12026 = sst [smem:[#allocation33_spill]] %s11944_s0 }
   0x2   :  { %12027 = sst [smem:[#allocation34_spill]] %s11945_s1 }
   0x3   :  { %12028 = sst [smem:[#allocation35_spill]] %s11946_s2 }
   0x4   :  { %12029 = sst [smem:[#allocation36_spill]] %s11947_s3 }
   0x5   :  { %12030 = sst [smem:[#allocation37_spill]] %s11948_s4 }
   0x6   :  { %12031 = sst [smem:[#allocation38_spill]] %s11949_s5 }
   0x7   :  { %12032 = sst [smem:[#allocation39_spill]] %s11950_s6 }
   0x8   :  { %12033 = sst [smem:[#allocation40_spill]] %s11951_s7 }
   0x9   :  { %12034 = sst [smem:[#allocation41_spill]] %s11953_s9 }
   0xa   :  { %12035 = sst [smem:[#allocation42_spill]] %s11955_s11 }
   0xb   :  { %21 = vsyncpa [#allocation3], 0 }
   0xc   :  { %23 = vsyncpa [#allocation3 + $0x1], 0 }
   0xd   :  { %24 = vsyncpa [#allocation5], 0 }
   0xe   :  { %26 = vsyncpa [#allocation5 + $0x1], 0 }
   0xf   :  { %27 = vsyncpa [#allocation8], 0 }
  0x10   :  { %29 = vsyncpa [#allocation8 + $0x1], 0 }
  0x11   :  { %30 = vsyncpa [#allocation11], 0 }
  0x12   :  { %32 = vsyncpa [#allocation11 + $0x1], 0  ;;  %s9189_s18 = smov 0   ;;  %s9191_s19 = smov 0  }
  0x13   :  { %s9193_s20 = smov 0   ;;  %s9195_s21 = smov 0  }
  0x14 LB: > { %12036 = sst [smem:[#allocation16_spill]] %s9085_s19  ;;  %s9210_s22 = sadd.s32 4294967295, %s9093_s21   ;;  %s9093_s21 = sphi %s9195_s21, %s12173_s21   ;;  %s9089_s20 = sphi %s9193_s20, %s12172_s20   ;;  %s9085_s19 = sphi %s9191_s19, %s12171_s19   ;;  %s9081_s18 = sphi %s9189_s18, %s12170_s18  }
  0x15   : > { %12037 = sst [smem:[#allocation17_spill]] %s9089_s20  ;;  %s11988_s23 = sadd.s32 4294967294, %s9093_s21  }
  0x16   : > { %s9214_s24 = sadd.s32 1, %s9093_s21   ;;  %s265_s25 = sadd.s32 1, %s9089_s20 }
  0x17   : > { %s262_s26 = ssub.s32 %s9093_s21, %s9214_s24  ;;  %p275_p0 = scmp.ne.s32.totalorder %s9089_s20, %s9085_s19 }
  0x18   : > { %p263_p1 = scmp.eq.s32.totalorder %s262_s26, 0  ;;  %p276_p2 = scmp.eq.s32.totalorder %s9210_s22, 1 }
  0x19   : > { %p281_p3 = scmp.ne.s32.totalorder %s9085_s19, %s9081_s18  ;;  %p282_p4 = scmp.eq.s32.totalorder %s11988_s23, 1 }
  0x1a   : > { %s9227_s27 = scalar_select %p263_p1, %s9089_s20, %s265_s25  }
  0x1b   : > { %p9229_p5 = por %p276_p2, %p275_p0  ;;  %p9233_p6 = por %p282_p4, %p281_p3 }
  0x1c   : > { %12038 = sst [smem:[#allocation18_spill]] %s9227_s27  ;;  %p6622_p7 = scmp.ge.s32.totalorder %s9093_s21, 1 }
  0x1d   : > { %p462_p8 = scmp.lt.s32.totalorder %s9093_s21, 3 }
  0x1f   : > { %p463_p9 = pnand %p6622_p7, %p462_p8 }
  0x21   : > { %466 = sbr.rel (%p463_p9) target bundleno = 2135 (0x857), region = 56 }
  0x28   : > { %s12041_s1 = sld [smem:[#allocation34_spill]]  ;;  %vm761_vm0 = vcmask 1040384   ;;  %vm762_vm1 = vcmask 1041408   ;;  %v9095_v1 = vmov 65535   ;;  %v11960_v3 = vmov 0.0|0.0   ;;  %p538_p10 = scmp.lt.s32.totalorder %s9210_s22, 1 }
  0x29   : > { %v763_v2 = vsel %vm761_vm0, 4294967295, %v9095_v1  ;;  %7499 = vmatprep.mubr.bf16.mxu0 %v11960_v3  ;;  %v581_v5 = vlaneseq  ;;  %7465 = vmatprep.mubr.bf16.mxu1 %v11960_v3  ;;  %s12042_s0 = sld [smem:[#allocation33_spill]]  ;;  %vm712_vm3 = vcmask 23552   ;;  %s12074_s3 = sld [smem:[#allocation36_spill]]  ;;  %vm2771_vm7 = vcmask 130048  }
  0x2a   : > { %v9248_v6 = vsel %vm762_vm1, %v763_v2, 0  ;;  %s9253_s26 = scalar_select %p538_p10, %s9210_s22, 1  ;;  %vm5014_vm8 = vcmask 261120   ;;  %vm9098_vm9 = vmmov 0   ;;  %vm6165_vm10 = vcmask 257024  }
  0x2b   : > { %v9255_v9 = vshrl.u32 %v581_v5, 7  ;;  %s12075_s2 = sld [smem:[#allocation35_spill]]  ;;  %s12076_s9 = sld [smem:[#allocation41_spill]]  ;;  %vm6184_vm11 = vcmask 253952  }
  0x2c   : > { %s7092_s30 = sshll.u32 %s9253_s26, 8  ;;  %s12159_s5 = sld [smem:[#allocation38_spill]] }
  0x2d   : > { %vm615_vm2 = vcmp.lt.s32.totalorder %v9255_v9, 1  ;;  %vm646_vm4 = vcmp.gt.s32.totalorder %v9255_v9, 0  ;;  %vm1169_vm5 = vcmp.lt.s32.totalorder %v9255_v9, 7  ;;  %s11202_s16 = sand.u32 1, %s9085_s19   ;;  %s12160_s4 = sld [smem:[#allocation37_spill]] }
  0x2e   : > { %v694_v0 = vld [vmem:[%s12041_s1] sm:$0x3]  ;;  %v6662_v4 = vld [vmem:[%s12041_s1 + $0x4] sm:$0x3]  ;;  %v6678_v22 = vld [vmem:[%s12041_s1 + $0x6] sm:$0x3] }
  0x2f   : > { %v975_v7 = vand.u32 %v9248_v6, %v694_v0  ;;  %v1295_v8 = vand.u32 %v6662_v4, %v9248_v6  ;;  %s9263_s25 = scalar_lea.vmem %s12042_s0, %s7092_s30  ;;  %v9324_v36 = vand.u32 %v6678_v22, %v9248_v6  ;;  %s12018_s17 = sshll.u32 %s11202_s16, 6 }
  0x30   : > { %v9266_v10 = vld [vmem:[%s9263_s25] sm:$0xff]  ;;  %v9269_v11 = vld [vmem:[%s9263_s25 + $0x8] sm:$0xff]  ;;  %v9272_v12 = vld [vmem:[%s9263_s25 + $0xf8] sm:$0xff]  ;;  %s12161_s7 = sld [smem:[#allocation40_spill]]  ;;  %s12162_s6 = sld [smem:[#allocation39_spill]] }
  0x31   : > { %7497 = vmatprep.subr.bf16.mxu0 %v975_v7  ;;  %12043 = vst [vmem:[#allocation19_spill] sm:$0xff] %v9266_v10  ;;  %v584_v13 = vrot.slane %v9266_v10, 7  ;;  %v585_v14 = vrot.slane %v9269_v11, 7  ;;  %v614_v15 = vrot.slane %v9272_v12, 7  ;;  %v9280_v16 = vld [vmem:[%s9263_s25 + $0x10] sm:$0xff]  ;;  %v9283_v17 = vld [vmem:[%s9263_s25 + $0x18] sm:$0xff]  ;;  %s10155_s0 = scalar_lea.vmem %s12076_s9, %s7092_s30 }
  0x32   : > { %7498 = vmatpush3.bf16.msra.mxu0 %v975_v7  ;;  %v586_v18 = vrot.slane %v9280_v16, 7  ;;  %v587_v19 = vrot.slane %v9283_v17, 7  ;;  %v9288_v20 = vld [vmem:[%s9263_s25 + $0x20] sm:$0xff]  ;;  %v9291_v21 = vld [vmem:[%s9263_s25 + $0x28] sm:$0xff]  ;;  %v9305_v27 = vld [vmem:[%s9263_s25 + $0x30] sm:$0xff]  ;;  %v11966_v3 = vrot.slane %v9266_v10, 1 }
  0x33   : > { %7531 = vmatprep.subr.bf16.mxu0 %v1295_v8  ;;  %12044 = vst [vmem:[#allocation20_spill] sm:$0xff] %v9288_v20  ;;  %v644_v23 = vsel %vm615_vm2, %v584_v13, %v585_v14  ;;  %v645_v24 = vsel %vm615_vm2, %v614_v15, %v584_v13  ;;  %v588_v25 = vrot.slane %v9288_v20, 7  ;;  %v589_v26 = vrot.slane %v9291_v21, 7  ;;  %v9308_v28 = vld [vmem:[%s9263_s25 + $0x38] sm:$0xff]  ;;  %v9332_v40 = vld [vmem:[%s9263_s25 + $0x40] sm:$0xff]  ;;  %v9337_v41 = vld [vmem:[%s9263_s25 + $0x50] sm:$0xff] }
  0x34   : > { %v648_v29 = vsel %vm646_vm4, %v645_v24, 0.0  ;;  %v642_v30 = vsel %vm615_vm2, %v586_v18, %v587_v19  ;;  %v643_v31 = vsel %vm615_vm2, %v585_v14, %v586_v18  ;;  %v590_v32 = vrot.slane %v9305_v27, 7  ;;  %v9350_v46 = vld [vmem:[%s9263_s25 + $0x48] sm:$0xff]  ;;  %v9355_v48 = vld [vmem:[%s9263_s25 + $0x58] sm:$0xff]  ;;  %v9369_v56 = vld [vmem:[%s9263_s25 + $0x60] sm:$0xff]  ;;  %s12019_s26 = scalar_lea.vmem [#allocation9], %s11202_s16 }
  0x35   : > { %v9317_v33 = vpack.c.bf16 %v644_v23, %v648_v29  ;;  %v650_v34 = vsel %vm646_vm4, %v643_v31, 0.0  ;;  %v641_v35 = vsel %vm615_vm2, %v587_v19, %v588_v25  ;;  %v591_v38 = vrot.slane %v9308_v28, 7  ;;  %v9374_v57 = vld [vmem:[%s9263_s25 + $0x70] sm:$0xff]  ;;  %v9383_v60 = vld [vmem:[%s9263_s25 + $0x68] sm:$0xff]  ;;  %v9391_v0 = vld [vmem:[%s9263_s25 + $0x78] sm:$0xff]  ;;  %s12020_s30 = sand.u32 1, %s9210_s22  }
  0x36   : > { %v9326_v37 = vpack.c.bf16 %v642_v30, %v650_v34  ;;  %v639_v39 = vsel %vm615_vm2, %v589_v26, %v590_v32  ;;  %v640_v42 = vsel %vm615_vm2, %v588_v25, %v589_v26  ;;  %v652_v43 = vsel %vm646_vm4, %v641_v35, 0.0  ;;  %v9405_v14 = vld [vmem:[%s9263_s25 + $0x80] sm:$0xff]  ;;  %v9410_v18 = vld [vmem:[%s9263_s25 + $0x90] sm:$0xff]  ;;  %v9419_v23 = vld [vmem:[%s9263_s25 + $0x88] sm:$0xff]  ;;  %s12164_s11 = sld [smem:[#allocation42_spill]] }
  0x37   : > { %7500 = vmatmul.mubr.msk.bf16.vlgmr.msra.gmra.mrb[0].mxu0 %vm712_vm3, %v9317_v33  ;;  %v638_v44 = vsel %vm615_vm2, %v590_v32, %v591_v38  ;;  %v654_v45 = vsel %vm646_vm4, %v639_v39, 0.0  ;;  %v592_v47 = vrot.slane %v9332_v40, 7  ;;  %v594_v49 = vrot.slane %v9337_v41, 7  ;;  %v9427_v29 = vld [vmem:[%s9263_s25 + $0x98] sm:$0xff] }
  0x38   : > { %7532 = vmatpush3.bf16.msra.mxu0 %v1295_v8  ;;  %7503 = vmatprep.mubr.msk.bf16.mxu0 %vm712_vm3, %v9326_v37  ;;  %v9358_v50 = vpack.c.bf16 %v640_v42, %v652_v43  ;;  %v9360_v51 = vpack.c.bf16 %v638_v44, %v654_v45  ;;  %v593_v52 = vrot.slane %v9350_v46, 7  ;;  %v595_v54 = vrot.slane %v9355_v48, 7  ;;  %v9441_v42 = vld [vmem:[%s9263_s25 + $0xa0] sm:$0xff]  ;;  %v9446_v43 = vld [vmem:[%s9263_s25 + $0xb0] sm:$0xff] }
  0x39   : > { %7565 = vmatprep.subr.bf16.mxu0 %v9324_v36  ;;  %v637_v53 = vsel %vm615_vm2, %v591_v38, %v592_v47  ;;  %v596_v63 = vrot.slane %v9369_v56, 7  ;;  %v598_v1 = vrot.slane %v9374_v57, 7  ;;  %v597_v5 = vrot.slane %v9383_v60, 7 }
  0x3a   : > { %v635_v55 = vsel %vm615_vm2, %v593_v52, %v594_v49  ;;  %v636_v58 = vsel %vm615_vm2, %v592_v47, %v593_v52  ;;  %v656_v59 = vsel %vm646_vm4, %v637_v53, 0.0  ;;  %v634_v61 = vsel %vm615_vm2, %v594_v49, %v595_v54  ;;  %v9459_v52 = vld [vmem:[%s9263_s25 + $0xa8] sm:$0xff] }
  0x3b   : > { %v658_v62 = vsel %vm646_vm4, %v635_v55, 0.0  ;;  %v9394_v2 = vpack.c.bf16 %v636_v58, %v656_v59  ;;  %v633_v7 = vsel %vm615_vm2, %v595_v54, %v596_v63  ;;  %v599_v8 = vrot.slane %v9391_v0, 7  ;;  %v9463_v54 = vld [vmem:[%s9263_s25 + $0xb8] sm:$0xff] }
  0x3c   : > { %v9396_v4 = vpack.c.bf16 %v634_v61, %v658_v62  ;;  %v631_v13 = vsel %vm615_vm2, %v597_v5, %v598_v1  ;;  %v632_v19 = vsel %vm615_vm2, %v596_v63, %v597_v5  ;;  %v660_v22 = vsel %vm646_vm4, %v633_v7, 0.0  ;;  %v9477_v5 = vld [vmem:[%s9263_s25 + $0xc0] sm:$0xff]  ;;  %v9482_v7 = vld [vmem:[%s9263_s25 + $0xd0] sm:$0xff] }
  0x3d   : > { %v630_v24 = vsel %vm615_vm2, %v598_v1, %v599_v8  ;;  %v662_v25 = vsel %vm646_vm4, %v631_v13, 0.0  ;;  %v600_v26 = vrot.slane %v9405_v14, 7  ;;  %v602_v30 = vrot.slane %v9410_v18, 7 }
  0x3e   : > { %v9430_v31 = vpack.c.bf16 %v632_v19, %v660_v22  ;;  %v9432_v32 = vpack.c.bf16 %v630_v24, %v662_v25  ;;  %v601_v34 = vrot.slane %v9419_v23, 7  ;;  %v603_v38 = vrot.slane %v9427_v29, 7  ;;  %v9495_v24 = vld [vmem:[%s9263_s25 + $0xc8] sm:$0xff] }
  0x3f   : > { %7504 = vmatmul.mubr.msk.bf16.gmra.mrb[4].mxu0 %vm712_vm3, %v9358_v50  ;;  %v629_v35 = vsel %vm615_vm2, %v599_v8, %v600_v26  ;;  %v604_v53 = vrot.slane %v9441_v42, 7  ;;  %v606_v55 = vrot.slane %v9446_v43, 7  ;;  %v605_v61 = vrot.slane %v9459_v52, 7 }
  0x40   : > { %7507 = vmatprep.mubr.msk.bf16.mxu0 %vm712_vm3, %v9360_v51  ;;  %v627_v39 = vsel %vm615_vm2, %v601_v34, %v602_v30  ;;  %v628_v44 = vsel %vm615_vm2, %v600_v26, %v601_v34  ;;  %v664_v45 = vsel %vm646_vm4, %v629_v35, 0.0  ;;  %v626_v47 = vsel %vm615_vm2, %v602_v30, %v603_v38  ;;  %v9499_v26 = vld [vmem:[%s9263_s25 + $0xd8] sm:$0xff] }
  0x41   : > { %v666_v49 = vsel %vm646_vm4, %v627_v39, 0.0  ;;  %v9466_v58 = vpack.c.bf16 %v628_v44, %v664_v45  ;;  %v625_v62 = vsel %vm615_vm2, %v603_v38, %v604_v53  ;;  %v607_v63 = vrot.slane %v9463_v54, 7 }
  0x42   : > { %v9468_v59 = vpack.c.bf16 %v626_v47, %v666_v49  ;;  %v623_v1 = vsel %vm615_vm2, %v605_v61, %v606_v55  ;;  %v624_v8 = vsel %vm615_vm2, %v604_v53, %v605_v61  ;;  %v668_v13 = vsel %vm646_vm4, %v625_v62, 0.0  ;;  %v9513_v47 = vld [vmem:[%s9263_s25 + $0xe0] sm:$0xff]  ;;  %v9528_v62 = vld [vmem:[%s9263_s25 + $0xe8] sm:$0xff] }
  0x43   : > { %v622_v19 = vsel %vm615_vm2, %v606_v55, %v607_v63  ;;  %v670_v22 = vsel %vm646_vm4, %v623_v1, 0.0  ;;  %v608_v25 = vrot.slane %v9477_v5, 7  ;;  %v610_v30 = vrot.slane %v9482_v7, 7 }
  0x44   : > { %v9502_v34 = vpack.c.bf16 %v624_v8, %v668_v13  ;;  %v9504_v35 = vpack.c.bf16 %v622_v19, %v670_v22  ;;  %v609_v38 = vrot.slane %v9495_v24, 7  ;;  %v611_v44 = vrot.slane %v9499_v26, 7  ;;  %v9541_v22 = vld [vmem:[%s9263_s25 + $0xf0] sm:$0xff]  ;;  %s11249_s25 = scalar_lea.vmem [#allocation4], %s12018_s17  ;;  %s12021_s17 = sshll.u32 %s9210_s22, 10 }
  0x45   : > { %v621_v39 = vsel %vm615_vm2, %v607_v63, %v608_v25  ;;  %v612_v63 = vrot.slane %v9513_v47, 7  ;;  %v613_v13 = vrot.slane %v9528_v62, 7 }
  0x46   : > { %v619_v45 = vsel %vm615_vm2, %v609_v38, %v610_v30  ;;  %v620_v49 = vsel %vm615_vm2, %v608_v25, %v609_v38  ;;  %v672_v53 = vsel %vm646_vm4, %v621_v39, 0.0  ;;  %v618_v55 = vsel %vm615_vm2, %v610_v30, %v611_v44 }
  0x47   : > { %7508 = vmatmul.mubr.msk.bf16.gmra.mrb[8].mxu0 %vm712_vm3, %v9394_v2  ;;  %v674_v61 = vsel %vm646_vm4, %v619_v45, 0.0  ;;  %v9531_v1 = vpack.c.bf16 %v620_v49, %v672_v53  ;;  %v617_v19 = vsel %vm615_vm2, %v611_v44, %v612_v63  ;;  %v616_v25 = vsel %vm615_vm2, %v612_v63, %v613_v13 }
  0x48   : > { %7511 = vmatprep.mubr.msk.bf16.mxu0 %vm712_vm3, %v9396_v4  ;;  %v9533_v8 = vpack.c.bf16 %v618_v55, %v674_v61  ;;  %v676_v30 = vsel %vm646_vm4, %v617_v19, 0.0  ;;  %v1490_v38 = vrot.slane %v9541_v22, 7  ;;  %v1139_v39 = vrot.slane %v9269_v11, 1 }
  0x49   : > { %v1140_v44 = vrot.slane %v9280_v16, 1  ;;  %v9554_v45 = vadd.s32 8, %v9255_v9  ;;  %v1141_v49 = vrot.slane %v9283_v17, 1  ;;  %v1142_v53 = vrot.slane %v9288_v20, 1  ;;  %v8877_v9 = vld [vmem:[%s12159_s5 + $0x80] sm:$0xff]  }
  0x4a   : > { %12045 = vst [vmem:[#allocation21_spill] sm:$0xff] %v9533_v8  ;;  %v1491_v55 = vsel %vm615_vm2, %v1490_v38, %v614_v15  ;;  %v1492_v61 = vsel %vm615_vm2, %v613_v13, %v1490_v38  ;;  %v9564_v63 = vpack.c.bf16 %v616_v25, %v676_v30  ;;  %v9580_v13 = vpack.c.bf16 %v9269_v11, %v9266_v10 }
  0x4b   : > { %v1493_v19 = vsel %vm646_vm4, %v1492_v61, 0.0  ;;  %v1198_v20 = vsel %vm1169_vm5, %v1139_v39, %v1140_v44  ;;  %vm1201_vm6 = vcmp.lt.s32.totalorder %v9554_v45, 15  ;;  %v1196_v15 = vsel %vm1169_vm5, %v1141_v49, %v1142_v53  ;;  %v8856_v45 = vld [vmem:[%s12074_s3 + $0x20] sm:$0xff]  }
  0x4c   : > { %v12046_v25 = vmov 0.0|0.0   ;;  %v1199_v30 = vsel %vm1169_vm5, %v11966_v3, %v1139_v39  ;;  %v1203_v38 = vsel %vm1201_vm6, %v1198_v20, 0.0  ;;  %v1197_v61 = vsel %vm1169_vm5, %v1140_v44, %v1141_v49  ;;  %v6695_v20 = vld [vmem:[%s12041_s1 + $0x8] sm:$0x3] }
  0x4d   : > { %v1205_v11 = vsel %vm1201_vm6, %v1196_v15, 0.0  ;;  %v1145_v10 = vrot.slane %v9308_v28, 1  ;;  %v1146_v39 = vrot.slane %v9332_v40, 1  ;;  %v9611_v49 = vand.u32 %v6695_v20, %v9248_v6 }
  0x4e   : > { %v1147_v20 = vrot.slane %v9350_v46, 1  ;;  %v1148_v3 = vrot.slane %v9337_v41, 1 }
  0x4f   : > { %7512 = vmatmul.mubr.msk.bf16.gmra.mrb[12].mxu0 %vm712_vm3, %v9430_v31  ;;  %v1192_v15 = vsel %vm1169_vm5, %v1145_v10, %v1146_v39 }
  0x50   : > { %7515 = vmatprep.mubr.msk.bf16.mxu0 %vm712_vm3, %v9432_v32 }
  0x57   : > { %7516 = vmatmul.mubr.msk.bf16.gmra.mrb[16].mxu0 %vm712_vm3, %v9466_v58 }
  0x58   : > { %7519 = vmatprep.mubr.msk.bf16.mxu0 %vm712_vm3, %v9468_v59 }
  0x5f   : > { %7520 = vmatmul.mubr.msk.bf16.gmra.mrb[20].mxu0 %vm712_vm3, %v9502_v34 }
  0x60   : > { %7523 = vmatprep.mubr.msk.bf16.mxu0 %vm712_vm3, %v9504_v35 }
  0x67   : > { %7524 = vmatmul.mubr.msk.bf16.gmra.mrb[24].mxu0 %vm712_vm3, %v9531_v1 }
  0x68   : > { %7527 = vmatprep.mubr.msk.bf16.mxu0 %vm712_vm3, %v9533_v8  ;;  %v9569_v8 = vpack.c.bf16 %v1491_v55, %v1493_v19  ;;  %v9591_v55 = vpack.c.bf16 %v9283_v17, %v9280_v16  ;;  %v1143_v19 = vrot.slane %v9291_v21, 1  ;;  %v9604_v16 = vpack.c.bf16 %v1203_v38, %v1199_v30 }
  0x69   : > { %v9606_v17 = vpack.c.bf16 %v1205_v11, %v1197_v61  ;;  %v1209_v11 = vsel %vm1201_vm6, %v1192_v15, 0.0 }
  0x6a   : > { %12047 = vst [vmem:[#allocation22_spill] sm:$0xff] %v9604_v16  ;;  %v1195_v30 = vsel %vm1169_vm5, %v1142_v53, %v1143_v19 }
  0x6b   : > { %12048 = vst [vmem:[#allocation23_spill] sm:$0xff] %v9606_v17 }
  0x6f   : > { %7528 = vmatmul.mubr.msk.bf16.gmra.mrb[28].mxu0 %vm712_vm3, %v9564_v63 }
  0x70   : > { %7533 = vmatprep.mubr.bf16.mxu0 %v12046_v25  ;;  %v1144_v25 = vrot.slane %v9305_v27, 1 }
  0x72   : > { %v1194_v44 = vsel %vm1169_vm5, %v1143_v19, %v1144_v25  ;;  %v1193_v61 = vsel %vm1169_vm5, %v1144_v25, %v1145_v10  ;;  %v1190_v10 = vsel %vm1169_vm5, %v1147_v20, %v1148_v3 }
  0x73   : > { %v1207_v38 = vsel %vm1201_vm6, %v1194_v44, 0.0  ;;  %v9635_v19 = vpack.c.bf16 %v1209_v11, %v1193_v61  ;;  %v1191_v44 = vsel %vm1169_vm5, %v1146_v39, %v1147_v20  ;;  %v1211_v15 = vsel %vm1201_vm6, %v1190_v10, 0.0 }
  0x74   : > { %v9633_v53 = vpack.c.bf16 %v1207_v38, %v1195_v30  ;;  %v1151_v61 = vrot.slane %v9383_v60, 1  ;;  %v1152_v11 = vrot.slane %v9374_v57, 1 }
  0x75   : > { %12050 = vst [vmem:[#allocation25_spill] sm:$0xff] %v9635_v19 }
  0x76   : > { %12049 = vst [vmem:[#allocation24_spill] sm:$0xff] %v9633_v53  ;;  %v1186_v20 = vsel %vm1169_vm5, %v1151_v61, %v1152_v11 }
  0x77   : > { %7534 = vmatmul.mubr.msk.bf16.vlgmr.msra.gmra.mrb[0].mxu0 %vm712_vm3, %v9604_v16  ;;  %v9657_v16 = vpack.c.bf16 %v1211_v15, %v1191_v44  ;;  %v1215_v10 = vsel %vm1201_vm6, %v1186_v20, 0.0  ;;  %v1155_v15 = vrot.slane %v9419_v23, 1 }
  0x78   : > { %7566 = vmatpush3.bf16.msra.mxu0 %v9324_v36  ;;  %7537 = vmatprep.mubr.msk.bf16.mxu0 %vm712_vm3, %v9606_v17  ;;  %v1149_v36 = vrot.slane %v9355_v48, 1  ;;  %v1150_v17 = vrot.slane %v9369_v56, 1 }
  0x79   : > { %7599 = vmatprep.subr.bf16.mxu0 %v9611_v49  ;;  %12051 = vst [vmem:[#allocation26_spill] sm:$0xff] %v9657_v16 }
  0x7a   : > { %v1188_v25 = vsel %vm1169_vm5, %v1149_v36, %v1150_v17  ;;  %v1189_v30 = vsel %vm1169_vm5, %v1148_v3, %v1149_v36  ;;  %v1187_v36 = vsel %vm1169_vm5, %v1150_v17, %v1151_v61 }
  0x7b   : > { %v1213_v38 = vsel %vm1201_vm6, %v1188_v25, 0.0 }
  0x7c   : > { %v9659_v39 = vpack.c.bf16 %v1213_v38, %v1189_v30  ;;  %v1156_v30 = vrot.slane %v9410_v18, 1  ;;  %v1157_v38 = vrot.slane %v9427_v29, 1 }
  0x7e   : > { %12052 = vst [vmem:[#allocation27_spill] sm:$0xff] %v9659_v39  ;;  %v1182_v61 = vsel %vm1169_vm5, %v1155_v15, %v1156_v30 }
  0x7f   : > { %7538 = vmatmul.mubr.msk.bf16.gmra.mrb[4].mxu0 %vm712_vm3, %v9633_v53  ;;  %v1153_v53 = vrot.slane %v9391_v0, 1  ;;  %v1219_v20 = vsel %vm1201_vm6, %v1182_v61, 0.0 }
  0x80   : > { %7541 = vmatprep.mubr.msk.bf16.mxu0 %vm712_vm3, %v9635_v19  ;;  %v1154_v19 = vrot.slane %v9405_v14, 1 }
  0x81   : > { %v1185_v25 = vsel %vm1169_vm5, %v1152_v11, %v1153_v53 }
  0x82   : > { %v1184_v3 = vsel %vm1169_vm5, %v1153_v53, %v1154_v19  ;;  %v1183_v11 = vsel %vm1169_vm5, %v1154_v19, %v1155_v15 }
  0x83   : > { %v1217_v44 = vsel %vm1201_vm6, %v1184_v3, 0.0  ;;  %v1181_v3 = vsel %vm1169_vm5, %v1156_v30, %v1157_v38 }
  0x84   : > { %v9683_v17 = vpack.c.bf16 %v1217_v44, %v1185_v25  ;;  %v1160_v25 = vrot.slane %v9446_v43, 1  ;;  %v1161_v44 = vrot.slane %v9463_v54, 1 }
  0x86   : > { %12054 = vst [vmem:[#allocation29_spill] sm:$0xff] %v9683_v17 }
  0x87   : > { %7542 = vmatmul.mubr.msk.bf16.gmra.mrb[8].mxu0 %vm712_vm3, %v9657_v16  ;;  %v9681_v16 = vpack.c.bf16 %v1215_v10, %v1187_v36  ;;  %v1159_v10 = vrot.slane %v9459_v52, 1 }
  0x88   : > { %7545 = vmatprep.mubr.msk.bf16.mxu0 %vm712_vm3, %v9659_v39  ;;  %v1158_v39 = vrot.slane %v9441_v42, 1 }
  0x89   : > { %12053 = vst [vmem:[#allocation28_spill] sm:$0xff] %v9681_v16  ;;  %v1178_v15 = vsel %vm1169_vm5, %v1159_v10, %v1160_v25 }
  0x8a   : > { %v1180_v53 = vsel %vm1169_vm5, %v1157_v38, %v1158_v39  ;;  %v1179_v38 = vsel %vm1169_vm5, %v1158_v39, %v1159_v10  ;;  %v1223_v61 = vsel %vm1201_vm6, %v1178_v15, 0.0 }
  0x8b   : > { %v1221_v36 = vsel %vm1201_vm6, %v1180_v53, 0.0  ;;  %v1177_v53 = vsel %vm1169_vm5, %v1160_v25, %v1161_v44 }
  0x8c   : > { %v9707_v19 = vpack.c.bf16 %v1221_v36, %v1181_v3  ;;  %v1164_v3 = vrot.slane %v9482_v7, 1  ;;  %v1165_v36 = vrot.slane %v9499_v26, 1 }
  0x8e   : > { %12056 = vst [vmem:[#allocation31_spill] sm:$0xff] %v9707_v19 }
  0x8f   : > { %7546 = vmatmul.mubr.msk.bf16.gmra.mrb[12].mxu0 %vm712_vm3, %v9681_v16  ;;  %v9705_v16 = vpack.c.bf16 %v1219_v20, %v1183_v11  ;;  %v1163_v20 = vrot.slane %v9495_v24, 1 }
  0x90   : > { %7549 = vmatprep.mubr.msk.bf16.mxu0 %vm712_vm3, %v9683_v17  ;;  %v1162_v17 = vrot.slane %v9477_v5, 1 }
  0x91   : > { %12055 = vst [vmem:[#allocation30_spill] sm:$0xff] %v9705_v16  ;;  %v1174_v10 = vsel %vm1169_vm5, %v1163_v20, %v1164_v3 }
  0x92   : > { %v1176_v30 = vsel %vm1169_vm5, %v1161_v44, %v1162_v17  ;;  %v1175_v44 = vsel %vm1169_vm5, %v1162_v17, %v1163_v20  ;;  %v1227_v15 = vsel %vm1201_vm6, %v1174_v10, 0.0  ;;  %v6712_v10 = vld [vmem:[%s12041_s1 + $0xa] sm:$0x3] }
  0x93   : > { %v1225_v11 = vsel %vm1201_vm6, %v1176_v30, 0.0  ;;  %v1173_v30 = vsel %vm1169_vm5, %v1164_v3, %v1165_v36 }
  0x94   : > { %v9731_v39 = vpack.c.bf16 %v1225_v11, %v1177_v53  ;;  %v1168_v53 = vrot.slane %v9541_v22, 1  ;;  %v9751_v11 = vpack.c.bf16 %v1227_v15, %v1175_v44 }
  0x97   : > { %7550 = vmatmul.mubr.msk.bf16.gmra.mrb[16].mxu0 %vm712_vm3, %v9705_v16  ;;  %v9729_v16 = vpack.c.bf16 %v1223_v61, %v1179_v38  ;;  %v1167_v61 = vrot.slane %v9528_v62, 1 }
  0x98   : > { %7553 = vmatprep.mubr.msk.bf16.mxu0 %vm712_vm3, %v9707_v19  ;;  %v1166_v19 = vrot.slane %v9513_v47, 1 }
  0x99   : > { %12057 = vst [vmem:[#allocation32_spill] sm:$0xff] %v9729_v16  ;;  %v1170_v17 = vsel %vm1169_vm5, %v1167_v61, %v1168_v53 }
  0x9a   : > { %v1172_v25 = vsel %vm1169_vm5, %v1165_v36, %v1166_v19  ;;  %v1171_v20 = vsel %vm1169_vm5, %v1166_v19, %v1167_v61  ;;  %v1231_v3 = vsel %vm1201_vm6, %v1170_v17, 0.0  ;;  %v12059_v19 = vld [vmem:[#allocation20_spill] sm:$0xff]  ;;  %v9840_v61 = vpack.c.bf16 %v9383_v60, %v9369_v56 }
  0x9b   : > { %v1229_v38 = vsel %vm1201_vm6, %v1172_v25, 0.0  ;;  %v9767_v36 = vpack.c.bf16 %v1231_v3, %v1171_v20  ;;  %v1911_v25 = vand.u32 %v6712_v10, %v9248_v6  ;;  %v9815_v44 = vpack.c.bf16 %v9291_v21, %v12059_v19 }
  0x9c   : > { %v9836_v21 = vpack.c.bf16 %v9355_v48, %v9337_v41  ;;  %v9864_v41 = vpack.c.bf16 %v9459_v52, %v9441_v42  ;;  %v9876_v48 = vpack.c.bf16 %v9495_v24, %v9477_v5  ;;  %v9884_v56 = vpack.c.bf16 %v9499_v26, %v9482_v7  ;;  %v12063_v42 = vld [vmem:[#allocation25_spill] sm:$0xff]  ;;  %v12065_v52 = vld [vmem:[#allocation27_spill] sm:$0xff]  ;;  %v12068_v7 = vld [vmem:[#allocation30_spill] sm:$0xff] }
  0x9d   : > { %v9896_v60 = vpack.c.bf16 %v9272_v12, %v9541_v22  ;;  %v12067_v5 = vld [vmem:[#allocation29_spill] sm:$0xff]  ;;  %v12069_v24 = vld [vmem:[#allocation31_spill] sm:$0xff]  ;;  %v6761_v22 = vld [vmem:[%s12041_s1 + $0x10] sm:$0x3] }
  0x9f   : > { %7554 = vmatmul.mubr.msk.bf16.gmra.mrb[20].mxu0 %vm712_vm3, %v9729_v16  ;;  %v9753_v16 = vpack.c.bf16 %v1229_v38, %v1173_v30  ;;  %v9824_v30 = vpack.c.bf16 %v9308_v28, %v9305_v27  ;;  %v9828_v38 = vpack.c.bf16 %v9350_v46, %v9332_v40  ;;  %v9848_v27 = vpack.c.bf16 %v9391_v0, %v9374_v57  ;;  %v12060_v0 = vld [vmem:[#allocation22_spill] sm:$0xff] }
  0xa0   : > { %7557 = vmatprep.mubr.msk.bf16.mxu0 %vm712_vm3, %v9731_v39  ;;  %v9852_v28 = vpack.c.bf16 %v9419_v23, %v9405_v14  ;;  %v9860_v40 = vpack.c.bf16 %v9427_v29, %v9410_v18  ;;  %v9872_v46 = vpack.c.bf16 %v9463_v54, %v9446_v43  ;;  %v9888_v57 = vpack.c.bf16 %v9528_v62, %v9513_v47  ;;  %v6745_v14 = vld [vmem:[%s12041_s1 + $0xe] sm:$0x3]  ;;  %v12061_v23 = vld [vmem:[#allocation23_spill] sm:$0xff]  ;;  %v12064_v43 = vld [vmem:[#allocation26_spill] sm:$0xff] }
  0xa1   : > { %v2307_v18 = vand.u32 %v6745_v14, %v9248_v6  ;;  %v12062_v29 = vld [vmem:[#allocation24_spill] sm:$0xff]  ;;  %v1899_v47 = vrot.slane %v9272_v12, 1  ;;  %v12071_v62 = vld [vmem:[#allocation19_spill] sm:$0xff] }
  0xa2   : > { %v12066_v54 = vld [vmem:[#allocation28_spill] sm:$0xff]  ;;  %v12072_v17 = vrot.slane %v12071_v62, 1 }
  0xa3   : > { %v12070_v26 = vld [vmem:[#allocation32_spill] sm:$0xff]  ;;  %v1900_v3 = vsel %vm1169_vm5, %v1168_v53, %v1899_v47  ;;  %v2505_v53 = vand.u32 %v6761_v22, %v9248_v6 }
  0xa4   : > { %v1901_v20 = vsel %vm1169_vm5, %v1899_v47, %v12072_v17 }
  0xa5   : > { %v1903_v10 = vsel %vm1201_vm6, %v1901_v20, 0.0 }
  0xa6   : > { %v9945_v12 = vpack.c.bf16 %v1903_v10, %v1900_v3 }
  0xa7   : > { %7558 = vmatmul.mubr.msk.bf16.gmra.mrb[24].mxu0 %vm712_vm3, %v9751_v11 }
  0xa8   : > { %7561 = vmatprep.mubr.msk.bf16.mxu0 %vm712_vm3, %v9753_v16 }
  0xaf   : > { %7562 = vmatmul.mubr.msk.bf16.gmra.mrb[28].mxu0 %vm712_vm3, %v9767_v36 }
  0xb0   : > { %7567 = vmatprep.mubr.msk.bf16.mxu0 %vm712_vm3, %v9317_v33  ;;  %v12058_v33 = vld [vmem:[#allocation21_spill] sm:$0xff] }
  0xb7   : > { %7568 = vmatmul.mubr.msk.bf16.vlgmr.msra.gmra.mrb[0].mxu0 %vm712_vm3, %v9326_v37 }
  0xb8   : > { %7600 = vmatpush3.bf16.msra.mxu0 %v9611_v49  ;;  %7571 = vmatprep.mubr.msk.bf16.mxu0 %vm712_vm3, %v9358_v50  ;;  %v6729_v49 = vld [vmem:[%s12041_s1 + $0xc] sm:$0x3] }
  0xb9   : > { %7633 = vmatprep.subr.bf16.mxu0 %v1911_v25  ;;  %v2109_v15 = vand.u32 %v6729_v49, %v9248_v6 }
  0xbf   : > { %7572 = vmatmul.mubr.msk.bf16.gmra.mrb[4].mxu0 %vm712_vm3, %v9360_v51 }
  0xc0   : > { %7575 = vmatprep.mubr.msk.bf16.mxu0 %vm712_vm3, %v9394_v2 }
  0xc7   : > { %7576 = vmatmul.mubr.msk.bf16.gmra.mrb[8].mxu0 %vm712_vm3, %v9396_v4 }
  0xc8   : > { %7579 = vmatprep.mubr.msk.bf16.mxu0 %vm712_vm3, %v9430_v31 }
  0xcf   : > { %7580 = vmatmul.mubr.msk.bf16.gmra.mrb[12].mxu0 %vm712_vm3, %v9432_v32 }
  0xd0   : > { %7583 = vmatprep.mubr.msk.bf16.mxu0 %vm712_vm3, %v9466_v58 }
  0xd7   : > { %7584 = vmatmul.mubr.msk.bf16.gmra.mrb[16].mxu0 %vm712_vm3, %v9468_v59 }
  0xd8   : > { %7587 = vmatprep.mubr.msk.bf16.mxu0 %vm712_vm3, %v9502_v34 }
  0xdf   : > { %7588 = vmatmul.mubr.msk.bf16.gmra.mrb[20].mxu0 %vm712_vm3, %v9504_v35 }
  0xe0   : > { %7591 = vmatprep.mubr.msk.bf16.mxu0 %vm712_vm3, %v9531_v1 }
  0xe7   : > { %7592 = vmatmul.mubr.msk.bf16.gmra.mrb[24].mxu0 %vm712_vm3, %v12058_v33 }
  0xe8   : > { %7595 = vmatprep.mubr.msk.bf16.mxu0 %vm712_vm3, %v9564_v63 }
  0xef   : > { %7596 = vmatmul.mubr.msk.bf16.gmra.mrb[28].mxu0 %vm712_vm3, %v9569_v8 }
  0xf0   : > { %7601 = vmatprep.mubr.msk.bf16.mxu0 %vm712_vm3, %v9580_v13 }
  0xf7   : > { %7602 = vmatmul.mubr.msk.bf16.vlgmr.msra.gmra.mrb[0].mxu0 %vm712_vm3, %v9591_v55 }
  0xf8   : > { %7634 = vmatpush3.bf16.msra.mxu0 %v1911_v25  ;;  %7605 = vmatprep.mubr.msk.bf16.mxu0 %vm712_vm3, %v9815_v44  ;;  %v6631_v25 = vld [vmem:[%s12041_s1 + $0x2] sm:$0x3]  ;;  %s12163_s1 = sshll.u32 %s11202_s16, 6 }
  0xf9   : > { %7667 = vmatprep.subr.bf16.mxu0 %v2109_v15  ;;  %v766_v49 = vand.u32 %v6631_v25, %v9248_v6  ;;  %v12073_v6 = vmov 0.0|0.0  }
  0xfb   : > { %7463 = vmatprep.subr.bf16.mxu1 %v766_v49 }
  0xfc   : > { %7464 = vmatpush3.bf16.msra.mxu1 %v766_v49 }
  0xff   : > { %7606 = vmatmul.mubr.msk.bf16.gmra.mrb[4].mxu0 %vm712_vm3, %v9824_v30  ;;  %7466 = vmatmul.mubr.msk.bf16.vlgmr.msra.gmra.mrb[0].mxu1 %vm712_vm3, %v9580_v13 }
 0x100   : > { %7609 = vmatprep.mubr.msk.bf16.mxu0 %vm712_vm3, %v9828_v38  ;;  %7469 = vmatprep.mubr.msk.bf16.mxu1 %vm712_vm3, %v9591_v55 }
 0x107   : > { %7610 = vmatmul.mubr.msk.bf16.gmra.mrb[8].mxu0 %vm712_vm3, %v9836_v21  ;;  %7470 = vmatmul.mubr.msk.bf16.gmra.mrb[4].mxu1 %vm712_vm3, %v9815_v44 }
 0x108   : > { %7613 = vmatprep.mubr.msk.bf16.mxu0 %vm712_vm3, %v9840_v61  ;;  %7473 = vmatprep.mubr.msk.bf16.mxu1 %vm712_vm3, %v9824_v30 }
 0x10f   : > { %7614 = vmatmul.mubr.msk.bf16.gmra.mrb[12].mxu0 %vm712_vm3, %v9848_v27  ;;  %7474 = vmatmul.mubr.msk.bf16.gmra.mrb[8].mxu1 %vm712_vm3, %v9828_v38 }
 0x110   : > { %7617 = vmatprep.mubr.msk.bf16.mxu0 %vm712_vm3, %v9852_v28  ;;  %7477 = vmatprep.mubr.msk.bf16.mxu1 %vm712_vm3, %v9836_v21 }
 0x117   : > { %7618 = vmatmul.mubr.msk.bf16.gmra.mrb[16].mxu0 %vm712_vm3, %v9860_v40  ;;  %7478 = vmatmul.mubr.msk.bf16.gmra.mrb[12].mxu1 %vm712_vm3, %v9840_v61 }
 0x118   : > { %7621 = vmatprep.mubr.msk.bf16.mxu0 %vm712_vm3, %v9864_v41  ;;  %7481 = vmatprep.mubr.msk.bf16.mxu1 %vm712_vm3, %v9848_v27 }
 0x11f   : > { %7622 = vmatmul.mubr.msk.bf16.gmra.mrb[20].mxu0 %vm712_vm3, %v9872_v46  ;;  %7482 = vmatmul.mubr.msk.bf16.gmra.mrb[16].mxu1 %vm712_vm3, %v9852_v28 }
 0x120   : > { %7625 = vmatprep.mubr.msk.bf16.mxu0 %vm712_vm3, %v9876_v48  ;;  %7485 = vmatprep.mubr.msk.bf16.mxu1 %vm712_vm3, %v9860_v40 }
 0x127   : > { %7626 = vmatmul.mubr.msk.bf16.gmra.mrb[24].mxu0 %vm712_vm3, %v9884_v56  ;;  %7486 = vmatmul.mubr.msk.bf16.gmra.mrb[20].mxu1 %vm712_vm3, %v9864_v41 }
 0x128   : > { %7629 = vmatprep.mubr.msk.bf16.mxu0 %vm712_vm3, %v9888_v57  ;;  %7489 = vmatprep.mubr.msk.bf16.mxu1 %vm712_vm3, %v9872_v46 }
 0x12f   : > { %7630 = vmatmul.mubr.msk.bf16.gmra.mrb[28].mxu0 %vm712_vm3, %v9896_v60  ;;  %7490 = vmatmul.mubr.msk.bf16.gmra.mrb[24].mxu1 %vm712_vm3, %v9876_v48 }
 0x130   : > { %7635 = vmatprep.mubr.msk.bf16.mxu0 %vm712_vm3, %v12060_v0  ;;  %7493 = vmatprep.mubr.msk.bf16.mxu1 %vm712_vm3, %v9884_v56 }
 0x137   : > { %7636 = vmatmul.mubr.msk.bf16.vlgmr.msra.gmra.mrb[0].mxu0 %vm712_vm3, %v12061_v23  ;;  %7494 = vmatmul.mubr.msk.bf16.gmra.mrb[28].mxu1 %vm712_vm3, %v9888_v57 }
 0x138   : > { %7668 = vmatpush3.bf16.msra.mxu0 %v2109_v15  ;;  %7639 = vmatprep.mubr.msk.bf16.mxu0 %vm712_vm3, %v12062_v29 }
 0x139   : > { %7701 = vmatprep.subr.bf16.mxu0 %v2307_v18  ;;  %7771 = vmatprep.mubr.bf16.mxu1 %v12073_v6 }
 0x13f   : > { %7640 = vmatmul.mubr.msk.bf16.gmra.mrb[4].mxu0 %vm712_vm3, %v12063_v42 }
 0x140   : > { %7643 = vmatprep.mubr.msk.bf16.mxu0 %vm712_vm3, %v12064_v43 }
 0x147   : > { %7644 = vmatmul.mubr.msk.bf16.gmra.mrb[8].mxu0 %vm712_vm3, %v12065_v52 }
 0x148   : > { %7647 = vmatprep.mubr.msk.bf16.mxu0 %vm712_vm3, %v12066_v54 }
 0x14f   : > { %7648 = vmatmul.mubr.msk.bf16.gmra.mrb[12].mxu0 %vm712_vm3, %v12067_v5 }
 0x150   : > { %7651 = vmatprep.mubr.msk.bf16.mxu0 %vm712_vm3, %v12068_v7 }
 0x157   : > { %7652 = vmatmul.mubr.msk.bf16.gmra.mrb[16].mxu0 %vm712_vm3, %v12069_v24 }
 0x158   : > { %7655 = vmatprep.mubr.msk.bf16.mxu0 %vm712_vm3, %v12070_v26 }
 0x15f   : > { %7656 = vmatmul.mubr.msk.bf16.gmra.mrb[20].mxu0 %vm712_vm3, %v9731_v39 }
 0x160   : > { %7659 = vmatprep.mubr.msk.bf16.mxu0 %vm712_vm3, %v9751_v11 }
 0x167   : > { %7660 = vmatmul.mubr.msk.bf16.gmra.mrb[24].mxu0 %vm712_vm3, %v9753_v16 }
 0x168   : > { %7663 = vmatprep.mubr.msk.bf16.mxu0 %vm712_vm3, %v9767_v36 }
 0x16f   : > { %7664 = vmatmul.mubr.msk.bf16.gmra.mrb[28].mxu0 %vm712_vm3, %v9945_v12 }
 0x170   : > { %7669 = vmatprep.mubr.msk.bf16.mxu0 %vm712_vm3, %v9326_v37  ;;  %v8852_v37 = vld [vmem:[%s12074_s3 + $0x8] sm:$0xff]  }
 0x171   : > { %7769 = vmatprep.subr.bf16.mxu1 %v8852_v37 }
 0x172   : > { %7770 = vmatpush3.bf16.msra.mxu1 %v8852_v37 }
 0x177   : > { %7670 = vmatmul.mubr.msk.bf16.vlgmr.msra.gmra.mrb[0].mxu0 %vm712_vm3, %v9358_v50 }
 0x178   : > { %7702 = vmatpush3.bf16.msra.mxu0 %v2307_v18  ;;  %7673 = vmatprep.mubr.msk.bf16.mxu0 %vm712_vm3, %v9360_v51 }
 0x179   : > { %7735 = vmatprep.subr.bf16.mxu0 %v2505_v53 }
 0x17f   : > { %7674 = vmatmul.mubr.msk.bf16.gmra.mrb[4].mxu0 %vm712_vm3, %v9394_v2 }
 0x180   : > { %7677 = vmatprep.mubr.msk.bf16.mxu0 %vm712_vm3, %v9396_v4 }
 0x187   : > { %7678 = vmatmul.mubr.msk.bf16.gmra.mrb[8].mxu0 %vm712_vm3, %v9430_v31 }
 0x188   : > { %7681 = vmatprep.mubr.msk.bf16.mxu0 %vm712_vm3, %v9432_v32 }
 0x18f   : > { %7682 = vmatmul.mubr.msk.bf16.gmra.mrb[12].mxu0 %vm712_vm3, %v9466_v58 }
 0x190   : > { %7685 = vmatprep.mubr.msk.bf16.mxu0 %vm712_vm3, %v9468_v59 }
 0x197   : > { %7686 = vmatmul.mubr.msk.bf16.gmra.mrb[16].mxu0 %vm712_vm3, %v9502_v34 }
 0x198   : > { %7689 = vmatprep.mubr.msk.bf16.mxu0 %vm712_vm3, %v9504_v35 }
 0x19f   : > { %7690 = vmatmul.mubr.msk.bf16.gmra.mrb[20].mxu0 %vm712_vm3, %v9531_v1 }
 0x1a0   : > { %7693 = vmatprep.mubr.msk.bf16.mxu0 %vm712_vm3, %v12058_v33 }
 0x1a7   : > { %7694 = vmatmul.mubr.msk.bf16.gmra.mrb[24].mxu0 %vm712_vm3, %v9564_v63  ;;  %v10101_v63 = vld [vmem:[%s12074_s3] sm:$0xff]  }
 0x1a8   : > { %7697 = vmatprep.mubr.msk.bf16.mxu0 %vm712_vm3, %v9569_v8  ;;  %7803 = vmatprep.subr.bf16.mxu1 %v10101_v63 }
 0x1af   : > { %7698 = vmatmul.mubr.bf16.gmra.mrb[28].mxu0 %v12073_v6 }
 0x1b0   : > { %7703 = vmatprep.mubr.msk.bf16.mxu0 %vm712_vm3, %v9591_v55 }
 0x1b7   : > { %7704 = vmatmul.mubr.msk.bf16.vlgmr.msra.gmra.mrb[0].mxu0 %vm712_vm3, %v9815_v44 }
 0x1b8   : > { %7736 = vmatpush3.bf16.msra.mxu0 %v2505_v53  ;;  %7707 = vmatprep.mubr.msk.bf16.mxu0 %vm712_vm3, %v9824_v30 }
 0x1bf   : > { %7708 = vmatmul.mubr.msk.bf16.gmra.mrb[4].mxu0 %vm712_vm3, %v9828_v38 }
 0x1c0   : > { %7711 = vmatprep.mubr.msk.bf16.mxu0 %vm712_vm3, %v9836_v21 }
 0x1c7   : > { %7712 = vmatmul.mubr.msk.bf16.gmra.mrb[8].mxu0 %vm712_vm3, %v9840_v61 }
 0x1c8   : > { %7715 = vmatprep.mubr.msk.bf16.mxu0 %vm712_vm3, %v9848_v27 }
 0x1cf   : > { %7716 = vmatmul.mubr.msk.bf16.gmra.mrb[12].mxu0 %vm712_vm3, %v9852_v28 }
 0x1d0   : > { %7719 = vmatprep.mubr.msk.bf16.mxu0 %vm712_vm3, %v9860_v40 }
 0x1d2   : > { %v7467_v50 = vpop.f32.mrb[0].mxu1 }
 0x1d3   : > { %v802_v51 = vpop.f32.mrb[1].mxu1 }
 0x1d4   : > { %v7468_v2 = vpop.f32.mrb[2].mxu1 }
 0x1d5   : > { %v805_v4 = vpop.f32.mrb[3].mxu1 }
 0x1d7   : > { %7720 = vmatmul.mubr.msk.bf16.gmra.mrb[16].mxu0 %vm712_vm3, %v9864_v41 }
 0x1d8   : > { %7723 = vmatprep.mubr.msk.bf16.mxu0 %vm712_vm3, %v9872_v46 }
 0x1da   : > { %v7471_v31 = vpop.f32.mrb[4].mxu1 }
 0x1db   : > { %v10084_v32 = vpop.f32.mrb[5].mxu1 }
 0x1dc   : > { %v10086_v58 = vpop.f32.mrb[6].mxu1 }
 0x1dd   : > { %v10088_v59 = vpop.f32.mrb[7].mxu1 }
 0x1df   : > { %7724 = vmatmul.mubr.msk.bf16.gmra.mrb[20].mxu0 %vm712_vm3, %v9876_v48 }
 0x1e0   : > { %7727 = vmatprep.mubr.msk.bf16.mxu0 %vm712_vm3, %v9884_v56 }
 0x1e2   : > { %v10090_v34 = vpop.f32.mrb[8].mxu1 }
 0x1e3   : > { %v10092_v35 = vpop.f32.mrb[9].mxu1 }
 0x1e4   : > { %v10094_v1 = vpop.f32.mrb[10].mxu1 }
 0x1e5   : > { %v10096_v8 = vpop.f32.mrb[11].mxu1 }
 0x1e7   : > { %7728 = vmatmul.mubr.msk.bf16.gmra.mrb[24].mxu0 %vm712_vm3, %v9888_v57  ;;  %v10147_v57 = vld [vmem:[%s12075_s2] ss:$0 sm:$0xff]  ;;  %s11661_s2 = scalar_lea.vmem [#allocation6], %s12163_s1 }
 0x1e8   : > { %7731 = vmatprep.mubr.msk.bf16.mxu0 %vm712_vm3, %v9896_v60 }
 0x1ea   : > { %v10104_v13 = vpop.f32.mrb[12].mxu1 }
 0x1eb   : > { %v10106_v55 = vpop.f32.mrb[13].mxu1 }
 0x1ef   : > { %7732 = vmatmul.mubr.bf16.gmra.mrb[28].mxu0 %v12073_v6 }
 0x1f0   : > { %7737 = vmatprep.mubr.msk.bf16.mxu0 %vm712_vm3, %v12061_v23 }
 0x1f7   : > { %7738 = vmatmul.mubr.msk.bf16.vlgmr.msra.gmra.mrb[0].mxu0 %vm712_vm3, %v12062_v29 }
 0x1f8   : > { %7741 = vmatprep.mubr.msk.bf16.mxu0 %vm712_vm3, %v12063_v42 }
 0x1ff   : > { %7742 = vmatmul.mubr.msk.bf16.gmra.mrb[4].mxu0 %vm712_vm3, %v12064_v43 }
 0x200   : > { %7745 = vmatprep.mubr.msk.bf16.mxu0 %vm712_vm3, %v12065_v52 }
 0x207   : > { %7746 = vmatmul.mubr.msk.bf16.gmra.mrb[8].mxu0 %vm712_vm3, %v12066_v54 }
 0x208   : > { %7749 = vmatprep.mubr.msk.bf16.mxu0 %vm712_vm3, %v12067_v5 }
 0x20f   : > { %7750 = vmatmul.mubr.msk.bf16.gmra.mrb[12].mxu0 %vm712_vm3, %v12068_v7 }
 0x210   : > { %7753 = vmatprep.mubr.msk.bf16.mxu0 %vm712_vm3, %v12069_v24 }
 0x217   : > { %7754 = vmatmul.mubr.msk.bf16.gmra.mrb[16].mxu0 %vm712_vm3, %v12070_v26 }
 0x218   : > { %7757 = vmatprep.mubr.msk.bf16.mxu0 %vm712_vm3, %v9731_v39 }
 0x21f   : > { %7758 = vmatmul.mubr.msk.bf16.gmra.mrb[20].mxu0 %vm712_vm3, %v9751_v11 }
 0x220   : > { %7761 = vmatprep.mubr.msk.bf16.mxu0 %vm712_vm3, %v9753_v16  ;;  %v10108_v16 = vpop.f32.mrb[14].mxu1 }
 0x221   : > { %v10110_v39 = vpop.f32.mrb[15].mxu1 }
 0x222   : > { %v10112_v11 = vpop.f32.mrb[16].mxu1 }
 0x227   : > { %7762 = vmatmul.mubr.msk.bf16.gmra.mrb[24].mxu0 %vm712_vm3, %v9767_v36  ;;  %v10114_v36 = vpop.f32.mrb[17].mxu1 }
 0x228   : > { %7765 = vmatprep.mubr.msk.bf16.mxu0 %vm712_vm3, %v9945_v12  ;;  %v10116_v33 = vpop.f32.mrb[18].mxu1 }
 0x229   : > { %v10118_v19 = vpop.f32.mrb[19].mxu1 }
 0x22a   : > { %v10120_v44 = vpop.f32.mrb[20].mxu1 }
 0x22b   : > { %v10122_v15 = vpop.f32.mrb[21].mxu1 }
 0x22c   : > { %v10124_v30 = vpop.f32.mrb[22].mxu1 }
 0x22d   : > { %v10126_v38 = vpop.f32.mrb[23].mxu1 }
 0x22e   : > { %v10128_v21 = vpop.f32.mrb[24].mxu1 }
 0x22f   : > { %7766 = vmatmul.mubr.bf16.gmra.mrb[28].mxu0 %v12073_v6  ;;  %v10130_v61 = vpop.f32.mrb[25].mxu1 }
 0x230   : > { %v10132_v27 = vpop.f32.mrb[26].mxu1 }
 0x231   : > { %v10134_v28 = vpop.f32.mrb[27].mxu1 }
 0x232   : > { %v10136_v40 = vpop.f32.mrb[28].mxu1 }
 0x233   : > { %v10138_v41 = vpop.f32.mrb[29].mxu1 }
 0x234   : > { %v10140_v46 = vpop.f32.mrb[30].mxu1 }
 0x235   : > { %v10142_v48 = vpop.f32.mrb[31].mxu1 }
 0x2ca   : > { %v7739_v56 = vpop.f32.mrb[0].mxu0 }
 0x2cb   : > { %v8204_v60 = vadd.f32 %v7739_v56, %v7467_v50  ;;  %v2541_v0 = vpop.f32.mrb[1].mxu0  ;;  %v10188_v56 = vld [vmem:[%s12074_s3 + $0x10] sm:$0xff]  }
 0x2cc   : > { %v8205_v14 = vadd.f32 %v2541_v0, %v802_v51  ;;  %v7740_v18 = vpop.f32.mrb[2].mxu0 }
 0x2cd   : > { %v2709_v23 = vadd.f32 %v8204_v60, %v10147_v57  ;;  %v8206_v29 = vadd.f32 %v7740_v18, %v7468_v2  ;;  %v2544_v42 = vpop.f32.mrb[3].mxu0 }
 0x2ce   : > { %v2707_v43 = vadd.f32 %v8205_v14, %v10147_v57  ;;  %v8207_v52 = vadd.f32 %v2544_v42, %v805_v4 }
 0x2cf   : > { %v2741_v54 = vmax.f32 %v2709_v23, 0.0  ;;  %v2710_v5 = vadd.f32 %v8206_v29, %v10147_v57 }
 0x2d0   : > { %v10159_v7 = vmax.f32 %v2707_v43, 0.0  ;;  %v2708_v24 = vadd.f32 %v8207_v52, %v10147_v57 }
 0x2d1   : > { %2774 = vst.msk [vmem:[%s10155_s0 + $0x10] sm:$0xff] %vm2771_vm7, %v2741_v54  ;;  %v2806_v26 = vrot.slane %v2741_v54, 7  ;;  %v10164_v47 = vmax.f32 %v2710_v5, 0.0  ;;  %v3358_v62 = vrot.slane %v2741_v54, 1 }
 0x2d2   : > { %2772 = vst.msk [vmem:[%s10155_s0] sm:$0xff] %vm2771_vm7, %v10159_v7  ;;  %v11990_v17 = vrot.slane %v10159_v7, 7  ;;  %v11989_v20 = vrot.slane %v10159_v7, 1  ;;  %v2740_v3 = vmax.f32 %v2708_v24, 0.0  ;;  %v7743_v10 = vpop.f32.mrb[4].mxu0 }
 0x2d3   : > { %2775 = vst.msk [vmem:[%s10155_s0 + $0x18] sm:$0xff] %vm2771_vm7, %v10164_v47  ;;  %v2807_v12 = vrot.slane %v10164_v47, 7  ;;  %v11991_v25 = vrot.slane %v10164_v47, 1  ;;  %v8208_v49 = vadd.f32 %v7743_v10, %v7471_v31  ;;  %v2557_v22 = vpop.f32.mrb[5].mxu0  ;;  %v10177_v53 = vpack.c.bf16 %v10164_v47, %v2741_v54 }
 0x2d4   : > { %2773 = vst.msk [vmem:[%s10155_s0 + $0x8] sm:$0xff] %vm2771_vm7, %v2740_v3  ;;  %v2805_v37 = vrot.slane %v2740_v3, 7  ;;  %v10182_v50 = vpack.c.bf16 %v2740_v3, %v10159_v7  ;;  %v3357_v51 = vrot.slane %v2740_v3, 1  ;;  %v8209_v2 = vadd.f32 %v2557_v22, %v10084_v32  ;;  %v7744_v4 = vpop.f32.mrb[6].mxu0 }
 0x2d5   : > { %12077 = vst [vmem:[#allocation21_spill] sm:$0xff] %v10177_v53  ;;  %v2713_v31 = vadd.f32 %v8208_v49, %v10147_v57  ;;  %v8210_v60 = vadd.f32 %v7744_v4, %v10086_v58  ;;  %v2560_v0 = vpop.f32.mrb[7].mxu0  ;;  %v2861_v14 = vsel %vm615_vm2, %v2806_v26, %v2807_v12  ;;  %v10198_v18 = vsel %vm1169_vm5, %v3358_v62, %v11991_v25 }
 0x2d6   : > { %12078 = vst [vmem:[#allocation20_spill] sm:$0xff] %v10182_v50  ;;  %v10204_v32 = vsel %vm615_vm2, %v11990_v17, %v2805_v37  ;;  %v3415_v58 = vsel %vm1169_vm5, %v3357_v51, %v3358_v62  ;;  %v3416_v23 = vsel %vm1169_vm5, %v11989_v20, %v3357_v51  ;;  %v2711_v29 = vadd.f32 %v8209_v2, %v10147_v57 }
 0x2d7   : > { %7772 = vmatmul.mubr.msk.bf16.vlgmr.msra.gmra.mrb[32].mxu1 %vm2771_vm7, %v10182_v50  ;;  %v3418_v42 = vsel %vm1201_vm6, %v3415_v58, 0.0  ;;  %v10217_v43 = vmax.f32 %v2713_v31, 0.0  ;;  %v2714_v52 = vadd.f32 %v8210_v60, %v10147_v57  ;;  %v8211_v54 = vadd.f32 %v2560_v0, %v10088_v59 }
 0x2d8   : > { %7804 = vmatpush3.bf16.msra.mxu1 %v10101_v63  ;;  %7775 = vmatprep.mubr.msk.bf16.mxu1 %vm2771_vm7, %v10177_v53  ;;  %v10224_v5 = vpack.c.bf16 %v3418_v42, %v3416_v23  ;;  %v10226_v24 = vmax.f32 %v2711_v29, 0.0  ;;  %v2862_v62 = vsel %vm615_vm2, %v2805_v37, %v2806_v26 }
 0x2d9   : > { %7837 = vmatprep.subr.bf16.mxu1 %v10188_v56  ;;  %2778 = vst.msk [vmem:[%s10155_s0 + $0x30] sm:$0xff] %vm2771_vm7, %v10217_v43  ;;  %v2810_v59 = vrot.slane %v10217_v43, 7  ;;  %v10235_v3 = vmax.f32 %v2714_v52, 0.0  ;;  %v2712_v63 = vadd.f32 %v8211_v54, %v10147_v57  ;;  %v2867_v37 = vsel %vm646_vm4, %v2862_v62, 0.0 }
 0x2da   : > { %2776 = vst.msk [vmem:[%s10155_s0 + $0x20] sm:$0xff] %vm2771_vm7, %v10226_v24  ;;  %v2808_v49 = vrot.slane %v10226_v24, 7  ;;  %v11992_v22 = vrot.slane %v10226_v24, 1  ;;  %v7747_v26 = vpop.f32.mrb[8].mxu0  ;;  %v10259_v29 = vpack.c.bf16 %v2861_v14, %v2867_v37 }
 0x2db   : > { %2779 = vst.msk [vmem:[%s10155_s0 + $0x38] sm:$0xff] %vm2771_vm7, %v10235_v3  ;;  %v2811_v51 = vrot.slane %v10235_v3, 7  ;;  %v10251_v4 = vmax.f32 %v2712_v63, 0.0  ;;  %v8212_v31 = vadd.f32 %v7747_v26, %v10090_v34  ;;  %v2573_v60 = vpop.f32.mrb[9].mxu0  ;;  %v10257_v23 = vpack.c.bf16 %v10235_v3, %v10217_v43 }
 0x2dc   : > { %v8213_v0 = vadd.f32 %v2573_v60, %v10092_v35  ;;  %v7748_v58 = vpop.f32.mrb[10].mxu0  ;;  %v2860_v42 = vsel %vm615_vm2, %v2807_v12, %v2808_v49 }
 0x2dd   : > { %12079 = vst [vmem:[#allocation22_spill] sm:$0xff] %v10257_v23  ;;  %2777 = vst.msk [vmem:[%s10155_s0 + $0x28] sm:$0xff] %vm2771_vm7, %v10251_v4  ;;  %v2809_v52 = vrot.slane %v10251_v4, 7  ;;  %v2717_v54 = vadd.f32 %v8212_v31, %v10147_v57  ;;  %v8214_v35 = vadd.f32 %v7748_v58, %v10094_v1  ;;  %v2576_v62 = vpop.f32.mrb[11].mxu0  ;;  %v10274_v12 = vpack.c.bf16 %v10251_v4, %v10226_v24 }
 0x2de   : > { %v2715_v63 = vadd.f32 %v8213_v0, %v10147_v57  ;;  %v8215_v14 = vadd.f32 %v2576_v62, %v10096_v8  ;;  %v2869_v26 = vsel %vm646_vm4, %v2860_v42, 0.0  ;;  %v2857_v60 = vsel %vm615_vm2, %v2810_v59, %v2811_v51 }
 0x2df   : > { %12080 = vst [vmem:[#allocation23_spill] sm:$0xff] %v10274_v12  ;;  %v10278_v37 = vmax.f32 %v2717_v54, 0.0  ;;  %v2718_v31 = vadd.f32 %v8214_v35, %v10147_v57  ;;  %v2859_v1 = vsel %vm615_vm2, %v2808_v49, %v2809_v52  ;;  %7776 = vmatmul.mubr.msk.bf16.gmra.mrb[36].mxu1 %vm2771_vm7, %v10274_v12  ;;  %v2858_v42 = vsel %vm615_vm2, %v2809_v52, %v2810_v59 }
 0x2e0   : > { %v10285_v0 = vmax.f32 %v2715_v63, 0.0  ;;  %v2716_v8 = vadd.f32 %v8215_v14, %v10147_v57  ;;  %v10290_v58 = vpack.c.bf16 %v2859_v1, %v2869_v26  ;;  %7779 = vmatprep.mubr.msk.bf16.mxu1 %vm2771_vm7, %v10257_v23  ;;  %v2871_v62 = vsel %vm646_vm4, %v2858_v42, 0.0 }
 0x2e1   : > { %2782 = vst.msk [vmem:[%s10155_s0 + $0x50] sm:$0xff] %vm2771_vm7, %v10278_v37  ;;  %v2814_v49 = vrot.slane %v10278_v37, 7  ;;  %v10299_v35 = vmax.f32 %v2718_v31, 0.0  ;;  %v10312_v26 = vpack.c.bf16 %v2857_v60, %v2871_v62 }
 0x2e2   : > { %2780 = vst.msk [vmem:[%s10155_s0 + $0x40] sm:$0xff] %vm2771_vm7, %v10285_v0  ;;  %v2812_v59 = vrot.slane %v10285_v0, 7  ;;  %v10310_v63 = vmax.f32 %v2716_v8, 0.0  ;;  %v7751_v14 = vpop.f32.mrb[12].mxu0 }
 0x2e3   : > { %2783 = vst.msk [vmem:[%s10155_s0 + $0x58] sm:$0xff] %vm2771_vm7, %v10299_v35  ;;  %v2815_v31 = vrot.slane %v10299_v35, 7  ;;  %v8216_v42 = vadd.f32 %v7751_v14, %v10104_v13  ;;  %v2589_v20 = vpop.f32.mrb[13].mxu0  ;;  %v10322_v17 = vpack.c.bf16 %v10299_v35, %v10278_v37 }
 0x2e4   : > { %2781 = vst.msk [vmem:[%s10155_s0 + $0x48] sm:$0xff] %vm2771_vm7, %v10310_v63  ;;  %v2813_v60 = vrot.slane %v10310_v63, 7  ;;  %v8217_v62 = vadd.f32 %v2589_v20, %v10106_v55  ;;  %v7752_v54 = vpop.f32.mrb[14].mxu0  ;;  %v10332_v1 = vpack.c.bf16 %v10310_v63, %v10285_v0  ;;  %v2856_v52 = vsel %vm615_vm2, %v2811_v51, %v2812_v59 }
 0x2e5   : > { %12081 = vst [vmem:[#allocation24_spill] sm:$0xff] %v10322_v17  ;;  %v2721_v13 = vadd.f32 %v8216_v42, %v10147_v57  ;;  %v8218_v14 = vadd.f32 %v7752_v54, %v10108_v16  ;;  %v2592_v2 = vpop.f32.mrb[15].mxu0  ;;  %v2853_v34 = vsel %vm615_vm2, %v2814_v49, %v2815_v31  ;;  %v2873_v42 = vsel %vm646_vm4, %v2856_v52, 0.0 }
 0x2e6   : > { %12082 = vst [vmem:[#allocation25_spill] sm:$0xff] %v10332_v1  ;;  %v2719_v8 = vadd.f32 %v8217_v62, %v10147_v57  ;;  %v8219_v55 = vadd.f32 %v2592_v2, %v10110_v39  ;;  %v2855_v20 = vsel %vm615_vm2, %v2812_v59, %v2813_v60  ;;  %v2854_v51 = vsel %vm615_vm2, %v2813_v60, %v2814_v49 }
 0x2e7   : > { %v10346_v16 = vmax.f32 %v2721_v13, 0.0  ;;  %v2722_v54 = vadd.f32 %v8218_v14, %v10147_v57  ;;  %v10349_v10 = vpack.c.bf16 %v2855_v20, %v2873_v42  ;;  %7780 = vmatmul.mubr.msk.bf16.gmra.mrb[40].mxu1 %vm2771_vm7, %v10332_v1  ;;  %v2875_v2 = vsel %vm646_vm4, %v2854_v51, 0.0 }
 0x2e8   : > { %v10353_v25 = vmax.f32 %v2719_v8, 0.0  ;;  %v2720_v39 = vadd.f32 %v8219_v55, %v10147_v57  ;;  %v12083_v59 = vrot.slane %v10164_v47, 1  ;;  %7783 = vmatprep.mubr.msk.bf16.mxu1 %vm2771_vm7, %v10322_v17  ;;  %v10375_v62 = vpack.c.bf16 %v2853_v34, %v2875_v2 }
 0x2e9   : > { %2786 = vst.msk [vmem:[%s10155_s0 + $0x70] sm:$0xff] %vm2771_vm7, %v10346_v16  ;;  %v2818_v49 = vrot.slane %v10346_v16, 7  ;;  %v10371_v8 = vmax.f32 %v2722_v54, 0.0 }
 0x2ea   : > { %v3413_v52 = vsel %vm1169_vm5, %v12083_v59, %v11992_v22  ;;  %2784 = vst.msk [vmem:[%s10155_s0 + $0x60] sm:$0xff] %vm2771_vm7, %v10353_v25  ;;  %v2816_v47 = vrot.slane %v10353_v25, 7  ;;  %v10382_v14 = vmax.f32 %v2720_v39, 0.0  ;;  %v7755_v55 = vpop.f32.mrb[16].mxu0 }
 0x2eb   : > { %v3420_v20 = vsel %vm1201_vm6, %v3413_v52, 0.0  ;;  %2787 = vst.msk [vmem:[%s10155_s0 + $0x78] sm:$0xff] %vm2771_vm7, %v10371_v8  ;;  %v2819_v42 = vrot.slane %v10371_v8, 7  ;;  %v8220_v54 = vadd.f32 %v7755_v55, %v10112_v11  ;;  %v2605_v51 = vpop.f32.mrb[17].mxu0  ;;  %v10394_v2 = vpack.c.bf16 %v10371_v8, %v10346_v16 }
 0x2ec   : > { %2785 = vst.msk [vmem:[%s10155_s0 + $0x68] sm:$0xff] %vm2771_vm7, %v10382_v14  ;;  %v2817_v39 = vrot.slane %v10382_v14, 7  ;;  %v8221_v52 = vadd.f32 %v2605_v51, %v10114_v36  ;;  %v7756_v60 = vpop.f32.mrb[18].mxu0  ;;  %v10404_v34 = vpack.c.bf16 %v10382_v14, %v10353_v25  ;;  %v2852_v22 = vsel %vm615_vm2, %v2815_v31, %v2816_v47 }
 0x2ed   : > { %12084 = vst [vmem:[#allocation26_spill] sm:$0xff] %v10394_v2  ;;  %v2725_v11 = vadd.f32 %v8220_v54, %v10147_v57  ;;  %v8222_v55 = vadd.f32 %v7756_v60, %v10116_v33  ;;  %v2608_v13 = vpop.f32.mrb[19].mxu0  ;;  %v2849_v17 = vsel %vm615_vm2, %v2818_v49, %v2819_v42  ;;  %v2877_v54 = vsel %vm646_vm4, %v2852_v22, 0.0 }
 0x2ee   : > { %12085 = vst [vmem:[#allocation27_spill] sm:$0xff] %v10404_v34  ;;  %v2723_v59 = vadd.f32 %v8221_v52, %v10147_v57  ;;  %v8223_v36 = vadd.f32 %v2608_v13, %v10118_v19  ;;  %v2851_v51 = vsel %vm615_vm2, %v2816_v47, %v2817_v39  ;;  %v2850_v31 = vsel %vm615_vm2, %v2817_v39, %v2818_v49 }
 0x2ef   : > { %v10418_v33 = vmax.f32 %v2725_v11, 0.0  ;;  %v2726_v60 = vadd.f32 %v8222_v55, %v10147_v57  ;;  %v10421_v1 = vpack.c.bf16 %v2851_v51, %v2877_v54  ;;  %7784 = vmatmul.mubr.msk.bf16.gmra.mrb[44].mxu1 %vm2771_vm7, %v10404_v34  ;;  %v2879_v22 = vsel %vm646_vm4, %v2850_v31, 0.0 }
 0x2f0   : > { %v10425_v23 = vmax.f32 %v2723_v59, 0.0  ;;  %v2724_v19 = vadd.f32 %v8223_v36, %v10147_v57  ;;  %v10433_v47 = vpack.c.bf16 %v3420_v20, %v10198_v18  ;;  %7787 = vmatprep.mubr.msk.bf16.mxu1 %vm2771_vm7, %v10394_v2  ;;  %v10444_v59 = vpack.c.bf16 %v2849_v17, %v2879_v22 }
 0x2f1   : > { %2790 = vst.msk [vmem:[%s10155_s0 + $0x90] sm:$0xff] %vm2771_vm7, %v10418_v33  ;;  %v2822_v13 = vrot.slane %v10418_v33, 7  ;;  %v10440_v39 = vmax.f32 %v2726_v60, 0.0  ;;  %v12087_v55 = vrot.slane %v10217_v43, 1  ;;  %v12088_v36 = vrot.slane %v10251_v4, 1 }
 0x2f2   : > { %12086 = vst [vmem:[#allocation28_spill] sm:$0xff] %v10433_v47  ;;  %2788 = vst.msk [vmem:[%s10155_s0 + $0x80] sm:$0xff] %vm2771_vm7, %v10425_v23  ;;  %v2820_v18 = vrot.slane %v10425_v23, 7  ;;  %v10451_v52 = vmax.f32 %v2724_v19, 0.0  ;;  %v7759_v11 = vpop.f32.mrb[20].mxu0 }
 0x2f3   : > { %v3411_v51 = vsel %vm1169_vm5, %v12088_v36, %v12087_v55  ;;  %2791 = vst.msk [vmem:[%s10155_s0 + $0x98] sm:$0xff] %vm2771_vm7, %v10440_v39  ;;  %v2823_v17 = vrot.slane %v10440_v39, 7  ;;  %v8224_v60 = vadd.f32 %v7759_v11, %v10120_v44  ;;  %v2621_v31 = vpop.f32.mrb[21].mxu0  ;;  %v10467_v19 = vpack.c.bf16 %v10440_v39, %v10418_v33 }
 0x2f4   : > { %2789 = vst.msk [vmem:[%s10155_s0 + $0x88] sm:$0xff] %vm2771_vm7, %v10451_v52  ;;  %v2821_v22 = vrot.slane %v10451_v52, 7  ;;  %v8225_v36 = vadd.f32 %v2621_v31, %v10122_v15  ;;  %v7760_v49 = vpop.f32.mrb[22].mxu0  ;;  %v10477_v54 = vpack.c.bf16 %v10451_v52, %v10425_v23  ;;  %v2848_v2 = vsel %vm615_vm2, %v2819_v42, %v2820_v18 }
 0x2f5   : > { %12089 = vst [vmem:[#allocation29_spill] sm:$0xff] %v10467_v19  ;;  %v2729_v44 = vadd.f32 %v8224_v60, %v10147_v57  ;;  %v8226_v11 = vadd.f32 %v7760_v49, %v10124_v30  ;;  %v2624_v20 = vpop.f32.mrb[23].mxu0  ;;  %v2845_v34 = vsel %vm615_vm2, %v2822_v13, %v2823_v17  ;;  %v2881_v60 = vsel %vm646_vm4, %v2848_v2, 0.0 }
 0x2f6   : > { %12090 = vst [vmem:[#allocation30_spill] sm:$0xff] %v10477_v54  ;;  %v2727_v55 = vadd.f32 %v8225_v36, %v10147_v57  ;;  %v8227_v15 = vadd.f32 %v2624_v20, %v10126_v38  ;;  %v2847_v31 = vsel %vm615_vm2, %v2820_v18, %v2821_v22  ;;  %v2846_v42 = vsel %vm615_vm2, %v2821_v22, %v2822_v13 }
 0x2f7   : > { %v10491_v30 = vmax.f32 %v2729_v44, 0.0  ;;  %v2730_v49 = vadd.f32 %v8226_v11, %v10147_v57  ;;  %v10494_v12 = vpack.c.bf16 %v2847_v31, %v2881_v60  ;;  %7788 = vmatmul.mubr.msk.bf16.gmra.mrb[48].mxu1 %vm2771_vm7, %v10477_v54  ;;  %v2883_v2 = vsel %vm646_vm4, %v2846_v42, 0.0 }
 0x2f8   : > { %v10498_v53 = vmax.f32 %v2727_v55, 0.0  ;;  %v2728_v38 = vadd.f32 %v8227_v15, %v10147_v57  ;;  %v12091_v18 = vrot.slane %v10251_v4, 1  ;;  %v12092_v20 = vrot.slane %v10226_v24, 1  ;;  %7791 = vmatprep.mubr.msk.bf16.mxu1 %vm2771_vm7, %v10467_v19 }
 0x2f9   : > { %2794 = vst.msk [vmem:[%s10155_s0 + $0xb0] sm:$0xff] %vm2771_vm7, %v10491_v30  ;;  %v2826_v13 = vrot.slane %v10491_v30, 7  ;;  %v10516_v55 = vmax.f32 %v2730_v49, 0.0  ;;  %v10520_v44 = vpack.c.bf16 %v2845_v34, %v2883_v2  ;;  %v3422_v31 = vsel %vm1201_vm6, %v3411_v51, 0.0 }
 0x2fa   : > { %v3412_v36 = vsel %vm1169_vm5, %v12092_v20, %v12091_v18  ;;  %2792 = vst.msk [vmem:[%s10155_s0 + $0xa0] sm:$0xff] %vm2771_vm7, %v10498_v53  ;;  %v2824_v24 = vrot.slane %v10498_v53, 7  ;;  %v10527_v11 = vmax.f32 %v2728_v38, 0.0  ;;  %v7763_v15 = vpop.f32.mrb[24].mxu0 }
 0x2fb   : > { %2795 = vst.msk [vmem:[%s10155_s0 + $0xb8] sm:$0xff] %vm2771_vm7, %v10516_v55  ;;  %v2827_v60 = vrot.slane %v10516_v55, 7  ;;  %v8228_v49 = vadd.f32 %v7763_v15, %v10128_v21  ;;  %v2637_v42 = vpop.f32.mrb[25].mxu0  ;;  %v10539_v2 = vpack.c.bf16 %v10516_v55, %v10491_v30 }
 0x2fc   : > { %2793 = vst.msk [vmem:[%s10155_s0 + $0xa8] sm:$0xff] %vm2771_vm7, %v10527_v11  ;;  %v2825_v38 = vrot.slane %v10527_v11, 7  ;;  %v8229_v18 = vadd.f32 %v2637_v42, %v10130_v61  ;;  %v7764_v20 = vpop.f32.mrb[26].mxu0  ;;  %v10549_v34 = vpack.c.bf16 %v10527_v11, %v10498_v53  ;;  %v2844_v4 = vsel %vm615_vm2, %v2823_v17, %v2824_v24 }
 0x2fd   : > { %12093 = vst [vmem:[#allocation31_spill] sm:$0xff] %v10539_v2  ;;  %v2733_v21 = vadd.f32 %v8228_v49, %v10147_v57  ;;  %v8230_v15 = vadd.f32 %v7764_v20, %v10132_v27  ;;  %v2640_v22 = vpop.f32.mrb[27].mxu0  ;;  %v2841_v19 = vsel %vm615_vm2, %v2826_v13, %v2827_v60  ;;  %v2885_v49 = vsel %vm646_vm4, %v2844_v4, 0.0 }
 0x2fe   : > { %12094 = vst [vmem:[#allocation32_spill] sm:$0xff] %v10549_v34  ;;  %v2731_v51 = vadd.f32 %v8229_v18, %v10147_v57  ;;  %v8231_v61 = vadd.f32 %v2640_v22, %v10134_v28  ;;  %v2843_v42 = vsel %vm615_vm2, %v2824_v24, %v2825_v38  ;;  %v2842_v17 = vsel %vm615_vm2, %v2825_v38, %v2826_v13 }
 0x2ff   : > { %v10563_v27 = vmax.f32 %v2733_v21, 0.0  ;;  %v2734_v20 = vadd.f32 %v8230_v15, %v10147_v57  ;;  %v10566_v54 = vpack.c.bf16 %v2843_v42, %v2885_v49  ;;  %7792 = vmatmul.mubr.msk.bf16.gmra.mrb[52].mxu1 %vm2771_vm7, %v10549_v34  ;;  %v2887_v22 = vsel %vm646_vm4, %v2842_v17, 0.0 }
 0x300   : > { %v10570_v50 = vmax.f32 %v2731_v51, 0.0  ;;  %v2732_v28 = vadd.f32 %v8231_v61, %v10147_v57  ;;  %v10577_v24 = vpack.c.bf16 %v3422_v31, %v3412_v36  ;;  %7795 = vmatprep.mubr.msk.bf16.mxu1 %vm2771_vm7, %v10539_v2  ;;  %v10588_v51 = vpack.c.bf16 %v2841_v19, %v2887_v22 }
 0x301   : > { %2798 = vst.msk [vmem:[%s10155_s0 + $0xd0] sm:$0xff] %vm2771_vm7, %v10563_v27  ;;  %v2830_v4 = vrot.slane %v10563_v27, 7  ;;  %v10584_v38 = vmax.f32 %v2734_v20, 0.0  ;;  %v12096_v15 = vrot.slane %v10285_v0, 1  ;;  %v12097_v61 = vrot.slane %v10235_v3, 1 }
 0x302   : > { %12095 = vst [vmem:[#allocation19_spill] sm:$0xff] %v10577_v24  ;;  %2796 = vst.msk [vmem:[%s10155_s0 + $0xc0] sm:$0xff] %vm2771_vm7, %v10570_v50  ;;  %v2828_v36 = vrot.slane %v10570_v50, 7  ;;  %v10595_v18 = vmax.f32 %v2732_v28, 0.0  ;;  %v7767_v21 = vpop.f32.mrb[28].mxu0 }
 0x303   : > { %v3409_v42 = vsel %vm1169_vm5, %v12097_v61, %v12096_v15  ;;  %2799 = vst.msk [vmem:[%s10155_s0 + $0xd8] sm:$0xff] %vm2771_vm7, %v10584_v38  ;;  %v2831_v19 = vrot.slane %v10584_v38, 7  ;;  %v8232_v20 = vadd.f32 %v7767_v21, %v10136_v40  ;;  %v2653_v17 = vpop.f32.mrb[29].mxu0  ;;  %v10611_v28 = vpack.c.bf16 %v10584_v38, %v10563_v27 }
 0x304   : > { %2797 = vst.msk [vmem:[%s10155_s0 + $0xc8] sm:$0xff] %vm2771_vm7, %v10595_v18  ;;  %v2829_v22 = vrot.slane %v10595_v18, 7  ;;  %v8233_v61 = vadd.f32 %v2653_v17, %v10138_v41  ;;  %v7768_v13 = vpop.f32.mrb[30].mxu0  ;;  %v10621_v49 = vpack.c.bf16 %v10595_v18, %v10570_v50  ;;  %v2840_v2 = vsel %vm615_vm2, %v2827_v60, %v2828_v36 }
 0x305   : > { %v2737_v40 = vadd.f32 %v8232_v20, %v10147_v57  ;;  %v8234_v21 = vadd.f32 %v7768_v13, %v10140_v46  ;;  %v2656_v31 = vpop.f32.mrb[31].mxu0  ;;  %v2837_v34 = vsel %vm615_vm2, %v2830_v4, %v2831_v19  ;;  %v2889_v20 = vsel %vm646_vm4, %v2840_v2, 0.0 }
 0x306   : > { %v2735_v15 = vadd.f32 %v8233_v61, %v10147_v57  ;;  %v8235_v41 = vadd.f32 %v2656_v31, %v10142_v48  ;;  %v2839_v17 = vsel %vm615_vm2, %v2828_v36, %v2829_v22  ;;  %v2838_v60 = vsel %vm615_vm2, %v2829_v22, %v2830_v4 }
 0x307   : > { %v10635_v46 = vmax.f32 %v2737_v40, 0.0  ;;  %v2738_v13 = vadd.f32 %v8234_v21, %v10147_v57  ;;  %v10638_v24 = vpack.c.bf16 %v2839_v17, %v2889_v20  ;;  %7796 = vmatmul.mubr.msk.bf16.gmra.mrb[56].mxu1 %vm2771_vm7, %v10621_v49  ;;  %v2891_v2 = vsel %vm646_vm4, %v2838_v60, 0.0 }
 0x308   : > { %v10642_v47 = vmax.f32 %v2735_v15, 0.0  ;;  %v2736_v48 = vadd.f32 %v8235_v41, %v10147_v57  ;;  %v12098_v36 = vrot.slane %v10235_v3, 1  ;;  %v12099_v31 = vrot.slane %v10217_v43, 1  ;;  %7799 = vmatprep.mubr.msk.bf16.mxu1 %vm2771_vm7, %v10611_v28 }
 0x309   : > { %2802 = vst.msk [vmem:[%s10155_s0 + $0xf0] sm:$0xff] %vm2771_vm7, %v10635_v46  ;;  %v3386_v4 = vrot.slane %v10635_v46, 1  ;;  %v10660_v22 = vmax.f32 %v2738_v13, 0.0  ;;  %v10664_v15 = vpack.c.bf16 %v2837_v34, %v2891_v2  ;;  %v3424_v21 = vsel %vm1201_vm6, %v3409_v42, 0.0 }
 0x30a   : > { %v3410_v61 = vsel %vm1169_vm5, %v12099_v31, %v12098_v36  ;;  %2800 = vst.msk [vmem:[%s10155_s0 + $0xe0] sm:$0xff] %vm2771_vm7, %v10642_v47  ;;  %v2832_v43 = vrot.slane %v10642_v47, 7  ;;  %v3384_v3 = vrot.slane %v10642_v47, 1  ;;  %v10671_v40 = vmax.f32 %v2736_v48, 0.0 }
 0x30b   : > { %2803 = vst.msk [vmem:[%s10155_s0 + $0xf8] sm:$0xff] %vm2771_vm7, %v10660_v22  ;;  %v2834_v41 = vrot.slane %v10660_v22, 7  ;;  %v10680_v17 = vpack.c.bf16 %v3424_v21, %v3410_v61  ;;  %v12100_v20 = vrot.slane %v10278_v37, 1  ;;  %v12101_v13 = vrot.slane %v10310_v63, 1 }
 0x30c   : > { %2801 = vst.msk [vmem:[%s10155_s0 + $0xe8] sm:$0xff] %vm2771_vm7, %v10671_v40  ;;  %v2833_v42 = vrot.slane %v10671_v40, 7  ;;  %v3385_v48 = vrot.slane %v10671_v40, 1  ;;  %v10695_v2 = vpack.c.bf16 %v10671_v40, %v10642_v47  ;;  %v2836_v36 = vsel %vm615_vm2, %v2831_v19, %v2832_v43  ;;  %s6623_s0 = sshll.u32 %s11202_s16, 8 }
 0x30d   : > { %v3407_v60 = vsel %vm1169_vm5, %v12101_v13, %v12100_v20  ;;  %v12102_v31 = vrot.slane %v10159_v7, 7  ;;  %v2893_v21 = vsel %vm646_vm4, %v2836_v36, 0.0  ;;  %v12103_v20 = vmov %v12101_v13  ;;  %s11214_s23 = scalar_lea.vmem [#allocation2], %s6623_s0  ;;  %s6328_s0 = sshll.u32 %s11249_s25, 4  ;;  %s11725_s0 = int_to_ptr.vmem [resolvable:$true] %s6328_s0 }
 0x30e   : > { %v12104_v13 = vrot.slane %v10285_v0, 1  ;;  %v3426_v19 = vsel %vm1201_vm6, %v3407_v60, 0.0  ;;  %v2835_v57 = vsel %vm615_vm2, %v2832_v43, %v2833_v42  ;;  %v12105_v36 = vrot.slane %v10353_v25, 1 }
 0x30f   : > { %v2864_v61 = vsel %vm615_vm2, %v2834_v41, %v12102_v31  ;;  %v12106_v63 = vrot.slane %v10299_v35, 1  ;;  %7800 = vmatmul.mubr.msk.bf16.gmra.mrb[60].mxu1 %vm2771_vm7, %v10695_v2 }
 0x310   : > { %v3408_v40 = vsel %vm1169_vm5, %v12104_v13, %v12103_v20  ;;  %v2865_v34 = vsel %vm646_vm4, %v2864_v61, 0.0  ;;  %v10730_v13 = vpack.c.bf16 %v2835_v57, %v2893_v21  ;;  %v12108_v61 = vrot.slane %v10278_v37, 1  ;;  %7805 = vmatprep.mubr.bf16.mxu1 %v12073_v6 }
 0x311   : > { %v10719_v31 = vpack.c.bf16 %v3426_v19, %v3408_v40  ;;  %v3405_v0 = vsel %vm1169_vm5, %v12106_v63, %v12105_v36  ;;  %v10728_v20 = vpack.c.bf16 %v10204_v32, %v2865_v34  ;;  %v12107_v60 = vmov %v12106_v63 }
 0x312   : > { %v3406_v43 = vsel %vm1169_vm5, %v12108_v61, %v12107_v60  ;;  %v3428_v40 = vsel %vm1201_vm6, %v3405_v0, 0.0  ;;  %v12109_v32 = vrot.slane %v10346_v16, 1  ;;  %v12110_v57 = vrot.slane %v10382_v14, 1 }
 0x313   : > { %v10742_v19 = vpack.c.bf16 %v3428_v40, %v3406_v43  ;;  %v12112_v34 = vmov %v12105_v36  ;;  %v12113_v36 = vrot.slane %v10425_v23, 1  ;;  %v12114_v63 = vrot.slane %v10371_v8, 1 }
 0x314   : > { %v3403_v35 = vsel %vm1169_vm5, %v12110_v57, %v12109_v32  ;;  %v12111_v37 = vmov %v12110_v57  ;;  %v12116_v14 = vmov %v12109_v32  ;;  %v12117_v40 = vrot.slane %v10418_v33, 1 }
 0x315   : > { %v3404_v21 = vsel %vm1169_vm5, %v12112_v34, %v12111_v37  ;;  %v3401_v0 = vsel %vm1169_vm5, %v12114_v63, %v12113_v36  ;;  %v3430_v60 = vsel %vm1201_vm6, %v3403_v35, 0.0  ;;  %v12115_v61 = vmov %v12114_v63 }
 0x316   : > { %v3402_v25 = vsel %vm1169_vm5, %v12116_v14, %v12115_v61  ;;  %v3432_v43 = vsel %vm1201_vm6, %v3401_v0, 0.0  ;;  %v12118_v32 = vrot.slane %v10451_v52, 1  ;;  %v10779_v37 = vpack.c.bf16 %v3430_v60, %v3404_v21 }
 0x317   : > { %v10781_v35 = vpack.c.bf16 %v3432_v43, %v3402_v25  ;;  %v12120_v16 = vmov %v12113_v36  ;;  %v12121_v0 = vrot.slane %v10498_v53, 1  ;;  %v12122_v61 = vrot.slane %v10440_v39, 1  ;;  %7806 = vmatmul.mubr.msk.bf16.vlgmr.msra.gmra.mrb[32].mxu1 %vm2771_vm7, %v10728_v20 }
 0x318   : > { %v3399_v57 = vsel %vm1169_vm5, %v12118_v32, %v12117_v40  ;;  %v12119_v8 = vmov %v12118_v32  ;;  %v12124_v52 = vmov %v12117_v40  ;;  %v12125_v14 = vrot.slane %v10491_v30, 1  ;;  %7838 = vmatpush3.bf16.msra.mxu1 %v10188_v56  ;;  %7809 = vmatprep.mubr.msk.bf16.mxu1 %vm2771_vm7, %v10259_v29 }
 0x319   : > { %v3400_v34 = vsel %vm1169_vm5, %v12120_v16, %v12119_v8  ;;  %v3434_v36 = vsel %vm1201_vm6, %v3399_v57, 0.0  ;;  %v3397_v21 = vsel %vm1169_vm5, %v12122_v61, %v12121_v0  ;;  %v12123_v60 = vmov %v12122_v61 }
 0x31a   : > { %v10791_v63 = vpack.c.bf16 %v3434_v36, %v3400_v34  ;;  %v3398_v23 = vsel %vm1169_vm5, %v12124_v52, %v12123_v60  ;;  %v12126_v25 = vrot.slane %v10527_v11, 1  ;;  %v3436_v40 = vsel %vm1201_vm6, %v3397_v21, 0.0  ;;  %v8855_v60 = vld [vmem:[%s12074_s3 + $0x18] sm:$0xff]  }
 0x31b   : > { %v12128_v57 = vmov %v12121_v0  ;;  %v12129_v8 = vrot.slane %v10570_v50, 1  ;;  %v12130_v16 = vrot.slane %v10516_v55, 1  ;;  %v10827_v36 = vpack.c.bf16 %v3436_v40, %v3398_v23  ;;  %7871 = vmatprep.subr.bf16.mxu1 %v8855_v60 }
 0x31c   : > { %v3395_v43 = vsel %vm1169_vm5, %v12126_v25, %v12125_v14  ;;  %v12127_v32 = vmov %v12126_v25  ;;  %v12132_v53 = vmov %v12125_v14  ;;  %v12133_v23 = vrot.slane %v10563_v27, 1 }
 0x31d   : > { %v3396_v33 = vsel %vm1169_vm5, %v12128_v57, %v12127_v32  ;;  %v3438_v39 = vsel %vm1201_vm6, %v3395_v43, 0.0  ;;  %v3393_v34 = vsel %vm1169_vm5, %v12130_v16, %v12129_v8  ;;  %v12131_v11 = vmov %v12130_v16 }
 0x31e   : > { %v10829_v0 = vpack.c.bf16 %v3438_v39, %v3396_v33  ;;  %v3394_v61 = vsel %vm1169_vm5, %v12132_v53, %v12131_v11  ;;  %v3440_v21 = vsel %vm1201_vm6, %v3393_v34, 0.0  ;;  %v12134_v14 = vrot.slane %v10595_v18, 1 }
 0x31f   : > { %v10842_v52 = vpack.c.bf16 %v3440_v21, %v3394_v61  ;;  %v12136_v25 = vmov %v12129_v8  ;;  %v12137_v40 = vrot.slane %v10584_v38, 1  ;;  %v12139_v39 = vmov %v12133_v23  ;;  %7810 = vmatmul.mubr.msk.bf16.gmra.mrb[36].mxu1 %vm2771_vm7, %v10290_v58 }
 0x320   : > { %v3391_v55 = vsel %vm1169_vm5, %v12134_v14, %v12133_v23  ;;  %v12135_v30 = vmov %v12134_v14  ;;  %v3387_v8 = vsel %vm1169_vm5, %v3385_v48, %v3386_v4  ;;  %v3388_v27 = vsel %vm1169_vm5, %v3384_v3, %v3385_v48  ;;  %7813 = vmatprep.mubr.msk.bf16.mxu1 %vm2771_vm7, %v10312_v26 }
 0x321   : > { %v3392_v43 = vsel %vm1169_vm5, %v12136_v25, %v12135_v30  ;;  %v3389_v32 = vsel %vm1169_vm5, %v12137_v40, %v3384_v3  ;;  %v3442_v57 = vsel %vm1201_vm6, %v3391_v55, 0.0  ;;  %v12138_v33 = vmov %v12137_v40  ;;  %v12150_v40 = vld [vmem:[#allocation22_spill] sm:$0xff] }
 0x322   : > { %v3390_v50 = vsel %vm1169_vm5, %v12139_v39, %v12138_v33  ;;  %v3444_v18 = vsel %vm1201_vm6, %v3389_v32, 0.0  ;;  %v10878_v16 = vpack.c.bf16 %v3442_v57, %v3392_v43  ;;  %v3446_v38 = vsel %vm1201_vm6, %v3387_v8, 0.0  ;;  %v12149_v43 = vld [vmem:[#allocation23_spill] sm:$0xff]  ;;  %v12151_v32 = vld [vmem:[#allocation25_spill] sm:$0xff]  ;;  %v12152_v57 = vld [vmem:[#allocation24_spill] sm:$0xff] }
 0x323   : > { %v10880_v34 = vpack.c.bf16 %v3444_v18, %v3390_v50  ;;  %v10891_v11 = vpack.c.bf16 %v3446_v38, %v3388_v27  ;;  %v12140_v53 = vrot.slane %v10635_v46, 7  ;;  %v10907_v48 = vpack.c.bf16 %v10660_v22, %v10635_v46  ;;  %v12146_v46 = vld [vmem:[#allocation19_spill] sm:$0xff]  ;;  %v12154_v39 = vld [vmem:[#allocation26_spill] sm:$0xff]  ;;  %v12156_v18 = vld [vmem:[#allocation29_spill] sm:$0xff] }
 0x324   : > { %v12142_v21 = vrot.slane %v10660_v22, 1  ;;  %v12143_v23 = vrot.slane %v10159_v7, 1  ;;  %v12145_v7 = vld [vmem:[#allocation28_spill] sm:$0xff]  ;;  %v12153_v33 = vld [vmem:[#allocation27_spill] sm:$0xff]  ;;  %v12155_v50 = vld [vmem:[#allocation30_spill] sm:$0xff] }
 0x325   : > { %v3710_v47 = vsel %vm615_vm2, %v12140_v53, %v2834_v41  ;;  %v12141_v61 = vmov %v12140_v53  ;;  %v12147_v22 = vld [vmem:[#allocation20_spill] sm:$0xff]  ;;  %v12158_v27 = vld [vmem:[#allocation31_spill] sm:$0xff]  ;;  %v8859_v38 = vld [vmem:[%s12074_s3 + $0x38] sm:$0xff]  }
 0x326   : > { %v3711_v3 = vsel %vm615_vm2, %v2833_v42, %v12141_v61  ;;  %v4127_v41 = vsel %vm1169_vm5, %v3386_v4, %v12142_v21  ;;  %v12144_v14 = vmov %v12142_v21  ;;  %v8857_v4 = vld [vmem:[%s12074_s3 + $0x28] sm:$0xff]  }
 0x327   : > { %v3712_v56 = vsel %vm646_vm4, %v3711_v3, 0.0  ;;  %v4128_v42 = vsel %vm1169_vm5, %v12144_v14, %v12143_v23  ;;  %7814 = vmatmul.mubr.msk.bf16.gmra.mrb[40].mxu1 %vm2771_vm7, %v10349_v10  ;;  %v12157_v8 = vld [vmem:[#allocation32_spill] sm:$0xff] }
 0x328   : > { %v10921_v55 = vpack.c.bf16 %v3710_v47, %v3712_v56  ;;  %v4130_v30 = vsel %vm1201_vm6, %v4128_v42, 0.0  ;;  %7817 = vmatprep.mubr.msk.bf16.mxu1 %vm2771_vm7, %v10375_v62 }
 0x329   : > { %v10925_v25 = vpack.c.bf16 %v4130_v30, %v4127_v41 }
 0x32f   : > { %7818 = vmatmul.mubr.msk.bf16.gmra.mrb[44].mxu1 %vm2771_vm7, %v10421_v1 }
 0x330   : > { %7821 = vmatprep.mubr.msk.bf16.mxu1 %vm2771_vm7, %v10444_v59 }
 0x337   : > { %7822 = vmatmul.mubr.msk.bf16.gmra.mrb[48].mxu1 %vm2771_vm7, %v10494_v12 }
 0x338   : > { %7825 = vmatprep.mubr.msk.bf16.mxu1 %vm2771_vm7, %v10520_v44 }
 0x33f   : > { %7826 = vmatmul.mubr.msk.bf16.gmra.mrb[52].mxu1 %vm2771_vm7, %v10566_v54 }
 0x340   : > { %7829 = vmatprep.mubr.msk.bf16.mxu1 %vm2771_vm7, %v10588_v51 }
 0x347   : > { %7830 = vmatmul.mubr.msk.bf16.gmra.mrb[56].mxu1 %vm2771_vm7, %v10638_v24 }
 0x348   : > { %7833 = vmatprep.mubr.msk.bf16.mxu1 %vm2771_vm7, %v10664_v15 }
 0x34f   : > { %7834 = vmatmul.mubr.msk.bf16.gmra.mrb[60].mxu1 %vm2771_vm7, %v10730_v13 }
 0x350   : > { %7839 = vmatprep.mubr.bf16.mxu1 %v12073_v6 }
 0x357   : > { %7840 = vmatmul.mubr.msk.bf16.vlgmr.msra.gmra.mrb[32].mxu1 %vm2771_vm7, %v10224_v5 }
 0x358   : > { %7872 = vmatpush3.bf16.msra.mxu1 %v8855_v60  ;;  %7843 = vmatprep.mubr.msk.bf16.mxu1 %vm2771_vm7, %v12145_v7  ;;  %v12148_v60 = vld [vmem:[#allocation21_spill] sm:$0xff] }
 0x359   : > { %7905 = vmatprep.subr.bf16.mxu1 %v8856_v45 }
 0x35f   : > { %7844 = vmatmul.mubr.msk.bf16.gmra.mrb[36].mxu1 %vm2771_vm7, %v12146_v46 }
 0x360   : > { %7847 = vmatprep.mubr.msk.bf16.mxu1 %vm2771_vm7, %v10680_v17 }
 0x367   : > { %7848 = vmatmul.mubr.msk.bf16.gmra.mrb[40].mxu1 %vm2771_vm7, %v10719_v31 }
 0x368   : > { %7851 = vmatprep.mubr.msk.bf16.mxu1 %vm2771_vm7, %v10742_v19 }
 0x36f   : > { %7852 = vmatmul.mubr.msk.bf16.gmra.mrb[44].mxu1 %vm2771_vm7, %v10779_v37 }
 0x370   : > { %7855 = vmatprep.mubr.msk.bf16.mxu1 %vm2771_vm7, %v10781_v35 }
 0x377   : > { %7856 = vmatmul.mubr.msk.bf16.gmra.mrb[48].mxu1 %vm2771_vm7, %v10791_v63 }
 0x378   : > { %7859 = vmatprep.mubr.msk.bf16.mxu1 %vm2771_vm7, %v10827_v36 }
 0x37f   : > { %7860 = vmatmul.mubr.msk.bf16.gmra.mrb[52].mxu1 %vm2771_vm7, %v10829_v0 }
 0x380   : > { %7863 = vmatprep.mubr.msk.bf16.mxu1 %vm2771_vm7, %v10842_v52 }
 0x387   : > { %7864 = vmatmul.mubr.msk.bf16.gmra.mrb[56].mxu1 %vm2771_vm7, %v10878_v16 }
 0x388   : > { %7867 = vmatprep.mubr.msk.bf16.mxu1 %vm2771_vm7, %v10880_v34 }
 0x38f   : > { %7868 = vmatmul.mubr.msk.bf16.gmra.mrb[60].mxu1 %vm2771_vm7, %v10891_v11 }
 0x390   : > { %7873 = vmatprep.mubr.msk.bf16.mxu1 %vm2771_vm7, %v10728_v20  ;;  %v8858_v20 = vld [vmem:[%s12074_s3 + $0x30] sm:$0xff]  }
 0x397   : > { %7874 = vmatmul.mubr.msk.bf16.vlgmr.msra.gmra.mrb[32].mxu1 %vm2771_vm7, %v10259_v29 }
 0x398   : > { %7906 = vmatpush3.bf16.msra.mxu1 %v8856_v45  ;;  %7877 = vmatprep.mubr.msk.bf16.mxu1 %vm2771_vm7, %v10290_v58 }
 0x399   : > { %7939 = vmatprep.subr.bf16.mxu1 %v8857_v4 }
 0x39f   : > { %7878 = vmatmul.mubr.msk.bf16.gmra.mrb[36].mxu1 %vm2771_vm7, %v10312_v26 }
 0x3a0   : > { %7881 = vmatprep.mubr.msk.bf16.mxu1 %vm2771_vm7, %v10349_v10 }
 0x3a7   : > { %7882 = vmatmul.mubr.msk.bf16.gmra.mrb[40].mxu1 %vm2771_vm7, %v10375_v62 }
 0x3a8   : > { %7885 = vmatprep.mubr.msk.bf16.mxu1 %vm2771_vm7, %v10421_v1 }
 0x3af   : > { %7886 = vmatmul.mubr.msk.bf16.gmra.mrb[44].mxu1 %vm2771_vm7, %v10444_v59 }
 0x3b0   : > { %7889 = vmatprep.mubr.msk.bf16.mxu1 %vm2771_vm7, %v10494_v12 }
 0x3b7   : > { %7890 = vmatmul.mubr.msk.bf16.gmra.mrb[48].mxu1 %vm2771_vm7, %v10520_v44 }
 0x3b8   : > { %7893 = vmatprep.mubr.msk.bf16.mxu1 %vm2771_vm7, %v10566_v54 }
 0x3bf   : > { %7894 = vmatmul.mubr.msk.bf16.gmra.mrb[52].mxu1 %vm2771_vm7, %v10588_v51 }
 0x3c0   : > { %7897 = vmatprep.mubr.msk.bf16.mxu1 %vm2771_vm7, %v10638_v24 }
 0x3c7   : > { %7898 = vmatmul.mubr.msk.bf16.gmra.mrb[56].mxu1 %vm2771_vm7, %v10664_v15 }
 0x3c8   : > { %7901 = vmatprep.mubr.msk.bf16.mxu1 %vm2771_vm7, %v10730_v13 }
 0x3cf   : > { %7902 = vmatmul.mubr.msk.bf16.gmra.mrb[60].mxu1 %vm2771_vm7, %v10921_v55 }
 0x3d0   : > { %7907 = vmatprep.mubr.msk.bf16.mxu1 %vm2771_vm7, %v12147_v22 }
 0x3d7   : > { %7908 = vmatmul.mubr.msk.bf16.vlgmr.msra.gmra.mrb[32].mxu1 %vm2771_vm7, %v12148_v60 }
 0x3d8   : > { %7940 = vmatpush3.bf16.msra.mxu1 %v8857_v4  ;;  %7911 = vmatprep.mubr.msk.bf16.mxu1 %vm2771_vm7, %v12149_v43 }
 0x3d9   : > { %7973 = vmatprep.subr.bf16.mxu1 %v8858_v20 }
 0x3df   : > { %7912 = vmatmul.mubr.msk.bf16.gmra.mrb[36].mxu1 %vm2771_vm7, %v12150_v40 }
 0x3e0   : > { %7915 = vmatprep.mubr.msk.bf16.mxu1 %vm2771_vm7, %v12151_v32 }
 0x3e7   : > { %7916 = vmatmul.mubr.msk.bf16.gmra.mrb[40].mxu1 %vm2771_vm7, %v12152_v57 }
 0x3e8   : > { %7919 = vmatprep.mubr.msk.bf16.mxu1 %vm2771_vm7, %v12153_v33 }
 0x3ef   : > { %7920 = vmatmul.mubr.msk.bf16.gmra.mrb[44].mxu1 %vm2771_vm7, %v12154_v39 }
 0x3f0   : > { %7923 = vmatprep.mubr.msk.bf16.mxu1 %vm2771_vm7, %v12155_v50 }
 0x3f7   : > { %7924 = vmatmul.mubr.msk.bf16.gmra.mrb[48].mxu1 %vm2771_vm7, %v12156_v18 }
 0x3f8   : > { %7927 = vmatprep.mubr.msk.bf16.mxu1 %vm2771_vm7, %v12157_v8 }
 0x3ff   : > { %7928 = vmatmul.mubr.msk.bf16.gmra.mrb[52].mxu1 %vm2771_vm7, %v12158_v27 }
 0x400   : > { %7931 = vmatprep.mubr.msk.bf16.mxu1 %vm2771_vm7, %v10621_v49 }
 0x407   : > { %7932 = vmatmul.mubr.msk.bf16.gmra.mrb[56].mxu1 %vm2771_vm7, %v10611_v28 }
 0x408   : > { %7935 = vmatprep.mubr.msk.bf16.mxu1 %vm2771_vm7, %v10695_v2 }
 0x40f   : > { %7936 = vmatmul.mubr.msk.bf16.gmra.mrb[60].mxu1 %vm2771_vm7, %v10907_v48 }
 0x410   : > { %7941 = vmatprep.mubr.msk.bf16.mxu1 %vm2771_vm7, %v10224_v5  ;;  %v8860_v5 = vld [vmem:[%s12074_s3 + $0x40] sm:$0xff]   ;;  %s6626_s3 = sshll.u32 %s11202_s16, 4 }
 0x417   : > { %7942 = vmatmul.mubr.msk.bf16.vlgmr.msra.gmra.mrb[32].mxu1 %vm2771_vm7, %v12145_v7 }
 0x418   : > { %7974 = vmatpush3.bf16.msra.mxu1 %v8858_v20  ;;  %7945 = vmatprep.mubr.msk.bf16.mxu1 %vm2771_vm7, %v12146_v46 }
 0x419   : > { %8007 = vmatprep.subr.bf16.mxu1 %v8859_v38 }
 0x41f   : > { %7946 = vmatmul.mubr.msk.bf16.gmra.mrb[36].mxu1 %vm2771_vm7, %v10680_v17 }
 0x420   : > { %7949 = vmatprep.mubr.msk.bf16.mxu1 %vm2771_vm7, %v10719_v31 }
 0x427   : > { %7950 = vmatmul.mubr.msk.bf16.gmra.mrb[40].mxu1 %vm2771_vm7, %v10742_v19 }
 0x428   : > { %7953 = vmatprep.mubr.msk.bf16.mxu1 %vm2771_vm7, %v10779_v37 }
 0x42f   : > { %7954 = vmatmul.mubr.msk.bf16.gmra.mrb[44].mxu1 %vm2771_vm7, %v10781_v35 }
 0x430   : > { %7957 = vmatprep.mubr.msk.bf16.mxu1 %vm2771_vm7, %v10791_v63 }
 0x437   : > { %7958 = vmatmul.mubr.msk.bf16.gmra.mrb[48].mxu1 %vm2771_vm7, %v10827_v36 }
 0x438   : > { %7961 = vmatprep.mubr.msk.bf16.mxu1 %vm2771_vm7, %v10829_v0 }
 0x43f   : > { %7962 = vmatmul.mubr.msk.bf16.gmra.mrb[52].mxu1 %vm2771_vm7, %v10842_v52 }
 0x440   : > { %7965 = vmatprep.mubr.msk.bf16.mxu1 %vm2771_vm7, %v10878_v16 }
 0x447   : > { %7966 = vmatmul.mubr.msk.bf16.gmra.mrb[56].mxu1 %vm2771_vm7, %v10880_v34 }
 0x448   : > { %7969 = vmatprep.mubr.msk.bf16.mxu1 %vm2771_vm7, %v10891_v11 }
 0x44f   : > { %7970 = vmatmul.mubr.msk.bf16.gmra.mrb[60].mxu1 %vm2771_vm7, %v10925_v25 }
 0x450   : > { %7975 = vmatprep.mubr.msk.bf16.mxu1 %vm2771_vm7, %v10259_v29  ;;  %v8862_v29 = vld [vmem:[%s12159_s5 + $0x18] sm:$0xff]  }
 0x457   : > { %7976 = vmatmul.mubr.msk.bf16.vlgmr.msra.gmra.mrb[32].mxu1 %vm2771_vm7, %v10290_v58  ;;  %v11207_v58 = vld [vmem:[%s12160_s4] ss:$0 sm:$0xff]  ;;  %s11690_s4 = scalar_lea.vmem [#allocation7], %s6626_s3 }
 0x458   : > { %8008 = vmatpush3.bf16.msra.mxu1 %v8859_v38  ;;  %7979 = vmatprep.mubr.msk.bf16.mxu1 %vm2771_vm7, %v10312_v26 }
 0x459   : > { %8041 = vmatprep.subr.bf16.mxu1 %v8860_v5 }
 0x45f   : > { %7980 = vmatmul.mubr.msk.bf16.gmra.mrb[36].mxu1 %vm2771_vm7, %v10349_v10  ;;  %v8861_v10 = vld [vmem:[%s12159_s5 + $0x10] sm:$0xff]  }
 0x460   : > { %7983 = vmatprep.mubr.msk.bf16.mxu1 %vm2771_vm7, %v10375_v62  ;;  %8075 = vmatprep.subr.bf16.mxu0 %v8861_v10 }
 0x461   : > { %8076 = vmatpush3.bf16.msra.mxu0 %v8861_v10 }
 0x462   : > { %8077 = vmatprep.subr.bf16.mxu0 %v8862_v29 }
 0x465   : > { %8078 = vmatpush3.bf16.msra.mxu0 %v8862_v29 }
 0x467   : > { %7984 = vmatmul.mubr.msk.bf16.gmra.mrb[40].mxu1 %vm2771_vm7, %v10421_v1 }
 0x468   : > { %7987 = vmatprep.mubr.msk.bf16.mxu1 %vm2771_vm7, %v10444_v59 }
 0x46f   : > { %7988 = vmatmul.mubr.msk.bf16.gmra.mrb[44].mxu1 %vm2771_vm7, %v10494_v12  ;;  %v11198_v12 = vld [vmem:[%s12159_s5] sm:$0xff]  }
 0x470   : > { %7991 = vmatprep.mubr.msk.bf16.mxu1 %vm2771_vm7, %v10520_v44  ;;  %8087 = vmatprep.subr.bf16.mxu0 %v11198_v12 }
 0x477   : > { %7992 = vmatmul.mubr.msk.bf16.gmra.mrb[48].mxu1 %vm2771_vm7, %v10566_v54 }
 0x478   : > { %7995 = vmatprep.mubr.msk.bf16.mxu1 %vm2771_vm7, %v10588_v51 }
 0x47f   : > { %7996 = vmatmul.mubr.msk.bf16.gmra.mrb[52].mxu1 %vm2771_vm7, %v10638_v24 }
 0x480   : > { %7999 = vmatprep.mubr.msk.bf16.mxu1 %vm2771_vm7, %v10664_v15 }
 0x487   : > { %8000 = vmatmul.mubr.msk.bf16.gmra.mrb[56].mxu1 %vm2771_vm7, %v10730_v13 }
 0x488   : > { %8003 = vmatprep.mubr.msk.bf16.mxu1 %vm2771_vm7, %v10921_v55 }
 0x48f   : > { %8004 = vmatmul.mubr.bf16.gmra.mrb[60].mxu1 %v12073_v6 }
 0x490   : > { %8009 = vmatprep.mubr.msk.bf16.mxu1 %vm2771_vm7, %v12148_v60 }
 0x497   : > { %8010 = vmatmul.mubr.msk.bf16.vlgmr.msra.gmra.mrb[32].mxu1 %vm2771_vm7, %v12149_v43 }
 0x498   : > { %8042 = vmatpush3.bf16.msra.mxu1 %v8860_v5  ;;  %8013 = vmatprep.mubr.msk.bf16.mxu1 %vm2771_vm7, %v12150_v40 }
 0x499   : > { %8200 = vmatprep.subr.bf16.mxu1 %v8861_v10 }
 0x49f   : > { %8014 = vmatmul.mubr.msk.bf16.gmra.mrb[36].mxu1 %vm2771_vm7, %v12151_v32 }
 0x4a0   : > { %8017 = vmatprep.mubr.msk.bf16.mxu1 %vm2771_vm7, %v12152_v57 }
 0x4a7   : > { %8018 = vmatmul.mubr.msk.bf16.gmra.mrb[40].mxu1 %vm2771_vm7, %v12153_v33 }
 0x4a8   : > { %8021 = vmatprep.mubr.msk.bf16.mxu1 %vm2771_vm7, %v12154_v39 }
 0x4af   : > { %8022 = vmatmul.mubr.msk.bf16.gmra.mrb[44].mxu1 %vm2771_vm7, %v12155_v50 }
 0x4b0   : > { %8025 = vmatprep.mubr.msk.bf16.mxu1 %vm2771_vm7, %v12156_v18 }
 0x4b7   : > { %8026 = vmatmul.mubr.msk.bf16.gmra.mrb[48].mxu1 %vm2771_vm7, %v12157_v8 }
 0x4b8   : > { %8029 = vmatprep.mubr.msk.bf16.mxu1 %vm2771_vm7, %v12158_v27 }
 0x4bf   : > { %8030 = vmatmul.mubr.msk.bf16.gmra.mrb[52].mxu1 %vm2771_vm7, %v10621_v49 }
 0x4c0   : > { %8033 = vmatprep.mubr.msk.bf16.mxu1 %vm2771_vm7, %v10611_v28 }
 0x4c7   : > { %8034 = vmatmul.mubr.msk.bf16.gmra.mrb[56].mxu1 %vm2771_vm7, %v10695_v2 }
 0x4c8   : > { %8037 = vmatprep.mubr.msk.bf16.mxu1 %vm2771_vm7, %v10907_v48 }
 0x4cf   : > { %8038 = vmatmul.mubr.bf16.gmra.mrb[60].mxu1 %v12073_v6 }
 0x4d0   : > { %8043 = vmatprep.mubr.msk.bf16.mxu1 %vm2771_vm7, %v12145_v7 }
 0x4d7   : > { %8044 = vmatmul.mubr.msk.bf16.vlgmr.msra.gmra.mrb[32].mxu1 %vm2771_vm7, %v12146_v46  ;;  %v9097_v46 = vmov 0.0  }
 0x4d8   : > { %8047 = vmatprep.mubr.msk.bf16.mxu1 %vm2771_vm7, %v10680_v17  ;;  %8202 = vmatpush3.bf16.msra.mxu1 %v8861_v10 }
 0x4d9   : > { %8201 = vmatprep.subr.bf16.mxu1 %v8862_v29 }
 0x4dc   : > { %8203 = vmatpush3.bf16.msra.mxu1 %v8862_v29 }
 0x4dd   : > { %8194 = vmatprep.subr.bf16.mxu1 %v12073_v6 }
 0x4df   : > { %8048 = vmatmul.mubr.msk.bf16.gmra.mrb[36].mxu1 %vm2771_vm7, %v10719_v31 }
 0x4e0   : > { %8051 = vmatprep.mubr.msk.bf16.mxu1 %vm2771_vm7, %v10742_v19 }
 0x4e7   : > { %8052 = vmatmul.mubr.msk.bf16.gmra.mrb[40].mxu1 %vm2771_vm7, %v10779_v37 }
 0x4e8   : > { %8055 = vmatprep.mubr.msk.bf16.mxu1 %vm2771_vm7, %v10781_v35 }
 0x4ef   : > { %8056 = vmatmul.mubr.msk.bf16.gmra.mrb[44].mxu1 %vm2771_vm7, %v10791_v63 }
 0x4f0   : > { %8059 = vmatprep.mubr.msk.bf16.mxu1 %vm2771_vm7, %v10827_v36 }
 0x4f7   : > { %8060 = vmatmul.mubr.msk.bf16.gmra.mrb[48].mxu1 %vm2771_vm7, %v10829_v0 }
 0x4f8   : > { %8063 = vmatprep.mubr.msk.bf16.mxu1 %vm2771_vm7, %v10842_v52 }
 0x4ff   : > { %8064 = vmatmul.mubr.msk.bf16.gmra.mrb[52].mxu1 %vm2771_vm7, %v10878_v16 }
 0x500   : > { %8067 = vmatprep.mubr.msk.bf16.mxu1 %vm2771_vm7, %v10880_v34 }
 0x507   : > { %8068 = vmatmul.mubr.msk.bf16.gmra.mrb[56].mxu1 %vm2771_vm7, %v10891_v11 }
 0x508   : > { %8071 = vmatprep.mubr.msk.bf16.mxu1 %vm2771_vm7, %v10925_v25 }
 0x50f   : > { %8072 = vmatmul.mubr.bf16.gmra.mrb[60].mxu1 %v12073_v6 }
 0x5aa   : > { %v8045_v26 = vpop.f32.mrb[32].mxu1 }
 0x5ab   : > { %v4952_v1 = vadd.f32 %v8045_v26, %v11207_v58  ;;  %v4784_v62 = vpop.f32.mrb[33].mxu1 }
 0x5ac   : > { %v4950_v59 = vadd.f32 %v11207_v58, %v4784_v62  ;;  %v8046_v54 = vpop.f32.mrb[34].mxu1 }
 0x5ad   : > { %v4984_v44 = vmax.f32 %v4952_v1, 0.0  ;;  %v4953_v24 = vadd.f32 %v8046_v54, %v11207_v58  ;;  %v4787_v51 = vpop.f32.mrb[35].mxu1 }
 0x5ae   : > { %v4982_v49 = vmax.f32 %v4950_v59, 0.0  ;;  %v4951_v28 = vadd.f32 %v11207_v58, %v4787_v51 }
 0x5af   : > { %5017 = vst.msk [vmem:[%s11214_s23 + $0x10] sm:$0xff] %vm5014_vm8, %v4984_v44  ;;  %v4985_v15 = vmax.f32 %v4953_v24, 0.0 }
 0x5b0   : > { %5015 = vst.msk [vmem:[%s11214_s23] sm:$0xff] %vm5014_vm8, %v4982_v49  ;;  %v4983_v17 = vmax.f32 %v4951_v28, 0.0 }
 0x5b1   : > { %5018 = vst.msk [vmem:[%s11214_s23 + $0x18] sm:$0xff] %vm5014_vm8, %v4985_v15 }
 0x5b2   : > { %5016 = vst.msk [vmem:[%s11214_s23 + $0x8] sm:$0xff] %vm5014_vm8, %v4983_v17  ;;  %v8049_v2 = vpop.f32.mrb[36].mxu1 }
 0x5b3   : > { %v4956_v31 = vadd.f32 %v8049_v2, %v11207_v58  ;;  %v4800_v13 = vpop.f32.mrb[37].mxu1 }
 0x5b4   : > { %v4954_v19 = vadd.f32 %v11207_v58, %v4800_v13  ;;  %v8050_v37 = vpop.f32.mrb[38].mxu1 }
 0x5b5   : > { %v4988_v35 = vmax.f32 %v4956_v31, 0.0  ;;  %v4957_v63 = vadd.f32 %v8050_v37, %v11207_v58  ;;  %v4803_v36 = vpop.f32.mrb[39].mxu1 }
 0x5b6   : > { %v4986_v0 = vmax.f32 %v4954_v19, 0.0  ;;  %v4955_v52 = vadd.f32 %v11207_v58, %v4803_v36 }
 0x5b7   : > { %5021 = vst.msk [vmem:[%s11214_s23 + $0x30] sm:$0xff] %vm5014_vm8, %v4988_v35  ;;  %v4989_v16 = vmax.f32 %v4957_v63, 0.0 }
 0x5b8   : > { %5019 = vst.msk [vmem:[%s11214_s23 + $0x20] sm:$0xff] %vm5014_vm8, %v4986_v0  ;;  %v4987_v34 = vmax.f32 %v4955_v52, 0.0  ;;  %v6942_v11 = vld [vmem:[%s11214_s23 + $0x10] ss:$2 sm:$0xff]  ;;  %v6958_v53 = vld [vmem:[%s11214_s23 + $0x11] ss:$2 sm:$0xff] }
 0x5b9   : > { %5022 = vst.msk [vmem:[%s11214_s23 + $0x38] sm:$0xff] %vm5014_vm8, %v4989_v16  ;;  %v5047_v47 = vld [vmem:[%s11214_s23] ss:$2 sm:$0xff]  ;;  %v6957_v61 = vld [vmem:[%s11214_s23 + $0x1] ss:$2 sm:$0xff]  ;;  %v5111_v3 = vmax.f32 %v6942_v11, %v6958_v53 }
 0x5ba   : > { %5020 = vst.msk [vmem:[%s11214_s23 + $0x28] sm:$0xff] %vm5014_vm8, %v4987_v34  ;;  %v8053_v56 = vpop.f32.mrb[40].mxu1  ;;  %v5110_v48 = vmax.f32 %v5047_v47, %v6957_v61  ;;  %v8864_v34 = vld [vmem:[%s12159_s5 + $0x8] sm:$0xff]  }
 0x5bb   : > { %v4960_v21 = vadd.f32 %v8053_v56, %v11207_v58  ;;  %v4816_v41 = vpop.f32.mrb[41].mxu1 }
 0x5bc   : > { %v4958_v23 = vadd.f32 %v11207_v58, %v4816_v41  ;;  %v8054_v14 = vpop.f32.mrb[42].mxu1  ;;  %v11243_v42 = vmax.f32 %v5110_v48, %v5111_v3 }
 0x5bd   : > { %v4992_v55 = vmax.f32 %v4960_v21, 0.0  ;;  %v4961_v30 = vadd.f32 %v8054_v14, %v11207_v58  ;;  %v4819_v25 = vpop.f32.mrb[43].mxu1 }
 0x5be   : > { %v4990_v45 = vmax.f32 %v4958_v23, 0.0  ;;  %v4959_v7 = vadd.f32 %v11207_v58, %v4819_v25  ;;  %5134 = vst.msk [vmem:[%s11249_s25] sm:$0xff] %vm5014_vm8, %v11243_v42  ;;  %v5172_v4 = vpack.c.bf16 %v11243_v42, %v9097_v46  ;;  %v11326_v23 = vld [vmem:[%s12159_s5 + $0x20] sm:$0xff]  }
 0x5bf   : > { %5025 = vst.msk [vmem:[%s11214_s23 + $0x50] sm:$0xff] %vm5014_vm8, %v4992_v55  ;;  %v4993_v22 = vmax.f32 %v4961_v30, 0.0 }
 0x5c0   : > { %5023 = vst.msk [vmem:[%s11214_s23 + $0x40] sm:$0xff] %vm5014_vm8, %v4990_v45  ;;  %v4991_v20 = vmax.f32 %v4959_v7, 0.0  ;;  %8079 = vmatprep.mubr.msk.bf16.mxu0 %vm5014_vm8, %v5172_v4  ;;  %v6944_v60 = vld [vmem:[%s11214_s23 + $0x30] ss:$2 sm:$0xff]  ;;  %v6960_v43 = vld [vmem:[%s11214_s23 + $0x31] ss:$2 sm:$0xff] }
 0x5c1   : > { %5026 = vst.msk [vmem:[%s11214_s23 + $0x58] sm:$0xff] %vm5014_vm8, %v4993_v22  ;;  %v6943_v40 = vld [vmem:[%s11214_s23 + $0x20] ss:$2 sm:$0xff]  ;;  %v6959_v32 = vld [vmem:[%s11214_s23 + $0x21] ss:$2 sm:$0xff]  ;;  %v5113_v57 = vmax.f32 %v6944_v60, %v6960_v43 }
 0x5c2   : > { %5024 = vst.msk [vmem:[%s11214_s23 + $0x48] sm:$0xff] %vm5014_vm8, %v4991_v20  ;;  %v8057_v33 = vpop.f32.mrb[44].mxu1  ;;  %v5112_v39 = vmax.f32 %v6943_v40, %v6959_v32 }
 0x5c3   : > { %v4964_v50 = vadd.f32 %v8057_v33, %v11207_v58  ;;  %v4832_v18 = vpop.f32.mrb[45].mxu1 }
 0x5c4   : > { %v4962_v8 = vadd.f32 %v11207_v58, %v4832_v18  ;;  %v8058_v27 = vpop.f32.mrb[46].mxu1  ;;  %v11271_v38 = vmax.f32 %v5112_v39, %v5113_v57 }
 0x5c5   : > { %v4996_v5 = vmax.f32 %v4964_v50, 0.0  ;;  %v4965_v10 = vadd.f32 %v8058_v27, %v11207_v58  ;;  %v4835_v29 = vpop.f32.mrb[47].mxu1 }
 0x5c6   : > { %v4994_v26 = vmax.f32 %v4962_v8, 0.0  ;;  %v4963_v1 = vadd.f32 %v11207_v58, %v4835_v29  ;;  %5135 = vst.msk [vmem:[%s11249_s25 + $0x8] sm:$0xff] %vm5014_vm8, %v11271_v38  ;;  %v5595_v59 = vpack.c.bf16 %v11271_v38, %v11243_v42 }
 0x5c7   : > { %5029 = vst.msk [vmem:[%s11214_s23 + $0x70] sm:$0xff] %vm5014_vm8, %v4996_v5  ;;  %v4997_v62 = vmax.f32 %v4965_v10, 0.0 }
 0x5c8   : > { %5027 = vst.msk [vmem:[%s11214_s23 + $0x60] sm:$0xff] %vm5014_vm8, %v4994_v26  ;;  %v4995_v54 = vmax.f32 %v4963_v1, 0.0  ;;  %v6946_v44 = vld [vmem:[%s11214_s23 + $0x50] ss:$2 sm:$0xff]  ;;  %v6962_v24 = vld [vmem:[%s11214_s23 + $0x51] ss:$2 sm:$0xff] }
 0x5c9   : > { %5030 = vst.msk [vmem:[%s11214_s23 + $0x78] sm:$0xff] %vm5014_vm8, %v4997_v62  ;;  %v6945_v51 = vld [vmem:[%s11214_s23 + $0x40] ss:$2 sm:$0xff]  ;;  %v6961_v49 = vld [vmem:[%s11214_s23 + $0x41] ss:$2 sm:$0xff]  ;;  %v5115_v28 = vmax.f32 %v6946_v44, %v6962_v24 }
 0x5ca   : > { %5028 = vst.msk [vmem:[%s11214_s23 + $0x68] sm:$0xff] %vm5014_vm8, %v4995_v54  ;;  %v8061_v15 = vpop.f32.mrb[48].mxu1  ;;  %v5114_v17 = vmax.f32 %v6945_v51, %v6961_v49 }
 0x5cb   : > { %v4968_v2 = vadd.f32 %v8061_v15, %v11207_v58  ;;  %v4848_v31 = vpop.f32.mrb[49].mxu1 }
 0x5cc   : > { %v4966_v13 = vadd.f32 %v11207_v58, %v4848_v31  ;;  %v8062_v19 = vpop.f32.mrb[50].mxu1  ;;  %v11294_v37 = vmax.f32 %v5114_v17, %v5115_v28 }
 0x5cd   : > { %v5000_v35 = vmax.f32 %v4968_v2, 0.0  ;;  %v4969_v63 = vadd.f32 %v8062_v19, %v11207_v58  ;;  %v4851_v36 = vpop.f32.mrb[51].mxu1 }
 0x5ce   : > { %v4998_v0 = vmax.f32 %v4966_v13, 0.0  ;;  %v4967_v52 = vadd.f32 %v11207_v58, %v4851_v36  ;;  %v11300_v16 = vpack.c.bf16 %v11294_v37, %v11271_v38  ;;  %5136 = vst.msk [vmem:[%s11249_s25 + $0x10] sm:$0xff] %vm5014_vm8, %v11294_v37 }
 0x5cf   : > { %5033 = vst.msk [vmem:[%s11214_s23 + $0x90] sm:$0xff] %vm5014_vm8, %v5000_v35  ;;  %v5001_v11 = vmax.f32 %v4969_v63, 0.0 }
 0x5d0   : > { %5031 = vst.msk [vmem:[%s11214_s23 + $0x80] sm:$0xff] %vm5014_vm8, %v4998_v0  ;;  %v4999_v53 = vmax.f32 %v4967_v52, 0.0  ;;  %8080 = vmatmul.mubr.msk.bf16.vlgmr.msra.gmra.mrb[32].mxu0 %vm5014_vm8, %v11300_v16  ;;  %v6948_v47 = vld [vmem:[%s11214_s23 + $0x70] ss:$2 sm:$0xff]  ;;  %v6964_v61 = vld [vmem:[%s11214_s23 + $0x71] ss:$2 sm:$0xff] }
 0x5d1   : > { %5034 = vst.msk [vmem:[%s11214_s23 + $0x98] sm:$0xff] %vm5014_vm8, %v5001_v11  ;;  %v6947_v3 = vld [vmem:[%s11214_s23 + $0x60] ss:$2 sm:$0xff]  ;;  %v6963_v56 = vld [vmem:[%s11214_s23 + $0x61] ss:$2 sm:$0xff]  ;;  %v5117_v48 = vmax.f32 %v6948_v47, %v6964_v61  ;;  %8088 = vmatpush3.bf16.msra.mxu0 %v11198_v12 }
 0x5d2   : > { %5032 = vst.msk [vmem:[%s11214_s23 + $0x88] sm:$0xff] %vm5014_vm8, %v4999_v53  ;;  %v8065_v21 = vpop.f32.mrb[52].mxu1  ;;  %v5116_v41 = vmax.f32 %v6947_v3, %v6963_v56  ;;  %8089 = vmatprep.subr.bf16.mxu0 %v8864_v34 }
 0x5d3   : > { %v4972_v14 = vadd.f32 %v8065_v21, %v11207_v58  ;;  %v4864_v55 = vpop.f32.mrb[53].mxu1 }
 0x5d4   : > { %v4970_v30 = vadd.f32 %v11207_v58, %v4864_v55  ;;  %v8066_v12 = vpop.f32.mrb[54].mxu1  ;;  %v11330_v25 = vmax.f32 %v5116_v41, %v5117_v48 }
 0x5d5   : > { %v5004_v45 = vmax.f32 %v4972_v14, 0.0  ;;  %v4973_v7 = vadd.f32 %v8066_v12, %v11207_v58  ;;  %v4867_v4 = vpop.f32.mrb[55].mxu1  ;;  %8090 = vmatpush3.bf16.msra.mxu0 %v8864_v34 }
 0x5d6   : > { %v5002_v22 = vmax.f32 %v4970_v30, 0.0  ;;  %v4971_v20 = vadd.f32 %v11207_v58, %v4867_v4  ;;  %5137 = vst.msk [vmem:[%s11249_s25 + $0x18] sm:$0xff] %vm5014_vm8, %v11330_v25  ;;  %8099 = vmatprep.subr.bf16.mxu0 %v11326_v23  ;;  %v5596_v43 = vpack.c.bf16 %v11330_v25, %v11294_v37 }
 0x5d7   : > { %5037 = vst.msk [vmem:[%s11214_s23 + $0xb0] sm:$0xff] %vm5014_vm8, %v5004_v45  ;;  %v5005_v60 = vmax.f32 %v4973_v7, 0.0 }
 0x5d8   : > { %5035 = vst.msk [vmem:[%s11214_s23 + $0xa0] sm:$0xff] %vm5014_vm8, %v5002_v22  ;;  %v5003_v40 = vmax.f32 %v4971_v20, 0.0  ;;  %v6950_v32 = vld [vmem:[%s11214_s23 + $0x90] ss:$2 sm:$0xff]  ;;  %v6966_v57 = vld [vmem:[%s11214_s23 + $0x91] ss:$2 sm:$0xff] }
 0x5d9   : > { %5038 = vst.msk [vmem:[%s11214_s23 + $0xb8] sm:$0xff] %vm5014_vm8, %v5005_v60  ;;  %v6949_v33 = vld [vmem:[%s11214_s23 + $0x80] ss:$2 sm:$0xff]  ;;  %v6965_v39 = vld [vmem:[%s11214_s23 + $0x81] ss:$2 sm:$0xff]  ;;  %v5119_v50 = vmax.f32 %v6950_v32, %v6966_v57  ;;  %v5144_v32 = vrot.slane %v11294_v37, 7 }
 0x5da   : > { %5036 = vst.msk [vmem:[%s11214_s23 + $0xa8] sm:$0xff] %vm5014_vm8, %v5003_v40  ;;  %v8069_v18 = vpop.f32.mrb[56].mxu1  ;;  %v5118_v8 = vmax.f32 %v6949_v33, %v6965_v39  ;;  %v5143_v39 = vrot.slane %v11271_v38, 7 }
 0x5db   : > { %v4976_v27 = vadd.f32 %v8069_v18, %v11207_v58  ;;  %v4880_v5 = vpop.f32.mrb[57].mxu1  ;;  %v5145_v18 = vrot.slane %v11330_v25, 7 }
 0x5dc   : > { %v4974_v10 = vadd.f32 %v11207_v58, %v4880_v5  ;;  %v8070_v29 = vpop.f32.mrb[58].mxu1  ;;  %v11354_v26 = vmax.f32 %v5118_v8, %v5119_v50  ;;  %v5142_v8 = vrot.slane %v11243_v42, 7 }
 0x5dd   : > { %v5008_v1 = vmax.f32 %v4976_v27, 0.0  ;;  %v4977_v62 = vadd.f32 %v8070_v29, %v11207_v58  ;;  %v4883_v54 = vpop.f32.mrb[59].mxu1  ;;  %v5154_v27 = vsel %vm615_vm2, %v5143_v39, %v5144_v32 }
 0x5de   : > { %v5006_v44 = vmax.f32 %v4974_v10, 0.0  ;;  %v4975_v24 = vadd.f32 %v11207_v58, %v4883_v54  ;;  %5138 = vst.msk [vmem:[%s11249_s25 + $0x20] sm:$0xff] %vm5014_vm8, %v11354_v26  ;;  %v11363_v51 = vpack.c.bf16 %v11354_v26, %v11330_v25  ;;  %v5146_v33 = vrot.slane %v11354_v26, 7 }
 0x5df   : > { %5041 = vst.msk [vmem:[%s11214_s23 + $0xd0] sm:$0xff] %vm5014_vm8, %v5008_v1  ;;  %v5009_v49 = vmax.f32 %v4977_v62, 0.0  ;;  %v5155_v29 = vsel %vm615_vm2, %v5142_v8, %v5143_v39  ;;  %v11440_v62 = vsel %vm646_vm4, %v5154_v27, 0.0  ;;  %v5153_v54 = vsel %vm615_vm2, %v5144_v32, %v5145_v18  ;;  %v8869_v27 = vld [vmem:[%s12159_s5 + $0x40] sm:$0xff]  }
 0x5e0   : > { %5039 = vst.msk [vmem:[%s11214_s23 + $0xc0] sm:$0xff] %vm5014_vm8, %v5006_v44  ;;  %v5007_v28 = vmax.f32 %v4975_v24, 0.0  ;;  %8083 = vmatprep.mubr.msk.bf16.mxu1 %vm5014_vm8, %v11363_v51  ;;  %v6952_v15 = vld [vmem:[%s11214_s23 + $0xb0] ss:$2 sm:$0xff]  ;;  %v6968_v17 = vld [vmem:[%s11214_s23 + $0xb1] ss:$2 sm:$0xff]  ;;  %v5152_v10 = vsel %vm615_vm2, %v5145_v18, %v5146_v33 }
 0x5e1   : > { %5042 = vst.msk [vmem:[%s11214_s23 + $0xd8] sm:$0xff] %vm5014_vm8, %v5009_v49  ;;  %v6951_v2 = vld [vmem:[%s11214_s23 + $0xa0] ss:$2 sm:$0xff]  ;;  %v6967_v31 = vld [vmem:[%s11214_s23 + $0xa1] ss:$2 sm:$0xff]  ;;  %v5121_v13 = vmax.f32 %v6952_v15, %v6968_v17  ;;  %v11448_v24 = vsel %vm646_vm4, %v5152_v10, 0.0 }
 0x5e2   : > { %5040 = vst.msk [vmem:[%s11214_s23 + $0xc8] sm:$0xff] %vm5014_vm8, %v5007_v28  ;;  %v8073_v19 = vpop.f32.mrb[60].mxu1  ;;  %v5120_v35 = vmax.f32 %v6951_v2, %v6967_v31  ;;  %v5158_v15 = vsel %vm646_vm4, %v5155_v29, 0.0  ;;  %v5360_v17 = vrot.slane %v11271_v38, 1  ;;  %v5160_v31 = vsel %vm646_vm4, %v5153_v54, 0.0  ;;  %v8873_v38 = vld [vmem:[%s12159_s5 + $0x60] sm:$0xff]  }
 0x5e3   : > { %v4980_v63 = vadd.f32 %v8073_v19, %v11207_v58  ;;  %v4896_v36 = vpop.f32.mrb[61].mxu1  ;;  %v11456_v2 = vpack.c.bf16 %v11440_v62, %v5158_v15 }
 0x5e4   : > { %v4978_v0 = vadd.f32 %v11207_v58, %v4896_v36  ;;  %v8074_v52 = vpop.f32.mrb[62].mxu1  ;;  %v11381_v34 = vmax.f32 %v5120_v35, %v5121_v13  ;;  %v8866_v13 = vld [vmem:[%s12159_s5 + $0x28] sm:$0xff]   ;;  %v11466_v35 = vpack.c.bf16 %v11448_v24, %v5160_v31 }
 0x5e5   : > { %v5012_v11 = vmax.f32 %v4980_v63, 0.0  ;;  %v4981_v53 = vadd.f32 %v8074_v52, %v11207_v58  ;;  %v4899_v47 = vpop.f32.mrb[63].mxu1  ;;  %v5359_v63 = vrot.slane %v11243_v42, 1  ;;  %v8876_v42 = vld [vmem:[%s12159_s5 + $0x78] sm:$0xff]  }
 0x5e6   : > { %v5010_v61 = vmax.f32 %v4978_v0, 0.0  ;;  %v4979_v3 = vadd.f32 %v11207_v58, %v4899_v47  ;;  %5139 = vst.msk [vmem:[%s11249_s25 + $0x28] sm:$0xff] %vm5014_vm8, %v11381_v34  ;;  %v5597_v48 = vpack.c.bf16 %v11381_v34, %v11354_v26  ;;  %v5147_v19 = vrot.slane %v11381_v34, 7 }
 0x5e7   : > { %5045 = vst.msk [vmem:[%s11214_s23 + $0xf0] sm:$0xff] %vm5014_vm8, %v5012_v11  ;;  %v5013_v56 = vmax.f32 %v4981_v53, 0.0  ;;  %v5373_v0 = vsel %vm1169_vm5, %v5359_v63, %v5360_v17  ;;  %v8867_v11 = vld [vmem:[%s12159_s5 + $0x30] sm:$0xff]   ;;  %v5362_v47 = vrot.slane %v11330_v25, 1 }
 0x5e8   : > { %5043 = vst.msk [vmem:[%s11214_s23 + $0xe0] sm:$0xff] %vm5014_vm8, %v5010_v61  ;;  %v5011_v21 = vmax.f32 %v4979_v3, 0.0  ;;  %v6954_v41 = vld [vmem:[%s11214_s23 + $0xd0] ss:$2 sm:$0xff]  ;;  %v6970_v14 = vld [vmem:[%s11214_s23 + $0xd1] ss:$2 sm:$0xff]  ;;  %v5151_v52 = vsel %vm615_vm2, %v5146_v33, %v5147_v19 }
 0x5e9   : > { %5046 = vst.msk [vmem:[%s11214_s23 + $0xf8] sm:$0xff] %vm5014_vm8, %v5013_v56  ;;  %v6953_v58 = vld [vmem:[%s11214_s23 + $0xc0] ss:$2 sm:$0xff]  ;;  %v6969_v55 = vld [vmem:[%s11214_s23 + $0xc1] ss:$2 sm:$0xff]  ;;  %v5123_v30 = vmax.f32 %v6954_v41, %v6970_v14  ;;  %v5162_v61 = vsel %vm646_vm4, %v5151_v52, 0.0 }
 0x5ea   : > { %5044 = vst.msk [vmem:[%s11214_s23 + $0xe8] sm:$0xff] %vm5014_vm8, %v5011_v21  ;;  %v5122_v12 = vmax.f32 %v6953_v58, %v6969_v55  ;;  %v5364_v3 = vrot.slane %v11381_v34, 1  ;;  %v5361_v21 = vrot.slane %v11294_v37, 1  ;;  %v5363_v14 = vrot.slane %v11354_v26, 1 }
 0x5ec   : > { %v11402_v45 = vmax.f32 %v5122_v12, %v5123_v30  ;;  %v5371_v58 = vsel %vm1169_vm5, %v5361_v21, %v5362_v47  ;;  %v5369_v55 = vsel %vm1169_vm5, %v5363_v14, %v5364_v3  ;;  %v5372_v30 = vsel %vm1169_vm5, %v5360_v17, %v5361_v21  ;;  %v8870_v17 = vld [vmem:[%s12159_s5 + $0x48] sm:$0xff]  }
 0x5ed   : > { %v5376_v12 = vsel %vm1169_vm5, %v5371_v58, 0.0 }
 0x5ee   : > { %v11406_v7 = vpack.c.bf16 %v11402_v45, %v11381_v34  ;;  %5140 = vst.msk [vmem:[%s11249_s25 + $0x30] sm:$0xff] %vm5014_vm8, %v11402_v45  ;;  %v5148_v49 = vrot.slane %v11402_v45, 7  ;;  %v5365_v33 = vrot.slane %v11402_v45, 1 }
 0x5f0   : > { %8084 = vmatmul.mubr.msk.bf16.vlgmr.msra.gmra.mrb[64].mxu1 %vm5014_vm8, %v11406_v7  ;;  %v6956_v4 = vld [vmem:[%s11214_s23 + $0xf0] ss:$2 sm:$0xff]  ;;  %v6972_v22 = vld [vmem:[%s11214_s23 + $0xf1] ss:$2 sm:$0xff]  ;;  %v5150_v36 = vsel %vm615_vm2, %v5147_v19, %v5148_v49 }
 0x5f1   : > { %v6955_v20 = vld [vmem:[%s11214_s23 + $0xe0] ss:$2 sm:$0xff]  ;;  %v6971_v60 = vld [vmem:[%s11214_s23 + $0xe1] ss:$2 sm:$0xff]  ;;  %v5125_v40 = vmax.f32 %v6956_v4, %v6972_v22  ;;  %v5163_v53 = vsel %vm646_vm4, %v5150_v36, 0.0  ;;  %v5370_v4 = vsel %vm1169_vm5, %v5362_v47, %v5363_v14  ;;  %v5378_v22 = vsel %vm1169_vm5, %v5369_v55, 0.0  ;;  %8191 = vmatprep.mubr.msk.f32.mxu1 %vm9098_vm9, %v9097_v46 }
 0x5f2   : > { %v5124_v57 = vmax.f32 %v6955_v20, %v6971_v60  ;;  %v11497_v56 = vpack.c.bf16 %v5163_v53, %v5162_v61  ;;  %v5375_v60 = vsel %vm1169_vm5, %v5372_v30, 0.0  ;;  %v5377_v32 = vsel %vm1169_vm5, %v5370_v4, 0.0  ;;  %v6187_v36 = vld [vmem:[%s12161_s7 + $0x8] sm:$0xff] }
 0x5f3   : > { %v11529_v39 = vpack.c.bf16 %v5378_v22, %v5377_v32  ;;  %v5704_v25 = vpack.c.bf16 %v5377_v32, %v5376_v12 }
 0x5f4   : > { %v11420_v50 = vmax.f32 %v5124_v57, %v5125_v40  ;;  %v11521_v40 = vpack.c.bf16 %v5376_v12, %v5375_v60  ;;  %v8868_v57 = vld [vmem:[%s12159_s5 + $0x38] sm:$0xff]  }
 0x5f6   : > { %5141 = vst.msk [vmem:[%s11249_s25 + $0x38] sm:$0xff] %vm5014_vm8, %v11420_v50  ;;  %v5149_v5 = vrot.slane %v11420_v50, 7  ;;  %v5366_v20 = vrot.slane %v11420_v50, 1  ;;  %v5903_v19 = vpack.c.bf16 %v9097_v46, %v11420_v50  ;;  %s9099_s25 = smov [#allocation4]  }
 0x5f8   : > { %v5156_v1 = vsel %vm615_vm2, %v5149_v5, %v5142_v8  ;;  %v5367_v18 = vsel %vm1169_vm5, %v5365_v33, %v5366_v20  ;;  %v5368_v8 = vsel %vm1169_vm5, %v5364_v3, %v5365_v33  ;;  %v5701_v34 = vsel %vm1169_vm5, %v5366_v20, %v5359_v63 }
 0x5f9   : > { %v5157_v44 = vsel %vm646_vm4, %v5156_v1, 0.0  ;;  %v5380_v10 = vsel %vm1169_vm5, %v5367_v18, 0.0  ;;  %v5379_v29 = vsel %vm1169_vm5, %v5368_v8, 0.0 }
 0x5fa   : > { %v5164_v28 = vpack.c.bf16 %v5157_v44, %v9097_v46  ;;  %v11546_v1 = vpack.c.bf16 %v5380_v10, %v5379_v29  ;;  %v5489_v54 = vpack.c.bf16 %v5158_v15, %v5157_v44  ;;  %v5487_v44 = vsel %vm615_vm2, %v5148_v49, %v5149_v5  ;;  %v8872_v5 = vld [vmem:[%s12159_s5 + $0x58] sm:$0xff]  }
 0x5fb   : > { %v5705_v26 = vpack.c.bf16 %v5379_v29, %v5378_v22 }
 0x5fc   : > { %8091 = vmatprep.mubr.msk.bf16.mxu0 %vm5014_vm8, %v5164_v28  ;;  %v5490_v28 = vpack.c.bf16 %v5160_v31, %v11440_v62  ;;  %v8871_v62 = vld [vmem:[%s12159_s5 + $0x50] sm:$0xff]  }
 0x5fd   : > { %8092 = vmatmul.mubr.msk.bf16.vlgmr.msra.gmra.mrb[32].mxu0 %vm5014_vm8, %v11456_v2 }
 0x5fe   : > { %8100 = vmatpush3.bf16.msra.mxu0 %v11326_v23  ;;  %8095 = vmatprep.mubr.msk.bf16.mxu0 %vm5014_vm8, %v11466_v35  ;;  %v11491_v23 = vsel %vm1169_vm5, %v5373_v0, 0.0  ;;  %v6188_v0 = vld [vmem:[%s12161_s7 + $0x10] sm:$0xff] }
 0x5ff   : > { %8101 = vmatprep.subr.bf16.mxu0 %v8866_v13  ;;  %v5381_v41 = vpack.c.bf16 %v11491_v23, %v9097_v46  ;;  %v5703_v37 = vpack.c.bf16 %v5375_v60, %v11491_v23  ;;  %v7059_v23 = vld [vmem:[%s12162_s6] ss:$0 sm:$0xff]  ;;  %s11729_s6 = scalar_lea.sflag [#allocation5], %s12020_s30 }
 0x602   : > { %8102 = vmatpush3.bf16.msra.mxu0 %v8866_v13  ;;  %v5491_v13 = vpack.c.bf16 %v5162_v61, %v11448_v24  ;;  %v5488_v24 = vsel %vm646_vm4, %v5487_v44, 0.0 }
 0x603   : > { %8111 = vmatprep.subr.bf16.mxu0 %v8867_v11  ;;  %v5492_v15 = vpack.c.bf16 %v5488_v24, %v5163_v53  ;;  %v5809_v31 = vpack.c.bf16 %v9097_v46, %v5488_v24 }
 0x605   : > { %8096 = vmatmul.mubr.msk.bf16.gmra.mrb[36].mxu0 %vm5014_vm8, %v11497_v56 }
 0x606   : > { %8103 = vmatprep.mubr.msk.bf16.mxu0 %vm5014_vm8, %v5381_v41 }
 0x60d   : > { %8104 = vmatmul.mubr.msk.bf16.vlgmr.msra.gmra.mrb[32].mxu0 %vm5014_vm8, %v11521_v40 }
 0x60e   : > { %8112 = vmatpush3.bf16.msra.mxu0 %v8867_v11  ;;  %8107 = vmatprep.mubr.msk.bf16.mxu0 %vm5014_vm8, %v11529_v39  ;;  %v6189_v11 = vld [vmem:[%s12161_s7 + $0x18] sm:$0xff] }
 0x60f   : > { %8113 = vmatprep.subr.bf16.mxu0 %v8868_v57  ;;  %v8198_v53 = vpack.c.bf16 %v6189_v11, %v6188_v0 }
 0x612   : > { %8114 = vmatpush3.bf16.msra.mxu0 %v8868_v57 }
 0x613   : > { %8123 = vmatprep.subr.bf16.mxu0 %v8869_v27 }
 0x615   : > { %8108 = vmatmul.mubr.msk.bf16.gmra.mrb[36].mxu0 %vm5014_vm8, %v11546_v1 }
 0x616   : > { %8115 = vmatprep.mubr.msk.bf16.mxu0 %vm5014_vm8, %v5489_v54 }
 0x61d   : > { %8116 = vmatmul.mubr.msk.bf16.vlgmr.msra.gmra.mrb[32].mxu0 %vm5014_vm8, %v5490_v28 }
 0x61e   : > { %8124 = vmatpush3.bf16.msra.mxu0 %v8869_v27  ;;  %8119 = vmatprep.mubr.msk.bf16.mxu0 %vm5014_vm8, %v5491_v13 }
 0x61f   : > { %8125 = vmatprep.subr.bf16.mxu0 %v8870_v17 }
 0x622   : > { %8126 = vmatpush3.bf16.msra.mxu0 %v8870_v17 }
 0x623   : > { %8135 = vmatprep.subr.bf16.mxu0 %v8871_v62 }
 0x625   : > { %8120 = vmatmul.mubr.msk.bf16.gmra.mrb[36].mxu0 %vm5014_vm8, %v5492_v15 }
 0x626   : > { %8127 = vmatprep.mubr.msk.bf16.mxu0 %vm5014_vm8, %v5595_v59  ;;  %v5598_v59 = vpack.c.bf16 %v11420_v50, %v11402_v45  ;;  %v5702_v45 = vsel %vm1169_vm5, %v5701_v34, 0.0  ;;  %v6186_v50 = vld [vmem:[%s12161_s7] sm:$0xff]  ;;  %s8879_s7 = scalar_lea.vmem %s11725_s0, 1024 }
 0x627   : > { %v5706_v49 = vpack.c.bf16 %v5702_v45, %v5380_v10  ;;  %v8195_v52 = vpack.c.bf16 %v6187_v36, %v6186_v50  ;;  %p8880_p11 = scmp.ne.s32.totalorder %s11725_s0, %s8879_s7 }
 0x629   : > { %8196 = vmatpush3.bf16.msra.mxu1 %v8195_v52  ;;  %p8881_p12 = pnand %p8880_p11, %p9229_p5 }
 0x62a   : > { %8197 = vmatprep.subr.bf16.mxu1 %v12073_v6 }
 0x62b   : > { %p8882_p13 = pneg %p8881_p12 }
 0x62d   : > { %8128 = vmatmul.mubr.msk.bf16.vlgmr.msra.gmra.mrb[32].mxu0 %vm5014_vm8, %v5596_v43  ;;  %v8874_v43 = vld [vmem:[%s12159_s5 + $0x68] sm:$0xff]   ;;  %8199 = vmatpush3.bf16.msra.mxu1 %v8198_v53 }
 0x62e   : > { %8136 = vmatpush3.bf16.msra.mxu0 %v8871_v62  ;;  %8131 = vmatprep.mubr.msk.bf16.mxu0 %vm5014_vm8, %v5597_v48  ;;  %v8875_v48 = vld [vmem:[%s12159_s5 + $0x70] sm:$0xff]  }
 0x62f   : > { %8137 = vmatprep.subr.bf16.mxu0 %v8872_v5 }
 0x632   : > { %8138 = vmatpush3.bf16.msra.mxu0 %v8872_v5 }
 0x633   : > { %8147 = vmatprep.subr.bf16.mxu0 %v8873_v38 }
 0x635   : > { %8132 = vmatmul.mubr.msk.bf16.gmra.mrb[36].mxu0 %vm5014_vm8, %v5598_v59 }
 0x636   : > { %8139 = vmatprep.mubr.msk.bf16.mxu0 %vm5014_vm8, %v5703_v37 }
 0x63d   : > { %8140 = vmatmul.mubr.msk.bf16.vlgmr.msra.gmra.mrb[32].mxu0 %vm5014_vm8, %v5704_v25 }
 0x63e   : > { %8148 = vmatpush3.bf16.msra.mxu0 %v8873_v38  ;;  %8143 = vmatprep.mubr.msk.bf16.mxu0 %vm5014_vm8, %v5705_v26 }
 0x63f   : > { %8149 = vmatprep.subr.bf16.mxu0 %v8874_v43 }
 0x642   : > { %8150 = vmatpush3.bf16.msra.mxu0 %v8874_v43 }
 0x643   : > { %8159 = vmatprep.subr.bf16.mxu0 %v8875_v48 }
 0x645   : > { %8144 = vmatmul.mubr.msk.bf16.gmra.mrb[36].mxu0 %vm5014_vm8, %v5706_v49 }
 0x646   : > { %8151 = vmatprep.mubr.msk.bf16.mxu0 %vm5014_vm8, %v11456_v2  ;;  %v8878_v2 = vld [vmem:[%s12159_s5 + $0x88] sm:$0xff]   ;;  %s11723_s5 = scalar_lea.hbm %s12164_s11, %s12021_s17 }
 0x64d   : > { %8152 = vmatmul.mubr.msk.bf16.vlgmr.msra.gmra.mrb[32].mxu0 %vm5014_vm8, %v11466_v35 }
 0x64e   : > { %8160 = vmatpush3.bf16.msra.mxu0 %v8875_v48  ;;  %8155 = vmatprep.mubr.msk.bf16.mxu0 %vm5014_vm8, %v11497_v56 }
 0x64f   : > { %8161 = vmatprep.subr.bf16.mxu0 %v8876_v42 }
 0x652   : > { %8162 = vmatpush3.bf16.msra.mxu0 %v8876_v42 }
 0x653   : > { %8171 = vmatprep.subr.bf16.mxu0 %v8877_v9 }
 0x655   : > { %8156 = vmatmul.mubr.msk.bf16.gmra.mrb[36].mxu0 %vm5014_vm8, %v5809_v31 }
 0x656   : > { %8163 = vmatprep.mubr.msk.bf16.mxu0 %vm5014_vm8, %v11300_v16  ;;  %v5997_v16 = vpack.c.bf16 %v9097_v46, %v5702_v45 }
 0x65d   : > { %8164 = vmatmul.mubr.msk.bf16.vlgmr.msra.gmra.mrb[32].mxu0 %vm5014_vm8, %v11363_v51 }
 0x65e   : > { %8172 = vmatpush3.bf16.msra.mxu0 %v8877_v9  ;;  %8167 = vmatprep.mubr.msk.bf16.mxu0 %vm5014_vm8, %v11406_v7 }
 0x65f   : > { %8173 = vmatprep.subr.bf16.mxu0 %v8878_v2 }
 0x662   : > { %8174 = vmatpush3.bf16.msra.mxu0 %v8878_v2 }
 0x665   : > { %8168 = vmatmul.mubr.msk.bf16.gmra.mrb[36].mxu0 %vm5014_vm8, %v5903_v19 }
 0x666   : > { %8175 = vmatprep.mubr.msk.bf16.mxu0 %vm5014_vm8, %v11521_v40 }
 0x66d   : > { %8176 = vmatmul.mubr.msk.bf16.vlgmr.msra.gmra.mrb[32].mxu0 %vm5014_vm8, %v11529_v39 }
 0x66e   : > { %8179 = vmatprep.mubr.msk.bf16.mxu0 %vm5014_vm8, %v11546_v1 }
 0x675   : > { %8180 = vmatmul.mubr.msk.bf16.gmra.mrb[36].mxu0 %vm5014_vm8, %v5997_v16 }
 0x6c3   : > { %v8085_v51 = vpop.f32.mrb[64].mxu1 }
 0x6c4   : > { %v5255_v7 = vpop.f32.mrb[65].mxu1 }
 0x6c5   : > { %v8086_v35 = vpop.f32.mrb[66].mxu1 }
 0x6c6   : > { %v5258_v63 = vpop.f32.mrb[67].mxu1 }
 0x740   : > { %v8177_v47 = vpop.f32.mrb[32].mxu0 }
 0x741   : > { %v6100_v61 = vadd.f32 %v8177_v47, %v7059_v23  ;;  %v6052_v3 = vpop.f32.mrb[33].mxu0 }
 0x742   : > { %v6098_v56 = vadd.f32 %v7059_v23, %v6052_v3  ;;  %v8178_v21 = vpop.f32.mrb[34].mxu0 }
 0x743   : > { %v6108_v41 = vmax.f32 %v6100_v61, 0.0  ;;  %v6101_v14 = vadd.f32 %v8178_v21, %v7059_v23  ;;  %v6055_v58 = vpop.f32.mrb[35].mxu0 }
 0x744   : > { %v6106_v55 = vmax.f32 %v6098_v56, 0.0  ;;  %v6099_v46 = vadd.f32 %v7059_v23, %v6055_v58 }
 0x745   : > { %6116 = vst.msk [vmem:[%s11661_s2 + $0x10] sm:$0xff] %vm5014_vm8, %v6108_v41  ;;  %v6109_v6 = vmax.f32 %v6101_v14, 0.0 }
 0x746   : > { %6114 = vst.msk [vmem:[%s11661_s2] sm:$0xff] %vm5014_vm8, %v6106_v55  ;;  %v6107_v30 = vmax.f32 %v6099_v46, 0.0 }
 0x747   : > { %6117 = vst.msk [vmem:[%s11661_s2 + $0x18] sm:$0xff] %vm5014_vm8, %v6109_v6 }
 0x748   : > { %6115 = vst.msk [vmem:[%s11661_s2 + $0x8] sm:$0xff] %vm5014_vm8, %v6107_v30  ;;  %v8181_v12 = vpop.f32.mrb[36].mxu0 }
 0x749   : > { %v8236_v4 = vadd.f32 %v8181_v12, %v8085_v51  ;;  %v6068_v22 = vpop.f32.mrb[37].mxu0 }
 0x74a   : > { %v8237_v20 = vadd.f32 %v6068_v22, %v5255_v7  ;;  %v8182_v60 = vpop.f32.mrb[38].mxu0 }
 0x74b   : > { %v6104_v40 = vadd.f32 %v8236_v4, %v7059_v23  ;;  %v8238_v32 = vadd.f32 %v8182_v60, %v8086_v35  ;;  %v6071_v57 = vpop.f32.mrb[39].mxu0 }
 0x74c   : > { %v6102_v33 = vadd.f32 %v8237_v20, %v7059_v23  ;;  %v8239_v39 = vadd.f32 %v6071_v57, %v5258_v63  ;;  %v7061_v10 = vld [vmem:[%s11661_s2 + $0x10] ss:$2 sm:$0xf]  ;;  %v7069_v29 = vld [vmem:[%s11661_s2 + $0x11] ss:$2 sm:$0xf] }
 0x74d   : > { %v6112_v18 = vmax.f32 %v6104_v40, 0.0  ;;  %v6105_v8 = vadd.f32 %v8238_v32, %v7059_v23  ;;  %v6122_v27 = vld [vmem:[%s11661_s2] ss:$2 sm:$0xf]  ;;  %v6155_v59 = vmax.f32 %v7061_v10, %v7069_v29 }
 0x74e   : > { %v6110_v1 = vmax.f32 %v6102_v33, 0.0  ;;  %v6103_v54 = vadd.f32 %v8239_v39, %v7059_v23  ;;  %v7062_v28 = vld [vmem:[%s11661_s2 + $0x18] ss:$2 sm:$0xf] }
 0x74f   : > { %6120 = vst.msk [vmem:[%s11661_s2 + $0x30] sm:$0xff] %vm5014_vm8, %v6112_v18  ;;  %v6113_v17 = vmax.f32 %v6105_v8, 0.0  ;;  %v7060_v13 = vld [vmem:[%s11661_s2 + $0x8] ss:$2 sm:$0xf] }
 0x750   : > { %6118 = vst.msk [vmem:[%s11661_s2 + $0x20] sm:$0xff] %vm5014_vm8, %v6110_v1  ;;  %v6111_v44 = vmax.f32 %v6103_v54, 0.0  ;;  %v7067_v62 = vld [vmem:[%s11661_s2 + $0x1] ss:$2 sm:$0xf] }
 0x751   : > { %6121 = vst.msk [vmem:[%s11661_s2 + $0x38] sm:$0xff] %vm5014_vm8, %v6113_v17  ;;  %v7068_v24 = vld [vmem:[%s11661_s2 + $0x9] ss:$2 sm:$0xf]  ;;  %v6153_v5 = vmax.f32 %v6122_v27, %v7067_v62 }
 0x752   : > { %v7070_v15 = vld [vmem:[%s11661_s2 + $0x19] ss:$2 sm:$0xf]  ;;  %6119 = vst.msk [vmem:[%s11661_s2 + $0x28] sm:$0xff] %vm5014_vm8, %v6111_v44  ;;  %v6154_v38 = vmax.f32 %v7060_v13, %v7068_v24 }
 0x753   : > { %v6156_v37 = vmax.f32 %v7062_v28, %v7070_v15 }
 0x754   : > { %v6161_v25 = vmax.f32 %v6153_v5, %v6154_v38 }
 0x755   : > { %v6162_v43 = vmax.f32 %v6155_v59, %v6156_v37 }
 0x756   : > { %v7065_v26 = vld [vmem:[%s11661_s2 + $0x30] ss:$2 sm:$0xf]  ;;  %v7073_v34 = vld [vmem:[%s11661_s2 + $0x31] ss:$2 sm:$0xf] }
 0x757   : > { %6166 = vst.msk [vmem:[%s11690_s4] sm:$0xf] %vm6165_vm10, %v6161_v25  ;;  %6167 = vst.msk [vmem:[%s11690_s4 + $0x4] sm:$0xf] %vm6165_vm10, %v6162_v43  ;;  %v6159_v2 = vmax.f32 %v7065_v26, %v7073_v34  ;;  %v6170_v63 = vsel %vm6165_vm10, %v6161_v25, -inf  ;;  %v6171_v50 = vsel %vm6165_vm10, %v6162_v43, -inf }
 0x758   : > { %v7063_v48 = vld [vmem:[%s11661_s2 + $0x20] ss:$2 sm:$0xf]  ;;  %v7071_v45 = vld [vmem:[%s11661_s2 + $0x21] ss:$2 sm:$0xf]  ;;  %v6174_v52 = vmax.f32 %v6170_v63, %v6171_v50 }
 0x759   : > { %v7066_v49 = vld [vmem:[%s11661_s2 + $0x38] ss:$2 sm:$0xf]  ;;  %v7074_v42 = vld [vmem:[%s11661_s2 + $0x39] ss:$2 sm:$0xf]  ;;  %v6157_v16 = vmax.f32 %v7063_v48, %v7071_v45 }
 0x75a   : > { %v7064_v9 = vld [vmem:[%s11661_s2 + $0x28] ss:$2 sm:$0xf]  ;;  %v7072_v31 = vld [vmem:[%s11661_s2 + $0x29] ss:$2 sm:$0xf]  ;;  %v6160_v19 = vmax.f32 %v7066_v49, %v7074_v42 }
 0x75b   : > { %v6158_v51 = vmax.f32 %v7064_v9, %v7072_v31 }
 0x75c   : > { %v6164_v7 = vmax.f32 %v6159_v2, %v6160_v19 }
 0x75d   : > { %v6163_v35 = vmax.f32 %v6157_v16, %v6158_v51 }
 0x75e   : > { %v6173_v36 = vsel %vm6165_vm10, %v6164_v7, -inf  ;;  %6169 = vst.msk [vmem:[%s11690_s4 + $0xc] sm:$0xf] %vm6165_vm10, %v6164_v7 }
 0x75f   : > { %v6172_v0 = vsel %vm6165_vm10, %v6163_v35, -inf  ;;  %6168 = vst.msk [vmem:[%s11690_s4 + $0x8] sm:$0xf] %vm6165_vm10, %v6163_v35 }
 0x760   : > { %v6175_v11 = vmax.f32 %v6172_v0, %v6173_v36 }
 0x762   : > { %v6176_v53 = vmax.f32 %v6174_v52, %v6175_v11 }
 0x764   : > { %v6177_v23 = vsel %vm6165_vm10, %v6176_v53, -inf }
 0x765   : > { %v6178_v47 = vrot.slane %v6177_v23, 4 }
 0x767   : > { %v6179_v61 = vmax.f32 %v6177_v23, %v6178_v47 }
 0x769   : > { %v6180_v3 = vrot.slane %v6179_v61, 2 }
 0x76b   : > { %v6181_v56 = vmax.f32 %v6179_v61, %v6180_v3 }
 0x76d   : > { %v6182_v21 = vrot.slane %v6181_v56, 1 }
 0x76f   : > { %v6183_v41 = vmax.f32 %v6181_v56, %v6182_v21 }
 0x771   : > { %8192 = vmatmul.mubr.msk.f32.vlgmr.msra.gmra.mrb[68].mxu1 %vm5014_vm8, %v6183_v41  ;;  %6185 = vst.msk [vmem:[%s12019_s26] sm:$0x1] %vm6184_vm11, %v6183_v41  ;;  %s8883_s26 = sshll.u32 %s9099_s25, 4  ;;  %s8884_s26 = int_to_ptr.vmem [resolvable:$false] %s8883_s26 }
 0x772   : > { %s8885_s9 = scalar_lea.vmem %s8884_s26, 2048  ;;  %p8886_p0 = scmp.lt.s32.totalorder %s11725_s0, %s8884_s26 }
 0x773   : > { %p8887_p1 = scmp.lt.s32.totalorder %s8885_s9, %s8879_s7 }
 0x775   : > { %p8888_p2 = por %p8887_p1, %p8886_p0 }
 0x777   : > { %p8889_p3 = pnand %p8888_p2, %p8882_p13 }
 0x779   : > { %8892 = shalt.err (!%p8889_p3)
}
 0x77a   : > { %s8893_s1 = scalar_lea.hbm %s11723_s5, 1024  ;;  %s8897_s25 = scalar_lea.hbm %s12164_s11, 2048 }
 0x77b   : > { %p8894_p4 = scmp.ne.s32.totalorder %s11723_s5, %s8893_s1  ;;  %p8898_p9 = scmp.lt.u32.totalorder %s11723_s5, %s12164_s11 }
 0x77c   : > { %p8899_p10 = scmp.lt.u32.totalorder %s8897_s25, %s8893_s1  ;;  %p8901_p12 = scmp.lt.u32.totalorder %s8893_s1, %s11723_s5 }
 0x77d   : > { %p8895_p7 = pnand %p8894_p4, %p9229_p5 }
 0x77e   : > { %p8900_p11 = por %p8899_p10, %p8898_p9 }
 0x77f   : > { %p8896_p8 = pneg %p8895_p7 }
 0x780   : > { %p8902_p13 = por %p8901_p12, %p8900_p11 }
 0x782   : > { %p8903_p0 = pnand %p8902_p13, %p8896_p8 }
 0x784   : > { %8906 = shalt.err (!%p8903_p0)
}
 0x785   : > { %s12024_s7 = smov 128   ;;  %s9101_s9 = smov 8  }
 0x786   : > { %8781 = dma.vmem_to_hbm [thread:$0]  (%p9229_p5), %s11725_s0, 1024, %s11723_s5, %s11729_s6, %s12024_s7, %s12024_s7, %s9101_s9  }
 0x787   : > { %s12165_s30 = sshll.u32 %s9210_s22, 10  ;;  %s7097_s25 = sshll.u32 %s9210_s22, 8 }
 0x788   : > { %s11761_s3 = scalar_lea.hbm %s11956_s12, %s12165_s30  ;;  %s6360_s26 = sshll.u32 %s11690_s4, 4  ;;  %s11770_s26 = int_to_ptr.vmem [resolvable:$true] %s6360_s26 }
 0x789   : > { %s11768_s20 = scalar_lea.hbm %s11957_s13, %s7097_s25  ;;  %s12166_s19 = sand.u32 1, %s9210_s22  }
 0x78a   : > { %s11774_s5 = scalar_lea.sflag [#allocation8], %s12166_s19  ;;  %s8907_s0 = scalar_lea.vmem %s11770_s26, 256 }
 0x78b   : > { %p8908_p1 = scmp.ne.s32.totalorder %s11770_s26, %s8907_s0  ;;  %s9102_s30 = smov [#allocation7]  }
 0x78c   : > { %s8911_s4 = sshll.u32 %s9102_s30, 4  ;;  %s8912_s4 = int_to_ptr.vmem [resolvable:$false] %s8911_s4 }
 0x78d   : > { %p8909_p2 = pnand %p8908_p1, %p9229_p5  ;;  %s8913_s17 = scalar_lea.vmem %s8912_s4, 512 }
 0x78e   : > { %p8914_p4 = scmp.lt.s32.totalorder %s11770_s26, %s8912_s4  ;;  %p8915_p7 = scmp.lt.s32.totalorder %s8913_s17, %s8907_s0 }
 0x78f   : > { %p8910_p3 = pneg %p8909_p2 }
 0x790   : > { %p8916_p8 = por %p8915_p7, %p8914_p4 }
 0x792   : > { %p8917_p9 = pnand %p8916_p8, %p8910_p3 }
 0x794   : > { %8920 = shalt.err (!%p8917_p9)
}
 0x795   : > { %s8921_s11 = scalar_lea.hbm %s11768_s20, 256  ;;  %s8925_s1 = scalar_lea.hbm %s11957_s13, 512 }
 0x796   : > { %p8922_p10 = scmp.ne.s32.totalorder %s11768_s20, %s8921_s11  ;;  %p8926_p13 = scmp.lt.u32.totalorder %s11768_s20, %s11957_s13 }
 0x797   : > { %p8927_p0 = scmp.lt.u32.totalorder %s8925_s1, %s8921_s11  ;;  %p8929_p2 = scmp.lt.u32.totalorder %s8921_s11, %s11768_s20 }
 0x798   : > { %p8923_p11 = pnand %p8922_p10, %p9229_p5 }
 0x799   : > { %p8928_p1 = por %p8927_p0, %p8926_p13 }
 0x79a   : > { %p8924_p12 = pneg %p8923_p11 }
 0x79b   : > { %p8930_p3 = por %p8929_p2, %p8928_p1 }
 0x79d   : > { %p8931_p4 = pnand %p8930_p3, %p8924_p12 }
 0x79f   : > { %8934 = shalt.err (!%p8931_p4)
}
 0x7a0   : > { %s9103_s0 = smov 64   ;;  %s9104_s4 = smov 4  }
 0x7a1   : > { %8783 = dma.vmem_to_hbm [thread:$0]  (%p9229_p5), %s11770_s26, 256, %s11768_s20, %s11774_s5, %s9103_s0, %s9103_s0, %s9104_s4  }
 0x7a2   : > { %s7094_s17 = sshll.u32 %s9210_s22, 12  ;;  %s6312_s19 = sshll.u32 %s11214_s23, 4  ;;  %s11805_s19 = int_to_ptr.vmem [resolvable:$true] %s6312_s19 }
 0x7a3   : > { %s11803_s11 = scalar_lea.hbm %s11954_s10, %s7094_s17  ;;  %s6273_s25 = scalar_lea.sflag [#allocation3], %s11202_s16 }
 0x7a4   : > { %s8935_s30 = scalar_lea.vmem %s11805_s19, 4096  ;;  %s9105_s7 = smov [#allocation2]  }
 0x7a5   : > { %p8936_p7 = scmp.ne.s32.totalorder %s11805_s19, %s8935_s30  ;;  %s8939_s20 = sshll.u32 %s9105_s7, 4  ;;  %s8940_s20 = int_to_ptr.vmem [resolvable:$false] %s8939_s20 }
 0x7a6   : > { %s8941_s23 = scalar_lea.vmem %s8940_s20, 8192  ;;  %p8942_p10 = scmp.lt.s32.totalorder %s11805_s19, %s8940_s20 }
 0x7a7   : > { %p8937_p8 = pnand %p8936_p7, %p9229_p5  ;;  %p8943_p11 = scmp.lt.s32.totalorder %s8941_s23, %s8935_s30 }
 0x7a9   : > { %p8938_p9 = pneg %p8937_p8  ;;  %p8944_p12 = por %p8943_p11, %p8942_p10 }
 0x7ab   : > { %p8945_p13 = pnand %p8944_p12, %p8938_p9 }
 0x7ad   : > { %8948 = shalt.err (!%p8945_p13)
}
 0x7ae   : > { %s8949_s26 = scalar_lea.hbm %s11803_s11, 4096  ;;  %s8953_s7 = scalar_lea.hbm %s11954_s10, 8192 }
 0x7af   : > { %p8950_p0 = scmp.ne.s32.totalorder %s11803_s11, %s8949_s26  ;;  %p8954_p3 = scmp.lt.u32.totalorder %s11803_s11, %s11954_s10 }
 0x7b0   : > { %p8955_p4 = scmp.lt.u32.totalorder %s8953_s7, %s8949_s26  ;;  %p8957_p8 = scmp.lt.u32.totalorder %s8949_s26, %s11803_s11 }
 0x7b1   : > { %p8951_p1 = pnand %p8950_p0, %p9229_p5 }
 0x7b2   : > { %p8956_p7 = por %p8955_p4, %p8954_p3 }
 0x7b3   : > { %p8952_p2 = pneg %p8951_p1 }
 0x7b4   : > { %p8958_p9 = por %p8957_p8, %p8956_p7 }
 0x7b6   : > { %p8959_p10 = pnand %p8958_p9, %p8952_p2 }
 0x7b8   : > { %8962 = shalt.err (!%p8959_p10)
}
 0x7b9   : > { %s12167_s1 = smov 128   ;;  %s6344_s30 = sshll.u32 %s11661_s2, 4  ;;  %s11836_s30 = int_to_ptr.vmem [resolvable:$true] %s6344_s30 }
 0x7ba   : > { %8780 = dma.vmem_to_hbm [thread:$0]  (%p9229_p5), %s11805_s19, 4096, %s11803_s11, %s6273_s25, %s12167_s1, %s12167_s1, %s9101_s9  }
 0x7bb   : > { %s7088_s20 = sshll.u32 %s9210_s22, 4  ;;  %s8963_s4 = scalar_lea.vmem %s11836_s30, 1024 }
 0x7bc   : > { %s11843_s0 = scalar_lea.hbm %s11958_s14, %s7088_s20  ;;  %p8964_p11 = scmp.ne.s32.totalorder %s11836_s30, %s8963_s4 }
 0x7bd   : > { %s9106_s7 = smov [#allocation6]  }
 0x7be   : > { %p8965_p12 = pnand %p8964_p11, %p9229_p5  ;;  %s8967_s19 = sshll.u32 %s9106_s7, 4  ;;  %s8968_s19 = int_to_ptr.vmem [resolvable:$false] %s8967_s19 }
 0x7bf   : > { %s8969_s2 = scalar_lea.vmem %s8968_s19, 2048  ;;  %p8970_p0 = scmp.lt.s32.totalorder %s11836_s30, %s8968_s19 }
 0x7c0   : > { %p8966_p13 = pneg %p8965_p12  ;;  %p8971_p1 = scmp.lt.s32.totalorder %s8969_s2, %s8963_s4 }
 0x7c2   : > { %p8972_p2 = por %p8971_p1, %p8970_p0 }
 0x7c4   : > { %p8973_p3 = pnand %p8972_p2, %p8966_p13 }
 0x7c6   : > { %8976 = shalt.err (!%p8973_p3)
}
 0x7c7   : > { %s8977_s11 = scalar_lea.hbm %s11761_s3, 1024  ;;  %s8981_s27 = scalar_lea.hbm %s11956_s12, 2048 }
 0x7c8   : > { %p8978_p4 = scmp.ne.s32.totalorder %s11761_s3, %s8977_s11  ;;  %p8982_p9 = scmp.lt.u32.totalorder %s11761_s3, %s11956_s12 }
 0x7c9   : > { %p8983_p10 = scmp.lt.u32.totalorder %s8981_s27, %s8977_s11  ;;  %p8985_p12 = scmp.lt.u32.totalorder %s8977_s11, %s11761_s3 }
 0x7ca   : > { %p8979_p7 = pnand %p8978_p4, %p9229_p5 }
 0x7cb   : > { %p8984_p11 = por %p8983_p10, %p8982_p9 }
 0x7cc   : > { %p8980_p8 = pneg %p8979_p7 }
 0x7cd   : > { %p8986_p13 = por %p8985_p12, %p8984_p11 }
 0x7cf   : > { %p8987_p0 = pnand %p8986_p13, %p8980_p8 }
 0x7d1   : > { %8990 = shalt.err (!%p8987_p0)
}
 0x7d2   : > { %8782 = dma.vmem_to_hbm [thread:$0]  (%p9229_p5), %s11836_s30, 1024, %s11761_s3, %s11729_s6, %s12167_s1, %s12167_s1, %s9101_s9  }
 0x7d3   : > { %s12168_s4 = scalar_lea.vmem [#allocation9], %s11202_s16  ;;  %s9107_s2 = smov [#allocation9]  }
 0x7d4   : > { %s6376_s7 = sshll.u32 %s12168_s4, 4  ;;  %s8995_s11 = sshll.u32 %s9107_s2, 4  ;;  %s6377_s7 = int_to_ptr.vmem [resolvable:$true] %s6376_s7  ;;  %s8996_s11 = int_to_ptr.vmem [resolvable:$false] %s8995_s11 }
 0x7d5   : > { %s8991_s19 = scalar_lea.vmem %s6377_s7, 16  ;;  %s8997_s25 = scalar_lea.vmem %s8996_s11, 32 }
 0x7d6   : > { %p8992_p1 = scmp.ne.s32.totalorder %s6377_s7, %s8991_s19  ;;  %p8998_p4 = scmp.lt.s32.totalorder %s6377_s7, %s8996_s11 }
 0x7d7   : > { %p8999_p7 = scmp.lt.s32.totalorder %s8997_s25, %s8991_s19 }
 0x7d8   : > { %p8993_p2 = pnand %p8992_p1, %p9229_p5 }
 0x7d9   : > { %p9000_p8 = por %p8999_p7, %p8998_p4 }
 0x7da   : > { %p8994_p3 = pneg %p8993_p2 }
 0x7dc   : > { %p9001_p9 = pnand %p9000_p8, %p8994_p3 }
 0x7de   : > { %9004 = shalt.err (!%p9001_p9)
}
 0x7df   : > { %s9005_s6 = scalar_lea.hbm %s11843_s0, 16  ;;  %s9009_s1 = scalar_lea.hbm %s11958_s14, 32 }
 0x7e0   : > { %p9006_p10 = scmp.ne.s32.totalorder %s11843_s0, %s9005_s6  ;;  %p9010_p13 = scmp.lt.u32.totalorder %s11843_s0, %s11958_s14 }
 0x7e1   : > { %p9011_p0 = scmp.lt.u32.totalorder %s9009_s1, %s9005_s6  ;;  %p9013_p2 = scmp.lt.u32.totalorder %s9005_s6, %s11843_s0 }
 0x7e2   : > { %p9007_p11 = pnand %p9006_p10, %p9229_p5 }
 0x7e3   : > { %p9012_p1 = por %p9011_p0, %p9010_p13 }
 0x7e4   : > { %p9008_p12 = pneg %p9007_p11 }
 0x7e5   : > { %p9014_p3 = por %p9013_p2, %p9012_p1 }
 0x7e7   : > { %p9015_p4 = pnand %p9014_p3, %p9008_p12 }
 0x7e9   : > { %9018 = shalt.err (!%p9015_p4)
}
 0x7ea   : > { %8784 = dma.vmem_to_hbm [thread:$0]  (%p9229_p5), %s6377_s7, 16, %s11843_s0, %s11774_s5   ;;  %v6190_v14 = vld [vmem:[%s11952_s8] sm:$0x1]  ;;  %vm6265_vm12 = vcmask 73728  }
 0x7eb   : > { %s537_s26 = scalar_lea.vmem [#allocation10], %s11202_s16  ;;  %s11899_s11 = scalar_lea.hbm %s11959_s15, %s7088_s20 }
 0x7ec   : > { %s6389_s4 = sshll.u32 %s537_s26, 4  ;;  %s6297_s5 = scalar_lea.sflag [#allocation11], %s11202_s16  ;;  %s11901_s4 = int_to_ptr.vmem [resolvable:$true] %s6389_s4 }
 0x7ed   : > { %s9019_s0 = scalar_lea.vmem %s11901_s4, 16  ;;  %s9108_s7 = smov [#allocation10]  }
 0x7ee   : > { %p9020_p7 = scmp.ne.s32.totalorder %s11901_s4, %s9019_s0  ;;  %s9023_s25 = sshll.u32 %s9108_s7, 4  ;;  %s9024_s25 = int_to_ptr.vmem [resolvable:$false] %s9023_s25 }
 0x7ef   : > { %s9025_s22 = scalar_lea.vmem %s9024_s25, 32  ;;  %p9026_p10 = scmp.lt.s32.totalorder %s11901_s4, %s9024_s25 }
 0x7f0   : > { %p9021_p8 = pnand %p9020_p7, %p9229_p5  ;;  %p9027_p11 = scmp.lt.s32.totalorder %s9025_s22, %s9019_s0 }
 0x7f2   : > { %p9022_p9 = pneg %p9021_p8  ;;  %p9028_p12 = por %p9027_p11, %p9026_p10 }
 0x7f4   : > { %p9029_p13 = pnand %p9028_p12, %p9022_p9 }
 0x844   : > { %v6260_v58 = vpop.f32.mrb[68].mxu1 }
 0x845   : > { %v6261_v55 = vadd.f32 %v6260_v58, %v6190_v14  ;;  %v8193_v46 = vpop.f32.mrb[69].mxu1 }
 0x847   : > { %v6264_v6 = vmul.f32 0.125, %v6261_v55 }
 0x849   : > { %6266 = vst.msk [vmem:[%s537_s26] sm:$0x1] %vm6265_vm12, %v6264_v6 }
 0x84a   : > { %9032 = shalt.err (!%p9029_p13)
}
 0x84b   : > { %s9033_s16 = scalar_lea.hbm %s11899_s11, 16  ;;  %s9037_s9 = scalar_lea.hbm %s11959_s15, 32 }
 0x84c   : > { %p9034_p0 = scmp.ne.s32.totalorder %s11899_s11, %s9033_s16  ;;  %p9038_p3 = scmp.lt.u32.totalorder %s11899_s11, %s11959_s15 }
 0x84d   : > { %p9039_p4 = scmp.lt.u32.totalorder %s9037_s9, %s9033_s16  ;;  %p9041_p8 = scmp.lt.u32.totalorder %s9033_s16, %s11899_s11 }
 0x84e   : > { %p9035_p1 = pnand %p9034_p0, %p9229_p5 }
 0x84f   : > { %p9040_p7 = por %p9039_p4, %p9038_p3 }
 0x850   : > { %p9036_p2 = pneg %p9035_p1 }
 0x851   : > { %p9042_p9 = por %p9041_p8, %p9040_p7 }
 0x853   : > { %p9043_p10 = pnand %p9042_p9, %p9036_p2 }
 0x855   : > { %9046 = shalt.err (!%p9043_p10)
}
 0x856   : > { %8785 = dma.vmem_to_hbm [thread:$0]  (%p9229_p5), %s11901_s4, 16, %s11899_s11, %s6297_s5  }
 0x857 PF: > { %p8811_p11 = scmp.ge.s32.totalorder %s9093_s21, 2  ;;  %s6409_s30 = sand.u32 1, %s9081_s18  }
 0x858   : > { %s6410_s17 = scalar_lea.sflag [#allocation3], %s6409_s30 }
 0x859   : > { %p8793_p12 = pnand %p8811_p11, %p9233_p6 }
 0x85b   : > { %9064 = dma.done.wait (!%p8793_p12), %s6410_s17, 4096  }
 0x85c   : > { %9066 = vsyncadd (!%p8793_p12), %s6410_s17, 4294963200  ;;  %s12169_s27 = sadd.s32 4294967294, %s9093_s21  }
 0x85d   : > { %s6418_s23 = sand.u32 1, %s12169_s27  }
 0x85e   : > { %s6419_s26 = scalar_lea.sflag [#allocation5], %s6418_s23 }
 0x85f   : > { %9068 = dma.done.wait (!%p8793_p12), %s6419_s26, 2048  }
 0x860   : > { %9070 = vsyncadd (!%p8793_p12), %s6419_s26, 4294965248  ;;  %s6437_s28 = scalar_lea.sflag [#allocation8], %s6418_s23 }
 0x861   : > { %9072 = dma.done.wait (!%p8793_p12), %s6437_s28, 272  }
 0x862   : > { %9074 = vsyncadd (!%p8793_p12), %s6437_s28, 4294967024  ;;  %s6454_s4 = scalar_lea.sflag [#allocation11], %s6409_s30 }
 0x863   : > { %9076 = dma.done.wait (!%p8793_p12), %s6454_s4, 16  }
 0x864   : > { %9078 = vsyncadd (!%p8793_p12), %s6454_s4, 4294967280  ;;  %s12170_s18 = sld [smem:[#allocation16_spill]]  ;;  %s12171_s19 = sld [smem:[#allocation17_spill]] }
 0x865   : > { %s12172_s20 = sld [smem:[#allocation18_spill]]  ;;  %p35_p5 = scmp.ge.s32.totalorder %s9214_s24, 4  }
 0x866   : > { %s12173_s21 = smov %s9214_s24 }
 0x867   :  { %37 = sbr.rel (!%p35_p5) target bundleno = 20 (0x14), region = 254 }
 0x86e   :  { %6458 = vsyncpa [#allocation3], 1 }
 0x86f   :  { %6460 = vsyncpa [#allocation3 + $0x1], 1 }
 0x870   :  { %6461 = vsyncpa [#allocation5], 1 }
 0x871   :  { %6463 = vsyncpa [#allocation5 + $0x1], 1 }
 0x872   :  { %6464 = vsyncpa [#allocation8], 1 }
 0x873   :  { %6466 = vsyncpa [#allocation8 + $0x1], 1 }
 0x874   :  { %6467 = vsyncpa [#allocation11], 1 }
 0x875   :  { %6469 = vsyncpa [#allocation11 + $0x1], 1 }

</bundles_post_ra>
